<compile_context>
chip_gen: v6e
topology: v6e:2x2x1
jax: 0.10.0
libtpu: 0.0.40
codegen_flags: <defaults>
</compile_context>

<pallas_src>
import functools

import numpy as np
import jax
import jax.numpy as jnp
from jax.experimental import pallas as pl
from jax.experimental.pallas import tpu as pltpu

VMEM_SPEC = pl.BlockSpec(memory_space=pltpu.MemorySpace.VMEM)


# ----------------------------------------------------------------------------
# Single fused Pallas kernel: LSTM encoder + graph stage + classifier
# ----------------------------------------------------------------------------

def _fused_forward_kernel(u_ref, wih1_ref, b1_ref, whh1f_ref, whh1b_ref,
                          wih2_ref, b2_ref, whh2f_ref, whh2b_ref,
                          pperm_ref, ucol_ref, urow_ref, bmask_ref,
                          attw_ref, em_ref, emc_ref, rrep_ref,
                          adjrel_ref, adjunw_ref,
                          wcat_ref, rootw_ref, rootb_ref,
                          gcw_ref, gclw_ref, gclb_ref,
                          matw_ref, matb_ref, linw_ref, linb_ref,
                          fcw_ref, fcb_ref,
                          logp_ref, sc_ref,
                          lay1_sc, lay2_sc, *, T, B, H, nr, G):
    f32 = jnp.float32
    H4 = 4 * H

    # -------------------- 2-layer bidirectional LSTM --------------------
    # TODO(synk): nn.LSTM inter-layer dropout and nn.Dropout are identity (eval mode).
    def lstm_cell(xg, h, c, whh):
        # xg: (B, 4H) precomputed x @ W_ih + b; one (B,H)x(H,4H) recurrent GEMM.
        g = xg + jnp.dot(h, whh, preferred_element_type=f32)
        gi = jax.nn.sigmoid(g[:, 0:H])
        gf = jax.nn.sigmoid(g[:, H:2 * H])
        gg = jnp.tanh(g[:, 2 * H:3 * H])
        go = jax.nn.sigmoid(g[:, 3 * H:4 * H])
        c_new = gf * c + gi * gg
        return go * jnp.tanh(c_new), c_new

    def bilstm(x_flat, wih, bias, whh_f, whh_b, out_sc):
        # x_flat: (T*B, Din), rows ordered t*B + b.  Hoisted lane-dense (8H==128)
        # input projection for the whole sequence and both directions:
        xp = jnp.dot(x_flat, wih, preferred_element_type=f32) + bias      # (T*B, 8H)
        h_f = jnp.zeros((B, H), f32)
        c_f = jnp.zeros((B, H), f32)
        h_b = jnp.zeros((B, H), f32)
        c_b = jnp.zeros((B, H), f32)
        for s in range(T):                                   # static unroll of recurrence
            h_f, c_f = lstm_cell(xp[s * B:(s + 1) * B, 0:H4], h_f, c_f, whh_f)
            out_sc[s * B:(s + 1) * B, 0:H] = h_f
            tb = T - 1 - s                                   # backward direction
            h_b, c_b = lstm_cell(xp[tb * B:(tb + 1) * B, H4:2 * H4], h_b, c_b, whh_b)
            out_sc[tb * B:(tb + 1) * B, H:2 * H] = h_b
        return out_sc[...]                                   # (T*B, 2H)

    out1 = bilstm(u_ref[...], wih1_ref[...], b1_ref[...],
                  whh1f_ref[...], whh1b_ref[...], lay1_sc)
    out2 = bilstm(out1, wih2_ref[...], b2_ref[...],
                  whh2f_ref[...], whh2b_ref[...], lay2_sc)

    # Row permutation (t*B + b) -> (b*T + t) with one tiny MXU GEMM.
    x = jnp.dot(pperm_ref[...], out2, preferred_element_type=f32)          # (BP, 2H)

    # -------------------- MaskedEdgeAttention -> dense edge scores --------------------
    scale = jnp.dot(x, attw_ref[...], preferred_element_type=f32)          # (BP, msl)
    scale = scale - jnp.max(scale, axis=0, keepdims=True)                  # shift-invariant
    ex = jnp.exp(scale)
    bmask = bmask_ref[...]                                                 # (BP, BP) same-batch
    denom = jnp.maximum(jnp.dot(bmask, ex, preferred_element_type=f32), 1e-30)
    alpha = ex * pl.reciprocal(denom, approx=True)                         # softmax over time
    masked = alpha * em_ref[...]                                           # 1e-10 soft edge mask
    ssum = jnp.maximum(jnp.dot(bmask, masked, preferred_element_type=f32), 1e-30)
    scores = masked * pl.reciprocal(ssum, approx=True) * emc_ref[...]      # rows (b,v), cols u
    sc_ref[...] = scores

    # Replicate per-(dst, u) scores to dense (BP, BP) src columns via a static 0/1 GEMM
    # (replaces the previous in-kernel lane concatenation).
    sc_bcast = jnp.dot(scores, rrep_ref[...], preferred_element_type=f32)  # (BP, BP)

    # -------------------- RGCNConv (basis-expanded), scatter-free --------------------
    # One hoisted GEMM for all relation transforms; per-relation aggregation GEMMs use
    # static lane slices of the result.
    xw_all = jnp.dot(x, wcat_ref[...], preferred_element_type=f32)         # (BP, nr*G)
    aggr1 = jnp.zeros((x.shape[0], G), f32)
    for r in range(nr):                                                    # static unroll
        a_r = adjrel_ref[r] * sc_bcast
        aggr1 = aggr1 + jnp.dot(a_r, xw_all[:, r * G:(r + 1) * G],
                                preferred_element_type=f32)
    out_c1 = (aggr1 + jnp.dot(x, rootw_ref[...], preferred_element_type=f32)
              + rootb_ref[...])

    # -------------------- GraphConv --------------------
    h1 = jnp.dot(out_c1, gcw_ref[...], preferred_element_type=f32)
    aggr2 = jnp.dot(adjunw_ref[...], h1, preferred_element_type=f32)
    out_c2 = (aggr2 + jnp.dot(out_c1, gclw_ref[...], preferred_element_type=f32)
              + gclb_ref[...])

    emo = jnp.concatenate([x, out_c2], axis=-1)                            # (BP, D)

    # -------------------- MatchingAttention 'general2' --------------------
    ucol = ucol_ref[...]                                                   # (BP, 1) valid query/mem
    urow = urow_ref[...]                                                   # (1, BP)
    mem_masked = emo * ucol
    xq = jnp.dot(emo, matw_ref[...], preferred_element_type=f32) + matb_ref[...]
    s_att = jax.lax.dot_general(xq, mem_masked, (((1,), (1,)), ((), ())),
                                preferred_element_type=f32)                # (BP, BP), no .T
    s_att = jnp.tanh(s_att * urow)
    kmask = bmask * urow                                                   # same batch AND valid key
    num = jnp.exp(s_att) * kmask
    att_w = num * pl.reciprocal(
        jnp.maximum(jnp.sum(num, axis=-1, keepdims=True), 1e-30), approx=True)
    att = jnp.dot(att_w, emo, preferred_element_type=f32)                  # (BP, D)

    # -------------------- classifier: relu(linear) -> fc (128-lane padded) -> log_softmax
    hid = jnp.maximum(
        jnp.dot(att, linw_ref[...], preferred_element_type=f32) + linb_ref[...], 0.0)
    logits = jnp.dot(hid, fcw_ref[...], preferred_element_type=f32) + fcb_ref[...]  # (BP, 128)
    # Padded lanes carry a -1e30 bias; the max always includes the real class logits,
    # so the log_softmax over the first n_classes lanes is unchanged and finite.
    lmax = jnp.max(logits, axis=-1, keepdims=True)
    lse = lmax + jnp.log(jnp.sum(jnp.exp(logits - lmax), axis=-1, keepdims=True))
    logp_ref[...] = logits - lse


# ----------------------------------------------------------------------------
# Device-side forward (jitted): ONE Pallas launch
# ----------------------------------------------------------------------------

def dialogue_gcn_forward(U, umask, params, static):
    """U: (T, B, D_m); umask: (B, T).  Returns (log_prob, edge_norm)."""
    T, B, D_m = U.shape
    BP = B * T
    lstm = params['lstm']
    H = lstm[0]['whh_f'].shape[0]
    G = params['rgcn_root'].shape[1]
    nr = static['adj_rel'].shape[0]
    msl = static['emask2d'].shape[1]
    nc = params['fc_wT'].shape[1]
    din2 = 2 * H
    D = din2 + G

    u_flat = U.astype(jnp.float32).reshape(T * B, D_m)        # rows ordered t*B + b

    # ---- parameter preprocessing (param-only, fused by XLA around the kernel) ----
    basis = params['rgcn_basis']                              # (nb, din2, G)
    nb = basis.shape[0]
    wstack = jnp.dot(params['rgcn_att'],
                     basis.reshape(nb, din2 * G)).reshape(nr, din2, G)
    wcat = wstack.transpose(1, 0, 2).reshape(din2, nr * G)    # lane-concat of W_r
    fcw_pad = jnp.pad(params['fc_wT'], ((0, 0), (0, 128 - nc)))
    fcb_pad = jnp.pad(params['fc_b'], (0, 128 - nc),
                      constant_values=-1e30).reshape(1, 128)

    umask_f = umask.astype(jnp.float32)
    ucol = umask_f.reshape(BP, 1)
    urow = umask_f.reshape(1, BP)

    flops = 2 * (T * B * D_m * 8 * H + T * B * din2 * 8 * H
                 + 4 * T * B * H * 4 * H
                 + BP * BP * din2
                 + BP * din2 * msl + 2 * BP * BP * msl + BP * msl * BP
                 + BP * din2 * (nr * G) + nr * BP * BP * G
                 + BP * din2 * G + 3 * BP * G * G + BP * BP * G
                 + BP * D * D + 2 * BP * BP * D
                 + BP * D * G + BP * G * 128)
    transc = 4 * T * B * H * 5 + 2 * BP * msl + 3 * BP * BP + BP * 256
    bytes_accessed = 4 * (u_flat.size
                          + 2 * (D_m * 8 * H + 8 * H + 2 * H * 4 * H) + din2 * 8 * H
                          + 3 * BP * BP + 2 * BP + din2 * msl + 2 * BP * msl
                          + msl * BP + nr * BP * BP + din2 * nr * G
                          + din2 * G + G + 3 * G * G + G + D * D + D + D * G + G
                          + G * 128 + 128 + BP * 128 + BP * msl)

    kernel = functools.partial(_fused_forward_kernel, T=T, B=B, H=H, nr=nr, G=G)
    logp_pad, scores = pl.pallas_call(
        kernel,
        out_shape=(jax.ShapeDtypeStruct((BP, 128), jnp.float32),
                   jax.ShapeDtypeStruct((BP, msl), jnp.float32)),
        in_specs=[VMEM_SPEC] * 31,
        out_specs=(VMEM_SPEC, VMEM_SPEC),
        scratch_shapes=[pltpu.VMEM((T * B, 2 * H), jnp.float32),
                        pltpu.VMEM((T * B, 2 * H), jnp.float32)],
        compiler_params=pltpu.CompilerParams(vmem_limit_bytes=32 * 1024 * 1024),
        cost_estimate=pl.CostEstimate(flops=flops, transcendentals=transc,
                                      bytes_accessed=bytes_accessed),
    )(u_flat,
      lstm[0]['wih'], lstm[0]['bias'].reshape(1, -1), lstm[0]['whh_f'], lstm[0]['whh_b'],
      lstm[1]['wih'], lstm[1]['bias'].reshape(1, -1), lstm[1]['whh_f'], lstm[1]['whh_b'],
      static['pperm'], ucol, urow, static['bmask'],
      params['att_scalar_wT'], static['emask2d'], static['emaskc2d'], static['rrep'],
      static['adj_rel'], static['adj_unw'],
      wcat, params['rgcn_root'], params['rgcn_bias'].reshape(1, G),
      params['gc_weight'], params['gc_lin_w'], params['gc_lin_b'].reshape(1, G),
      params['match_wT'], params['match_b'].reshape(1, -1),
      params['lin_wT'], params['lin_b'].reshape(1, G),
      fcw_pad, fcb_pad)

    log_prob = logp_pad[static['valid_idx'], :nc]                  # (N_valid, n_classes)
    edge_norm = scores[static['enorm_rows'], static['enorm_cols']]  # (E,)
    return log_prob, edge_norm


# ----------------------------------------------------------------------------
# Host-side static graph construction (numpy, outside the traced path)
# ----------------------------------------------------------------------------

def edge_perms(l, window_past, window_future):
    perms = []
    for j in range(l):
        lo = 0 if window_past == -1 else max(0, j - window_past)
        hi = l if window_future == -1 else min(l, j + window_future + 1)
        for item in range(lo, hi):
            perms.append((j, item))
    return perms


def build_static(seq_lengths, qmask_np, cfg, T, B):
    n_sp = cfg['n_speakers']
    wp, wf = cfg['window_past'], cfg['window_future']
    msl = cfg['max_seq_len']
    nr = cfg['num_relations']
    assert msl >= max(seq_lengths)
    L = T                                     # pad every conversation to T nodes
    BP = B * L
    speakers = np.argmax(qmask_np, axis=-1)   # (T, B)

    edge_src, edge_dst, edge_type = [], [], []
    enorm_rows, enorm_cols = [], []
    edge_index_lengths = []
    emask2d = np.full((BP, msl), 1e-10, np.float32)   # rows (b, v), cols u
    emaskc2d = np.zeros((BP, msl), np.float32)
    adj_rel = np.zeros((nr, BP, BP), np.float32)      # [rel, dst_flat, src_flat]
    offset = 0
    for b in range(B):
        perms = edge_perms(seq_lengths[b], wp, wf)
        edge_index_lengths.append(len(perms))
        for (u, v) in perms:
            edge_src.append(u + offset)
            edge_dst.append(v + offset)
            s0, s1 = int(speakers[u, b]), int(speakers[v, b])
            rel = 2 * (s0 * n_sp + s1) + (0 if u < v else 1)
            edge_type.append(rel)
            emask2d[b * L + v, u] = 1.0
            emaskc2d[b * L + v, u] = 1.0
            adj_rel[rel, b * L + v, b * L + u] += 1.0
            enorm_rows.append(b * L + v)
            enorm_cols.append(u)
        offset += seq_lengths[b]

    adj_unw = adj_rel.sum(axis=0)
    bmask = np.zeros((BP, BP), np.float32)
    pperm = np.zeros((BP, BP), np.float32)            # (t*B+b) -> (b*T+t) row permutation
    rrep = np.zeros((msl, BP), np.float32)            # score column replication matrix
    for b in range(B):
        bmask[b * L:(b + 1) * L, b * L:(b + 1) * L] = 1.0
        for t in range(L):
            pperm[b * L + t, t * B + b] = 1.0
            if t < msl:
                rrep[t, b * L + t] = 1.0
    valid_idx = np.array([b * L + t for b in range(B) for t in range(seq_lengths[b])],
                         np.int32)

    static = dict(
        emask2d=emask2d, emaskc2d=emaskc2d, adj_rel=adj_rel, adj_unw=adj_unw,
        bmask=bmask, pperm=pperm, rrep=rrep, valid_idx=valid_idx,
        enorm_rows=np.array(enorm_rows, np.int32),
        enorm_cols=np.array(enorm_cols, np.int32),
    )
    edge_index = np.stack([np.array(edge_src, np.int32),
                           np.array(edge_dst, np.int32)], axis=0)
    edge_type = np.array(edge_type, np.int32)
    return static, edge_index, edge_type, edge_index_lengths


# ----------------------------------------------------------------------------
# Parameter init (PyTorch layouts, converted to kernel-friendly layouts)
# ----------------------------------------------------------------------------

def make_params(key, cfg):
    D_m, D_e, G = cfg['D_m'], cfg['D_e'], cfg['graph_hidden']
    msl, nr, nb, nc = cfg['max_seq_len'], cfg['num_relations'], cfg['num_bases'], cfg['n_classes']
    D = 2 * D_e + G
    keys = iter(jax.random.split(key, 64))

    def init(shape, scale=0.1):
        return jax.random.normal(next(keys), shape, jnp.float32) * scale

    lstm_layers = []
    for l in range(2):
        din = D_m if l == 0 else 2 * D_e
        wih_dirs, bias_dirs, whh_dirs = [], [], []
        for _d in range(2):                          # forward, backward
            wih = init((4 * D_e, din))               # PyTorch weight_ih_l{l}[_reverse]
            whh = init((4 * D_e, D_e))               # PyTorch weight_hh_l{l}[_reverse]
            b_ih = init((4 * D_e,))
            b_hh = init((4 * D_e,))
            wih_dirs.append(wih.T)                   # (din, 4H), gate cols i,f,g,o
            bias_dirs.append(b_ih + b_hh)
            whh_dirs.append(whh.T)                   # (H, 4H), gate cols i,f,g,o
        lstm_layers.append({
            'wih': jnp.concatenate(wih_dirs, axis=1),       # (din, 8H), lane-dense 128
            'bias': jnp.concatenate(bias_dirs, axis=0),     # (8H,)
            'whh_f': whh_dirs[0],                           # (H, 4H)
            'whh_b': whh_dirs[1],                           # (H, 4H)
        })

    return {
        'lstm': lstm_layers,
        'att_scalar_wT': init((msl, 2 * D_e)).T,     # MaskedEdgeAttention.scalar (no bias)
        'rgcn_basis': init((nb, 2 * D_e, G)),
        'rgcn_att': init((nr, nb)),
        'rgcn_root': init((2 * D_e, G)),
        'rgcn_bias': init((G,)),
        'gc_weight': init((G, G)),
        'gc_lin_w': init((G, G)),
        'gc_lin_b': init((G,)),
        'match_wT': init((D, D)),
        'match_b': init((D,)),
        'lin_wT': init((D, G)),
        'lin_b': init((G,)),
        'fc_wT': init((G, nc)),
        'fc_b': init((nc,)),
    }


# ----------------------------------------------------------------------------
# main
# ----------------------------------------------------------------------------

if __name__ == "__main__":
    cfg = dict(D_m=32, D_e=16, graph_hidden=32, n_speakers=2, max_seq_len=8,
               window_past=2, window_future=2, n_classes=7,
               num_relations=2 * 2 ** 2, num_bases=30)
    T, B = 8, 2
    seq_lengths = [8, 6]

    key = jax.random.PRNGKey(0)
    kU, kP = jax.random.split(key)
    U = jax.random.normal(kU, (T, B, cfg['D_m']), jnp.float32)

    speakers = (np.arange(T)[:, None] + np.arange(B)[None, :]) % cfg['n_speakers']
    qmask_np = np.eye(cfg['n_speakers'], dtype=np.float32)[speakers]        # (T, B, n_speakers)
    umask = jnp.asarray(np.array([[1.0] * l + [0.0] * (T - l) for l in seq_lengths],
                                 np.float32))                               # (B, T)

    params = make_params(kP, cfg)
    static_np, edge_index_np, edge_type_np, edge_index_lengths = build_static(
        seq_lengths, qmask_np, cfg, T, B)
    static = {k: jnp.asarray(v) for k, v in static_np.items()}

    fwd = jax.jit(dialogue_gcn_forward)
    log_prob, edge_norm = fwd(U, umask, params, static)
    jax.block_until_ready(log_prob)
    jax.block_until_ready(edge_norm)

    edge_index = jnp.asarray(edge_index_np)
    edge_type = jnp.asarray(edge_type_np)

    assert log_prob.shape == (sum(seq_lengths), cfg['n_classes'])
    assert edge_index.shape == (2, sum(edge_index_lengths))
    assert edge_norm.shape == (sum(edge_index_lengths),)
    assert edge_type.shape == (sum(edge_index_lengths),)
    assert bool(jnp.all(jnp.isfinite(log_prob)))
    assert bool(jnp.all(jnp.isfinite(edge_norm)))
    print("KERNEL_OK")
</pallas_src>

<mosaic_0001>
module attributes {stable_mosaic.version = 11 : i64} {
  func.func @_fused_forward_kernel(%arg0: memref<16x32xf32, #tpu.memory_space<vmem>>, %arg1: memref<32x128xf32, #tpu.memory_space<vmem>>, %arg2: memref<1x128xf32, #tpu.memory_space<vmem>>, %arg3: memref<16x64xf32, #tpu.memory_space<vmem>>, %arg4: memref<16x64xf32, #tpu.memory_space<vmem>>, %arg5: memref<32x128xf32, #tpu.memory_space<vmem>>, %arg6: memref<1x128xf32, #tpu.memory_space<vmem>>, %arg7: memref<16x64xf32, #tpu.memory_space<vmem>>, %arg8: memref<16x64xf32, #tpu.memory_space<vmem>>, %arg9: memref<16x16xf32, #tpu.memory_space<vmem>>, %arg10: memref<16x1xf32, #tpu.memory_space<vmem>>, %arg11: memref<1x16xf32, #tpu.memory_space<vmem>>, %arg12: memref<16x16xf32, #tpu.memory_space<vmem>>, %arg13: memref<32x8xf32, #tpu.memory_space<vmem>>, %arg14: memref<16x8xf32, #tpu.memory_space<vmem>>, %arg15: memref<16x8xf32, #tpu.memory_space<vmem>>, %arg16: memref<8x16xf32, #tpu.memory_space<vmem>>, %arg17: memref<8x16x16xf32, #tpu.memory_space<vmem>>, %arg18: memref<16x16xf32, #tpu.memory_space<vmem>>, %arg19: memref<32x256xf32, #tpu.memory_space<vmem>>, %arg20: memref<32x32xf32, #tpu.memory_space<vmem>>, %arg21: memref<1x32xf32, #tpu.memory_space<vmem>>, %arg22: memref<32x32xf32, #tpu.memory_space<vmem>>, %arg23: memref<32x32xf32, #tpu.memory_space<vmem>>, %arg24: memref<1x32xf32, #tpu.memory_space<vmem>>, %arg25: memref<64x64xf32, #tpu.memory_space<vmem>>, %arg26: memref<1x64xf32, #tpu.memory_space<vmem>>, %arg27: memref<64x32xf32, #tpu.memory_space<vmem>>, %arg28: memref<1x32xf32, #tpu.memory_space<vmem>>, %arg29: memref<32x128xf32, #tpu.memory_space<vmem>>, %arg30: memref<1x128xf32, #tpu.memory_space<vmem>>, %arg31: memref<16x128xf32, #tpu.memory_space<vmem>>, %arg32: memref<16x8xf32, #tpu.memory_space<vmem>>, %arg33: memref<16x32xf32, #tpu.memory_space<vmem>>, %arg34: memref<16x32xf32, #tpu.memory_space<vmem>>) attributes {dimension_semantics = [], scalar_prefetch = 0 : i64, scratch_operands = 2 : i64, tpu.core_type = #tpu.core_type<tc>} {
    %c0 = arith.constant 0 : index
    %c0_0 = arith.constant 0 : index
    %0 = vector.load %arg0[%c0, %c0_0] : memref<16x32xf32, #tpu.memory_space<vmem>>, vector<16x32xf32>
    %c0_1 = arith.constant 0 : index
    %c0_2 = arith.constant 0 : index
    %1 = vector.load %arg1[%c0_1, %c0_2] : memref<32x128xf32, #tpu.memory_space<vmem>>, vector<32x128xf32>
    %c0_3 = arith.constant 0 : index
    %c0_4 = arith.constant 0 : index
    %2 = vector.load %arg2[%c0_3, %c0_4] : memref<1x128xf32, #tpu.memory_space<vmem>>, vector<1x128xf32>
    %c0_5 = arith.constant 0 : index
    %c0_6 = arith.constant 0 : index
    %3 = vector.load %arg3[%c0_5, %c0_6] : memref<16x64xf32, #tpu.memory_space<vmem>>, vector<16x64xf32>
    %c0_7 = arith.constant 0 : index
    %c0_8 = arith.constant 0 : index
    %4 = vector.load %arg4[%c0_7, %c0_8] : memref<16x64xf32, #tpu.memory_space<vmem>>, vector<16x64xf32>
    %cst = arith.constant dense<0.000000e+00> : vector<16x128xf32>
    %5 = tpu.matmul %0, %1, %cst {dimension_numbers = #tpu.dot_dimension_numbers<[1], [0], [0], [1], [0, 0, 1, 1], [], []>} : vector<16x32xf32>, vector<32x128xf32>, vector<16x128xf32> -> vector<16x128xf32>
    %6 = vector.broadcast %2 : vector<1x128xf32> to vector<16x128xf32>
    %7 = arith.addf %5, %6 : vector<16x128xf32>
    %cst_9 = arith.constant 0.000000e+00 : f32
    %8 = vector.broadcast %cst_9 : f32 to vector<2x16xf32>
    %cst_10 = arith.constant 0.000000e+00 : f32
    %9 = vector.broadcast %cst_10 : f32 to vector<2x16xf32>
    %cst_11 = arith.constant 0.000000e+00 : f32
    %10 = vector.broadcast %cst_11 : f32 to vector<2x16xf32>
    %cst_12 = arith.constant 0.000000e+00 : f32
    %11 = vector.broadcast %cst_12 : f32 to vector<2x16xf32>
    %12 = vector.extract_strided_slice %7 {offsets = [0, 0], sizes = [2, 64], strides = [1, 1]} : vector<16x128xf32> to vector<2x64xf32>
    %cst_13 = arith.constant dense<0.000000e+00> : vector<2x64xf32>
    %13 = tpu.matmul %8, %3, %cst_13 {dimension_numbers = #tpu.dot_dimension_numbers<[1], [0], [0], [1], [0, 0, 1, 1], [], []>} : vector<2x16xf32>, vector<16x64xf32>, vector<2x64xf32> -> vector<2x64xf32>
    %14 = arith.addf %12, %13 : vector<2x64xf32>
    %15 = vector.extract_strided_slice %14 {offsets = [0, 0], sizes = [2, 16], strides = [1, 1]} : vector<2x64xf32> to vector<2x16xf32>
    %16 = arith.negf %15 : vector<2x16xf32>
    %17 = math.exp %16 : vector<2x16xf32>
    %cst_14 = arith.constant 1.000000e+00 : f32
    %18 = vector.broadcast %cst_14 : f32 to vector<2x16xf32>
    %19 = arith.addf %18, %17 : vector<2x16xf32>
    %20 = arith.divf %18, %19 : vector<2x16xf32>
    %21 = vector.extract_strided_slice %14 {offsets = [0, 16], sizes = [2, 16], strides = [1, 1]} : vector<2x64xf32> to vector<2x16xf32>
    %22 = arith.negf %21 : vector<2x16xf32>
    %23 = math.exp %22 : vector<2x16xf32>
    %cst_15 = arith.constant 1.000000e+00 : f32
    %24 = vector.broadcast %cst_15 : f32 to vector<2x16xf32>
    %25 = arith.addf %24, %23 : vector<2x16xf32>
    %26 = arith.divf %24, %25 : vector<2x16xf32>
    %27 = vector.extract_strided_slice %14 {offsets = [0, 32], sizes = [2, 16], strides = [1, 1]} : vector<2x64xf32> to vector<2x16xf32>
    %28 = math.tanh %27 : vector<2x16xf32>
    %29 = vector.extract_strided_slice %14 {offsets = [0, 48], sizes = [2, 16], strides = [1, 1]} : vector<2x64xf32> to vector<2x16xf32>
    %30 = arith.negf %29 : vector<2x16xf32>
    %31 = math.exp %30 : vector<2x16xf32>
    %cst_16 = arith.constant 1.000000e+00 : f32
    %32 = vector.broadcast %cst_16 : f32 to vector<2x16xf32>
    %33 = arith.addf %32, %31 : vector<2x16xf32>
    %34 = arith.divf %32, %33 : vector<2x16xf32>
    %35 = arith.mulf %26, %9 : vector<2x16xf32>
    %36 = arith.mulf %20, %28 : vector<2x16xf32>
    %37 = arith.addf %35, %36 : vector<2x16xf32>
    %38 = math.tanh %37 : vector<2x16xf32>
    %39 = arith.mulf %34, %38 : vector<2x16xf32>
    %c0_17 = arith.constant 0 : index
    %c0_18 = arith.constant 0 : index
    %40 = vector.load %arg33[%c0_17, %c0_18] : memref<16x32xf32, #tpu.memory_space<vmem>>, vector<2x16xf32>
    tpu.vector_store %arg33[%c0_17, %c0_18], %39 {strides = array<i32>} : memref<16x32xf32, #tpu.memory_space<vmem>>, vector<2x16xf32>,
    %41 = vector.extract_strided_slice %7 {offsets = [14, 64], sizes = [2, 64], strides = [1, 1]} : vector<16x128xf32> to vector<2x64xf32>
    %cst_19 = arith.constant dense<0.000000e+00> : vector<2x64xf32>
    %42 = tpu.matmul %10, %4, %cst_19 {dimension_numbers = #tpu.dot_dimension_numbers<[1], [0], [0], [1], [0, 0, 1, 1], [], []>} : vector<2x16xf32>, vector<16x64xf32>, vector<2x64xf32> -> vector<2x64xf32>
    %43 = arith.addf %41, %42 : vector<2x64xf32>
    %44 = vector.extract_strided_slice %43 {offsets = [0, 0], sizes = [2, 16], strides = [1, 1]} : vector<2x64xf32> to vector<2x16xf32>
    %45 = arith.negf %44 : vector<2x16xf32>
    %46 = math.exp %45 : vector<2x16xf32>
    %cst_20 = arith.constant 1.000000e+00 : f32
    %47 = vector.broadcast %cst_20 : f32 to vector<2x16xf32>
    %48 = arith.addf %47, %46 : vector<2x16xf32>
    %49 = arith.divf %47, %48 : vector<2x16xf32>
    %50 = vector.extract_strided_slice %43 {offsets = [0, 16], sizes = [2, 16], strides = [1, 1]} : vector<2x64xf32> to vector<2x16xf32>
    %51 = arith.negf %50 : vector<2x16xf32>
    %52 = math.exp %51 : vector<2x16xf32>
    %cst_21 = arith.constant 1.000000e+00 : f32
    %53 = vector.broadcast %cst_21 : f32 to vector<2x16xf32>
    %54 = arith.addf %53, %52 : vector<2x16xf32>
    %55 = arith.divf %53, %54 : vector<2x16xf32>
    %56 = vector.extract_strided_slice %43 {offsets = [0, 32], sizes = [2, 16], strides = [1, 1]} : vector<2x64xf32> to vector<2x16xf32>
    %57 = math.tanh %56 : vector<2x16xf32>
    %58 = vector.extract_strided_slice %43 {offsets = [0, 48], sizes = [2, 16], strides = [1, 1]} : vector<2x64xf32> to vector<2x16xf32>
    %59 = arith.negf %58 : vector<2x16xf32>
    %60 = math.exp %59 : vector<2x16xf32>
    %cst_22 = arith.constant 1.000000e+00 : f32
    %61 = vector.broadcast %cst_22 : f32 to vector<2x16xf32>
    %62 = arith.addf %61, %60 : vector<2x16xf32>
    %63 = arith.divf %61, %62 : vector<2x16xf32>
    %64 = arith.mulf %55, %11 : vector<2x16xf32>
    %65 = arith.mulf %49, %57 : vector<2x16xf32>
    %66 = arith.addf %64, %65 : vector<2x16xf32>
    %67 = math.tanh %66 : vector<2x16xf32>
    %68 = arith.mulf %63, %67 : vector<2x16xf32>
    %c14 = arith.constant 14 : index
    %c16 = arith.constant 16 : index
    %69 = vector.load %arg33[%c14, %c16] : memref<16x32xf32, #tpu.memory_space<vmem>>, vector<2x16xf32>
    tpu.vector_store %arg33[%c14, %c16], %68 {strides = array<i32>} : memref<16x32xf32, #tpu.memory_space<vmem>>, vector<2x16xf32>,
    %70 = vector.extract_strided_slice %7 {offsets = [2, 0], sizes = [2, 64], strides = [1, 1]} : vector<16x128xf32> to vector<2x64xf32>
    %cst_23 = arith.constant dense<0.000000e+00> : vector<2x64xf32>
    %71 = tpu.matmul %39, %3, %cst_23 {dimension_numbers = #tpu.dot_dimension_numbers<[1], [0], [0], [1], [0, 0, 1, 1], [], []>} : vector<2x16xf32>, vector<16x64xf32>, vector<2x64xf32> -> vector<2x64xf32>
    %72 = arith.addf %70, %71 : vector<2x64xf32>
    %73 = vector.extract_strided_slice %72 {offsets = [0, 0], sizes = [2, 16], strides = [1, 1]} : vector<2x64xf32> to vector<2x16xf32>
    %74 = arith.negf %73 : vector<2x16xf32>
    %75 = math.exp %74 : vector<2x16xf32>
    %cst_24 = arith.constant 1.000000e+00 : f32
    %76 = vector.broadcast %cst_24 : f32 to vector<2x16xf32>
    %77 = arith.addf %76, %75 : vector<2x16xf32>
    %78 = arith.divf %76, %77 : vector<2x16xf32>
    %79 = vector.extract_strided_slice %72 {offsets = [0, 16], sizes = [2, 16], strides = [1, 1]} : vector<2x64xf32> to vector<2x16xf32>
    %80 = arith.negf %79 : vector<2x16xf32>
    %81 = math.exp %80 : vector<2x16xf32>
    %cst_25 = arith.constant 1.000000e+00 : f32
    %82 = vector.broadcast %cst_25 : f32 to vector<2x16xf32>
    %83 = arith.addf %82, %81 : vector<2x16xf32>
    %84 = arith.divf %82, %83 : vector<2x16xf32>
    %85 = vector.extract_strided_slice %72 {offsets = [0, 32], sizes = [2, 16], strides = [1, 1]} : vector<2x64xf32> to vector<2x16xf32>
    %86 = math.tanh %85 : vector<2x16xf32>
    %87 = vector.extract_strided_slice %72 {offsets = [0, 48], sizes = [2, 16], strides = [1, 1]} : vector<2x64xf32> to vector<2x16xf32>
    %88 = arith.negf %87 : vector<2x16xf32>
    %89 = math.exp %88 : vector<2x16xf32>
    %cst_26 = arith.constant 1.000000e+00 : f32
    %90 = vector.broadcast %cst_26 : f32 to vector<2x16xf32>
    %91 = arith.addf %90, %89 : vector<2x16xf32>
    %92 = arith.divf %90, %91 : vector<2x16xf32>
    %93 = arith.mulf %84, %37 : vector<2x16xf32>
    %94 = arith.mulf %78, %86 : vector<2x16xf32>
    %95 = arith.addf %93, %94 : vector<2x16xf32>
    %96 = math.tanh %95 : vector<2x16xf32>
    %97 = arith.mulf %92, %96 : vector<2x16xf32>
    %c2 = arith.constant 2 : index
    %c0_27 = arith.constant 0 : index
    %98 = vector.load %arg33[%c2, %c0_27] : memref<16x32xf32, #tpu.memory_space<vmem>>, vector<2x16xf32>
    tpu.vector_store %arg33[%c2, %c0_27], %97 {strides = array<i32>} : memref<16x32xf32, #tpu.memory_space<vmem>>, vector<2x16xf32>,
    %99 = vector.extract_strided_slice %7 {offsets = [12, 64], sizes = [2, 64], strides = [1, 1]} : vector<16x128xf32> to vector<2x64xf32>
    %cst_28 = arith.constant dense<0.000000e+00> : vector<2x64xf32>
    %100 = tpu.matmul %68, %4, %cst_28 {dimension_numbers = #tpu.dot_dimension_numbers<[1], [0], [0], [1], [0, 0, 1, 1], [], []>} : vector<2x16xf32>, vector<16x64xf32>, vector<2x64xf32> -> vector<2x64xf32>
    %101 = arith.addf %99, %100 : vector<2x64xf32>
    %102 = vector.extract_strided_slice %101 {offsets = [0, 0], sizes = [2, 16], strides = [1, 1]} : vector<2x64xf32> to vector<2x16xf32>
    %103 = arith.negf %102 : vector<2x16xf32>
    %104 = math.exp %103 : vector<2x16xf32>
    %cst_29 = arith.constant 1.000000e+00 : f32
    %105 = vector.broadcast %cst_29 : f32 to vector<2x16xf32>
    %106 = arith.addf %105, %104 : vector<2x16xf32>
    %107 = arith.divf %105, %106 : vector<2x16xf32>
    %108 = vector.extract_strided_slice %101 {offsets = [0, 16], sizes = [2, 16], strides = [1, 1]} : vector<2x64xf32> to vector<2x16xf32>
    %109 = arith.negf %108 : vector<2x16xf32>
    %110 = math.exp %109 : vector<2x16xf32>
    %cst_30 = arith.constant 1.000000e+00 : f32
    %111 = vector.broadcast %cst_30 : f32 to vector<2x16xf32>
    %112 = arith.addf %111, %110 : vector<2x16xf32>
    %113 = arith.divf %111, %112 : vector<2x16xf32>
    %114 = vector.extract_strided_slice %101 {offsets = [0, 32], sizes = [2, 16], strides = [1, 1]} : vector<2x64xf32> to vector<2x16xf32>
    %115 = math.tanh %114 : vector<2x16xf32>
    %116 = vector.extract_strided_slice %101 {offsets = [0, 48], sizes = [2, 16], strides = [1, 1]} : vector<2x64xf32> to vector<2x16xf32>
    %117 = arith.negf %116 : vector<2x16xf32>
    %118 = math.exp %117 : vector<2x16xf32>
    %cst_31 = arith.constant 1.000000e+00 : f32
    %119 = vector.broadcast %cst_31 : f32 to vector<2x16xf32>
    %120 = arith.addf %119, %118 : vector<2x16xf32>
    %121 = arith.divf %119, %120 : vector<2x16xf32>
    %122 = arith.mulf %113, %66 : vector<2x16xf32>
    %123 = arith.mulf %107, %115 : vector<2x16xf32>
    %124 = arith.addf %122, %123 : vector<2x16xf32>
    %125 = math.tanh %124 : vector<2x16xf32>
    %126 = arith.mulf %121, %125 : vector<2x16xf32>
    %c12 = arith.constant 12 : index
    %c16_32 = arith.constant 16 : index
    %127 = vector.load %arg33[%c12, %c16_32] : memref<16x32xf32, #tpu.memory_space<vmem>>, vector<2x16xf32>
    tpu.vector_store %arg33[%c12, %c16_32], %126 {strides = array<i32>} : memref<16x32xf32, #tpu.memory_space<vmem>>, vector<2x16xf32>,
    %128 = vector.extract_strided_slice %7 {offsets = [4, 0], sizes = [2, 64], strides = [1, 1]} : vector<16x128xf32> to vector<2x64xf32>
    %cst_33 = arith.constant dense<0.000000e+00> : vector<2x64xf32>
    %129 = tpu.matmul %97, %3, %cst_33 {dimension_numbers = #tpu.dot_dimension_numbers<[1], [0], [0], [1], [0, 0, 1, 1], [], []>} : vector<2x16xf32>, vector<16x64xf32>, vector<2x64xf32> -> vector<2x64xf32>
    %130 = arith.addf %128, %129 : vector<2x64xf32>
    %131 = vector.extract_strided_slice %130 {offsets = [0, 0], sizes = [2, 16], strides = [1, 1]} : vector<2x64xf32> to vector<2x16xf32>
    %132 = arith.negf %131 : vector<2x16xf32>
    %133 = math.exp %132 : vector<2x16xf32>
    %cst_34 = arith.constant 1.000000e+00 : f32
    %134 = vector.broadcast %cst_34 : f32 to vector<2x16xf32>
    %135 = arith.addf %134, %133 : vector<2x16xf32>
    %136 = arith.divf %134, %135 : vector<2x16xf32>
    %137 = vector.extract_strided_slice %130 {offsets = [0, 16], sizes = [2, 16], strides = [1, 1]} : vector<2x64xf32> to vector<2x16xf32>
    %138 = arith.negf %137 : vector<2x16xf32>
    %139 = math.exp %138 : vector<2x16xf32>
    %cst_35 = arith.constant 1.000000e+00 : f32
    %140 = vector.broadcast %cst_35 : f32 to vector<2x16xf32>
    %141 = arith.addf %140, %139 : vector<2x16xf32>
    %142 = arith.divf %140, %141 : vector<2x16xf32>
    %143 = vector.extract_strided_slice %130 {offsets = [0, 32], sizes = [2, 16], strides = [1, 1]} : vector<2x64xf32> to vector<2x16xf32>
    %144 = math.tanh %143 : vector<2x16xf32>
    %145 = vector.extract_strided_slice %130 {offsets = [0, 48], sizes = [2, 16], strides = [1, 1]} : vector<2x64xf32> to vector<2x16xf32>
    %146 = arith.negf %145 : vector<2x16xf32>
    %147 = math.exp %146 : vector<2x16xf32>
    %cst_36 = arith.constant 1.000000e+00 : f32
    %148 = vector.broadcast %cst_36 : f32 to vector<2x16xf32>
    %149 = arith.addf %148, %147 : vector<2x16xf32>
    %150 = arith.divf %148, %149 : vector<2x16xf32>
    %151 = arith.mulf %142, %95 : vector<2x16xf32>
    %152 = arith.mulf %136, %144 : vector<2x16xf32>
    %153 = arith.addf %151, %152 : vector<2x16xf32>
    %154 = math.tanh %153 : vector<2x16xf32>
    %155 = arith.mulf %150, %154 : vector<2x16xf32>
    %c4 = arith.constant 4 : index
    %c0_37 = arith.constant 0 : index
    %156 = vector.load %arg33[%c4, %c0_37] : memref<16x32xf32, #tpu.memory_space<vmem>>, vector<2x16xf32>
    tpu.vector_store %arg33[%c4, %c0_37], %155 {strides = array<i32>} : memref<16x32xf32, #tpu.memory_space<vmem>>, vector<2x16xf32>,
    %157 = vector.extract_strided_slice %7 {offsets = [10, 64], sizes = [2, 64], strides = [1, 1]} : vector<16x128xf32> to vector<2x64xf32>
    %cst_38 = arith.constant dense<0.000000e+00> : vector<2x64xf32>
    %158 = tpu.matmul %126, %4, %cst_38 {dimension_numbers = #tpu.dot_dimension_numbers<[1], [0], [0], [1], [0, 0, 1, 1], [], []>} : vector<2x16xf32>, vector<16x64xf32>, vector<2x64xf32> -> vector<2x64xf32>
    %159 = arith.addf %157, %158 : vector<2x64xf32>
    %160 = vector.extract_strided_slice %159 {offsets = [0, 0], sizes = [2, 16], strides = [1, 1]} : vector<2x64xf32> to vector<2x16xf32>
    %161 = arith.negf %160 : vector<2x16xf32>
    %162 = math.exp %161 : vector<2x16xf32>
    %cst_39 = arith.constant 1.000000e+00 : f32
    %163 = vector.broadcast %cst_39 : f32 to vector<2x16xf32>
    %164 = arith.addf %163, %162 : vector<2x16xf32>
    %165 = arith.divf %163, %164 : vector<2x16xf32>
    %166 = vector.extract_strided_slice %159 {offsets = [0, 16], sizes = [2, 16], strides = [1, 1]} : vector<2x64xf32> to vector<2x16xf32>
    %167 = arith.negf %166 : vector<2x16xf32>
    %168 = math.exp %167 : vector<2x16xf32>
    %cst_40 = arith.constant 1.000000e+00 : f32
    %169 = vector.broadcast %cst_40 : f32 to vector<2x16xf32>
    %170 = arith.addf %169, %168 : vector<2x16xf32>
    %171 = arith.divf %169, %170 : vector<2x16xf32>
    %172 = vector.extract_strided_slice %159 {offsets = [0, 32], sizes = [2, 16], strides = [1, 1]} : vector<2x64xf32> to vector<2x16xf32>
    %173 = math.tanh %172 : vector<2x16xf32>
    %174 = vector.extract_strided_slice %159 {offsets = [0, 48], sizes = [2, 16], strides = [1, 1]} : vector<2x64xf32> to vector<2x16xf32>
    %175 = arith.negf %174 : vector<2x16xf32>
    %176 = math.exp %175 : vector<2x16xf32>
    %cst_41 = arith.constant 1.000000e+00 : f32
    %177 = vector.broadcast %cst_41 : f32 to vector<2x16xf32>
    %178 = arith.addf %177, %176 : vector<2x16xf32>
    %179 = arith.divf %177, %178 : vector<2x16xf32>
    %180 = arith.mulf %171, %124 : vector<2x16xf32>
    %181 = arith.mulf %165, %173 : vector<2x16xf32>
    %182 = arith.addf %180, %181 : vector<2x16xf32>
    %183 = math.tanh %182 : vector<2x16xf32>
    %184 = arith.mulf %179, %183 : vector<2x16xf32>
    %c10 = arith.constant 10 : index
    %c16_42 = arith.constant 16 : index
    %185 = vector.load %arg33[%c10, %c16_42] : memref<16x32xf32, #tpu.memory_space<vmem>>, vector<2x16xf32>
    tpu.vector_store %arg33[%c10, %c16_42], %184 {strides = array<i32>} : memref<16x32xf32, #tpu.memory_space<vmem>>, vector<2x16xf32>,
    %186 = vector.extract_strided_slice %7 {offsets = [6, 0], sizes = [2, 64], strides = [1, 1]} : vector<16x128xf32> to vector<2x64xf32>
    %cst_43 = arith.constant dense<0.000000e+00> : vector<2x64xf32>
    %187 = tpu.matmul %155, %3, %cst_43 {dimension_numbers = #tpu.dot_dimension_numbers<[1], [0], [0], [1], [0, 0, 1, 1], [], []>} : vector<2x16xf32>, vector<16x64xf32>, vector<2x64xf32> -> vector<2x64xf32>
    %188 = arith.addf %186, %187 : vector<2x64xf32>
    %189 = vector.extract_strided_slice %188 {offsets = [0, 0], sizes = [2, 16], strides = [1, 1]} : vector<2x64xf32> to vector<2x16xf32>
    %190 = arith.negf %189 : vector<2x16xf32>
    %191 = math.exp %190 : vector<2x16xf32>
    %cst_44 = arith.constant 1.000000e+00 : f32
    %192 = vector.broadcast %cst_44 : f32 to vector<2x16xf32>
    %193 = arith.addf %192, %191 : vector<2x16xf32>
    %194 = arith.divf %192, %193 : vector<2x16xf32>
    %195 = vector.extract_strided_slice %188 {offsets = [0, 16], sizes = [2, 16], strides = [1, 1]} : vector<2x64xf32> to vector<2x16xf32>
    %196 = arith.negf %195 : vector<2x16xf32>
    %197 = math.exp %196 : vector<2x16xf32>
    %cst_45 = arith.constant 1.000000e+00 : f32
    %198 = vector.broadcast %cst_45 : f32 to vector<2x16xf32>
    %199 = arith.addf %198, %197 : vector<2x16xf32>
    %200 = arith.divf %198, %199 : vector<2x16xf32>
    %201 = vector.extract_strided_slice %188 {offsets = [0, 32], sizes = [2, 16], strides = [1, 1]} : vector<2x64xf32> to vector<2x16xf32>
    %202 = math.tanh %201 : vector<2x16xf32>
    %203 = vector.extract_strided_slice %188 {offsets = [0, 48], sizes = [2, 16], strides = [1, 1]} : vector<2x64xf32> to vector<2x16xf32>
    %204 = arith.negf %203 : vector<2x16xf32>
    %205 = math.exp %204 : vector<2x16xf32>
    %cst_46 = arith.constant 1.000000e+00 : f32
    %206 = vector.broadcast %cst_46 : f32 to vector<2x16xf32>
    %207 = arith.addf %206, %205 : vector<2x16xf32>
    %208 = arith.divf %206, %207 : vector<2x16xf32>
    %209 = arith.mulf %200, %153 : vector<2x16xf32>
    %210 = arith.mulf %194, %202 : vector<2x16xf32>
    %211 = arith.addf %209, %210 : vector<2x16xf32>
    %212 = math.tanh %211 : vector<2x16xf32>
    %213 = arith.mulf %208, %212 : vector<2x16xf32>
    %c6 = arith.constant 6 : index
    %c0_47 = arith.constant 0 : index
    %214 = vector.load %arg33[%c6, %c0_47] : memref<16x32xf32, #tpu.memory_space<vmem>>, vector<2x16xf32>
    tpu.vector_store %arg33[%c6, %c0_47], %213 {strides = array<i32>} : memref<16x32xf32, #tpu.memory_space<vmem>>, vector<2x16xf32>,
    %215 = vector.extract_strided_slice %7 {offsets = [8, 64], sizes = [2, 64], strides = [1, 1]} : vector<16x128xf32> to vector<2x64xf32>
    %cst_48 = arith.constant dense<0.000000e+00> : vector<2x64xf32>
    %216 = tpu.matmul %184, %4, %cst_48 {dimension_numbers = #tpu.dot_dimension_numbers<[1], [0], [0], [1], [0, 0, 1, 1], [], []>} : vector<2x16xf32>, vector<16x64xf32>, vector<2x64xf32> -> vector<2x64xf32>
    %217 = arith.addf %215, %216 : vector<2x64xf32>
    %218 = vector.extract_strided_slice %217 {offsets = [0, 0], sizes = [2, 16], strides = [1, 1]} : vector<2x64xf32> to vector<2x16xf32>
    %219 = arith.negf %218 : vector<2x16xf32>
    %220 = math.exp %219 : vector<2x16xf32>
    %cst_49 = arith.constant 1.000000e+00 : f32
    %221 = vector.broadcast %cst_49 : f32 to vector<2x16xf32>
    %222 = arith.addf %221, %220 : vector<2x16xf32>
    %223 = arith.divf %221, %222 : vector<2x16xf32>
    %224 = vector.extract_strided_slice %217 {offsets = [0, 16], sizes = [2, 16], strides = [1, 1]} : vector<2x64xf32> to vector<2x16xf32>
    %225 = arith.negf %224 : vector<2x16xf32>
    %226 = math.exp %225 : vector<2x16xf32>
    %cst_50 = arith.constant 1.000000e+00 : f32
    %227 = vector.broadcast %cst_50 : f32 to vector<2x16xf32>
    %228 = arith.addf %227, %226 : vector<2x16xf32>
    %229 = arith.divf %227, %228 : vector<2x16xf32>
    %230 = vector.extract_strided_slice %217 {offsets = [0, 32], sizes = [2, 16], strides = [1, 1]} : vector<2x64xf32> to vector<2x16xf32>
    %231 = math.tanh %230 : vector<2x16xf32>
    %232 = vector.extract_strided_slice %217 {offsets = [0, 48], sizes = [2, 16], strides = [1, 1]} : vector<2x64xf32> to vector<2x16xf32>
    %233 = arith.negf %232 : vector<2x16xf32>
    %234 = math.exp %233 : vector<2x16xf32>
    %cst_51 = arith.constant 1.000000e+00 : f32
    %235 = vector.broadcast %cst_51 : f32 to vector<2x16xf32>
    %236 = arith.addf %235, %234 : vector<2x16xf32>
    %237 = arith.divf %235, %236 : vector<2x16xf32>
    %238 = arith.mulf %229, %182 : vector<2x16xf32>
    %239 = arith.mulf %223, %231 : vector<2x16xf32>
    %240 = arith.addf %238, %239 : vector<2x16xf32>
    %241 = math.tanh %240 : vector<2x16xf32>
    %242 = arith.mulf %237, %241 : vector<2x16xf32>
    %c8 = arith.constant 8 : index
    %c16_52 = arith.constant 16 : index
    %243 = vector.load %arg33[%c8, %c16_52] : memref<16x32xf32, #tpu.memory_space<vmem>>, vector<2x16xf32>
    tpu.vector_store %arg33[%c8, %c16_52], %242 {strides = array<i32>} : memref<16x32xf32, #tpu.memory_space<vmem>>, vector<2x16xf32>,
    %244 = vector.extract_strided_slice %7 {offsets = [8, 0], sizes = [2, 64], strides = [1, 1]} : vector<16x128xf32> to vector<2x64xf32>
    %cst_53 = arith.constant dense<0.000000e+00> : vector<2x64xf32>
    %245 = tpu.matmul %213, %3, %cst_53 {dimension_numbers = #tpu.dot_dimension_numbers<[1], [0], [0], [1], [0, 0, 1, 1], [], []>} : vector<2x16xf32>, vector<16x64xf32>, vector<2x64xf32> -> vector<2x64xf32>
    %246 = arith.addf %244, %245 : vector<2x64xf32>
    %247 = vector.extract_strided_slice %246 {offsets = [0, 0], sizes = [2, 16], strides = [1, 1]} : vector<2x64xf32> to vector<2x16xf32>
    %248 = arith.negf %247 : vector<2x16xf32>
    %249 = math.exp %248 : vector<2x16xf32>
    %cst_54 = arith.constant 1.000000e+00 : f32
    %250 = vector.broadcast %cst_54 : f32 to vector<2x16xf32>
    %251 = arith.addf %250, %249 : vector<2x16xf32>
    %252 = arith.divf %250, %251 : vector<2x16xf32>
    %253 = vector.extract_strided_slice %246 {offsets = [0, 16], sizes = [2, 16], strides = [1, 1]} : vector<2x64xf32> to vector<2x16xf32>
    %254 = arith.negf %253 : vector<2x16xf32>
    %255 = math.exp %254 : vector<2x16xf32>
    %cst_55 = arith.constant 1.000000e+00 : f32
    %256 = vector.broadcast %cst_55 : f32 to vector<2x16xf32>
    %257 = arith.addf %256, %255 : vector<2x16xf32>
    %258 = arith.divf %256, %257 : vector<2x16xf32>
    %259 = vector.extract_strided_slice %246 {offsets = [0, 32], sizes = [2, 16], strides = [1, 1]} : vector<2x64xf32> to vector<2x16xf32>
    %260 = math.tanh %259 : vector<2x16xf32>
    %261 = vector.extract_strided_slice %246 {offsets = [0, 48], sizes = [2, 16], strides = [1, 1]} : vector<2x64xf32> to vector<2x16xf32>
    %262 = arith.negf %261 : vector<2x16xf32>
    %263 = math.exp %262 : vector<2x16xf32>
    %cst_56 = arith.constant 1.000000e+00 : f32
    %264 = vector.broadcast %cst_56 : f32 to vector<2x16xf32>
    %265 = arith.addf %264, %263 : vector<2x16xf32>
    %266 = arith.divf %264, %265 : vector<2x16xf32>
    %267 = arith.mulf %258, %211 : vector<2x16xf32>
    %268 = arith.mulf %252, %260 : vector<2x16xf32>
    %269 = arith.addf %267, %268 : vector<2x16xf32>
    %270 = math.tanh %269 : vector<2x16xf32>
    %271 = arith.mulf %266, %270 : vector<2x16xf32>
    %c8_57 = arith.constant 8 : index
    %c0_58 = arith.constant 0 : index
    %272 = vector.load %arg33[%c8_57, %c0_58] : memref<16x32xf32, #tpu.memory_space<vmem>>, vector<2x16xf32>
    tpu.vector_store %arg33[%c8_57, %c0_58], %271 {strides = array<i32>} : memref<16x32xf32, #tpu.memory_space<vmem>>, vector<2x16xf32>,
    %273 = vector.extract_strided_slice %7 {offsets = [6, 64], sizes = [2, 64], strides = [1, 1]} : vector<16x128xf32> to vector<2x64xf32>
    %cst_59 = arith.constant dense<0.000000e+00> : vector<2x64xf32>
    %274 = tpu.matmul %242, %4, %cst_59 {dimension_numbers = #tpu.dot_dimension_numbers<[1], [0], [0], [1], [0, 0, 1, 1], [], []>} : vector<2x16xf32>, vector<16x64xf32>, vector<2x64xf32> -> vector<2x64xf32>
    %275 = arith.addf %273, %274 : vector<2x64xf32>
    %276 = vector.extract_strided_slice %275 {offsets = [0, 0], sizes = [2, 16], strides = [1, 1]} : vector<2x64xf32> to vector<2x16xf32>
    %277 = arith.negf %276 : vector<2x16xf32>
    %278 = math.exp %277 : vector<2x16xf32>
    %cst_60 = arith.constant 1.000000e+00 : f32
    %279 = vector.broadcast %cst_60 : f32 to vector<2x16xf32>
    %280 = arith.addf %279, %278 : vector<2x16xf32>
    %281 = arith.divf %279, %280 : vector<2x16xf32>
    %282 = vector.extract_strided_slice %275 {offsets = [0, 16], sizes = [2, 16], strides = [1, 1]} : vector<2x64xf32> to vector<2x16xf32>
    %283 = arith.negf %282 : vector<2x16xf32>
    %284 = math.exp %283 : vector<2x16xf32>
    %cst_61 = arith.constant 1.000000e+00 : f32
    %285 = vector.broadcast %cst_61 : f32 to vector<2x16xf32>
    %286 = arith.addf %285, %284 : vector<2x16xf32>
    %287 = arith.divf %285, %286 : vector<2x16xf32>
    %288 = vector.extract_strided_slice %275 {offsets = [0, 32], sizes = [2, 16], strides = [1, 1]} : vector<2x64xf32> to vector<2x16xf32>
    %289 = math.tanh %288 : vector<2x16xf32>
    %290 = vector.extract_strided_slice %275 {offsets = [0, 48], sizes = [2, 16], strides = [1, 1]} : vector<2x64xf32> to vector<2x16xf32>
    %291 = arith.negf %290 : vector<2x16xf32>
    %292 = math.exp %291 : vector<2x16xf32>
    %cst_62 = arith.constant 1.000000e+00 : f32
    %293 = vector.broadcast %cst_62 : f32 to vector<2x16xf32>
    %294 = arith.addf %293, %292 : vector<2x16xf32>
    %295 = arith.divf %293, %294 : vector<2x16xf32>
    %296 = arith.mulf %287, %240 : vector<2x16xf32>
    %297 = arith.mulf %281, %289 : vector<2x16xf32>
    %298 = arith.addf %296, %297 : vector<2x16xf32>
    %299 = math.tanh %298 : vector<2x16xf32>
    %300 = arith.mulf %295, %299 : vector<2x16xf32>
    %c6_63 = arith.constant 6 : index
    %c16_64 = arith.constant 16 : index
    %301 = vector.load %arg33[%c6_63, %c16_64] : memref<16x32xf32, #tpu.memory_space<vmem>>, vector<2x16xf32>
    tpu.vector_store %arg33[%c6_63, %c16_64], %300 {strides = array<i32>} : memref<16x32xf32, #tpu.memory_space<vmem>>, vector<2x16xf32>,
    %302 = vector.extract_strided_slice %7 {offsets = [10, 0], sizes = [2, 64], strides = [1, 1]} : vector<16x128xf32> to vector<2x64xf32>
    %cst_65 = arith.constant dense<0.000000e+00> : vector<2x64xf32>
    %303 = tpu.matmul %271, %3, %cst_65 {dimension_numbers = #tpu.dot_dimension_numbers<[1], [0], [0], [1], [0, 0, 1, 1], [], []>} : vector<2x16xf32>, vector<16x64xf32>, vector<2x64xf32> -> vector<2x64xf32>
    %304 = arith.addf %302, %303 : vector<2x64xf32>
    %305 = vector.extract_strided_slice %304 {offsets = [0, 0], sizes = [2, 16], strides = [1, 1]} : vector<2x64xf32> to vector<2x16xf32>
    %306 = arith.negf %305 : vector<2x16xf32>
    %307 = math.exp %306 : vector<2x16xf32>
    %cst_66 = arith.constant 1.000000e+00 : f32
    %308 = vector.broadcast %cst_66 : f32 to vector<2x16xf32>
    %309 = arith.addf %308, %307 : vector<2x16xf32>
    %310 = arith.divf %308, %309 : vector<2x16xf32>
    %311 = vector.extract_strided_slice %304 {offsets = [0, 16], sizes = [2, 16], strides = [1, 1]} : vector<2x64xf32> to vector<2x16xf32>
    %312 = arith.negf %311 : vector<2x16xf32>
    %313 = math.exp %312 : vector<2x16xf32>
    %cst_67 = arith.constant 1.000000e+00 : f32
    %314 = vector.broadcast %cst_67 : f32 to vector<2x16xf32>
    %315 = arith.addf %314, %313 : vector<2x16xf32>
    %316 = arith.divf %314, %315 : vector<2x16xf32>
    %317 = vector.extract_strided_slice %304 {offsets = [0, 32], sizes = [2, 16], strides = [1, 1]} : vector<2x64xf32> to vector<2x16xf32>
    %318 = math.tanh %317 : vector<2x16xf32>
    %319 = vector.extract_strided_slice %304 {offsets = [0, 48], sizes = [2, 16], strides = [1, 1]} : vector<2x64xf32> to vector<2x16xf32>
    %320 = arith.negf %319 : vector<2x16xf32>
    %321 = math.exp %320 : vector<2x16xf32>
    %cst_68 = arith.constant 1.000000e+00 : f32
    %322 = vector.broadcast %cst_68 : f32 to vector<2x16xf32>
    %323 = arith.addf %322, %321 : vector<2x16xf32>
    %324 = arith.divf %322, %323 : vector<2x16xf32>
    %325 = arith.mulf %316, %269 : vector<2x16xf32>
    %326 = arith.mulf %310, %318 : vector<2x16xf32>
    %327 = arith.addf %325, %326 : vector<2x16xf32>
    %328 = math.tanh %327 : vector<2x16xf32>
    %329 = arith.mulf %324, %328 : vector<2x16xf32>
    %c10_69 = arith.constant 10 : index
    %c0_70 = arith.constant 0 : index
    %330 = vector.load %arg33[%c10_69, %c0_70] : memref<16x32xf32, #tpu.memory_space<vmem>>, vector<2x16xf32>
    tpu.vector_store %arg33[%c10_69, %c0_70], %329 {strides = array<i32>} : memref<16x32xf32, #tpu.memory_space<vmem>>, vector<2x16xf32>,
    %331 = vector.extract_strided_slice %7 {offsets = [4, 64], sizes = [2, 64], strides = [1, 1]} : vector<16x128xf32> to vector<2x64xf32>
    %cst_71 = arith.constant dense<0.000000e+00> : vector<2x64xf32>
    %332 = tpu.matmul %300, %4, %cst_71 {dimension_numbers = #tpu.dot_dimension_numbers<[1], [0], [0], [1], [0, 0, 1, 1], [], []>} : vector<2x16xf32>, vector<16x64xf32>, vector<2x64xf32> -> vector<2x64xf32>
    %333 = arith.addf %331, %332 : vector<2x64xf32>
    %334 = vector.extract_strided_slice %333 {offsets = [0, 0], sizes = [2, 16], strides = [1, 1]} : vector<2x64xf32> to vector<2x16xf32>
    %335 = arith.negf %334 : vector<2x16xf32>
    %336 = math.exp %335 : vector<2x16xf32>
    %cst_72 = arith.constant 1.000000e+00 : f32
    %337 = vector.broadcast %cst_72 : f32 to vector<2x16xf32>
    %338 = arith.addf %337, %336 : vector<2x16xf32>
    %339 = arith.divf %337, %338 : vector<2x16xf32>
    %340 = vector.extract_strided_slice %333 {offsets = [0, 16], sizes = [2, 16], strides = [1, 1]} : vector<2x64xf32> to vector<2x16xf32>
    %341 = arith.negf %340 : vector<2x16xf32>
    %342 = math.exp %341 : vector<2x16xf32>
    %cst_73 = arith.constant 1.000000e+00 : f32
    %343 = vector.broadcast %cst_73 : f32 to vector<2x16xf32>
    %344 = arith.addf %343, %342 : vector<2x16xf32>
    %345 = arith.divf %343, %344 : vector<2x16xf32>
    %346 = vector.extract_strided_slice %333 {offsets = [0, 32], sizes = [2, 16], strides = [1, 1]} : vector<2x64xf32> to vector<2x16xf32>
    %347 = math.tanh %346 : vector<2x16xf32>
    %348 = vector.extract_strided_slice %333 {offsets = [0, 48], sizes = [2, 16], strides = [1, 1]} : vector<2x64xf32> to vector<2x16xf32>
    %349 = arith.negf %348 : vector<2x16xf32>
    %350 = math.exp %349 : vector<2x16xf32>
    %cst_74 = arith.constant 1.000000e+00 : f32
    %351 = vector.broadcast %cst_74 : f32 to vector<2x16xf32>
    %352 = arith.addf %351, %350 : vector<2x16xf32>
    %353 = arith.divf %351, %352 : vector<2x16xf32>
    %354 = arith.mulf %345, %298 : vector<2x16xf32>
    %355 = arith.mulf %339, %347 : vector<2x16xf32>
    %356 = arith.addf %354, %355 : vector<2x16xf32>
    %357 = math.tanh %356 : vector<2x16xf32>
    %358 = arith.mulf %353, %357 : vector<2x16xf32>
    %c4_75 = arith.constant 4 : index
    %c16_76 = arith.constant 16 : index
    %359 = vector.load %arg33[%c4_75, %c16_76] : memref<16x32xf32, #tpu.memory_space<vmem>>, vector<2x16xf32>
    tpu.vector_store %arg33[%c4_75, %c16_76], %358 {strides = array<i32>} : memref<16x32xf32, #tpu.memory_space<vmem>>, vector<2x16xf32>,
    %360 = vector.extract_strided_slice %7 {offsets = [12, 0], sizes = [2, 64], strides = [1, 1]} : vector<16x128xf32> to vector<2x64xf32>
    %cst_77 = arith.constant dense<0.000000e+00> : vector<2x64xf32>
    %361 = tpu.matmul %329, %3, %cst_77 {dimension_numbers = #tpu.dot_dimension_numbers<[1], [0], [0], [1], [0, 0, 1, 1], [], []>} : vector<2x16xf32>, vector<16x64xf32>, vector<2x64xf32> -> vector<2x64xf32>
    %362 = arith.addf %360, %361 : vector<2x64xf32>
    %363 = vector.extract_strided_slice %362 {offsets = [0, 0], sizes = [2, 16], strides = [1, 1]} : vector<2x64xf32> to vector<2x16xf32>
    %364 = arith.negf %363 : vector<2x16xf32>
    %365 = math.exp %364 : vector<2x16xf32>
    %cst_78 = arith.constant 1.000000e+00 : f32
    %366 = vector.broadcast %cst_78 : f32 to vector<2x16xf32>
    %367 = arith.addf %366, %365 : vector<2x16xf32>
    %368 = arith.divf %366, %367 : vector<2x16xf32>
    %369 = vector.extract_strided_slice %362 {offsets = [0, 16], sizes = [2, 16], strides = [1, 1]} : vector<2x64xf32> to vector<2x16xf32>
    %370 = arith.negf %369 : vector<2x16xf32>
    %371 = math.exp %370 : vector<2x16xf32>
    %cst_79 = arith.constant 1.000000e+00 : f32
    %372 = vector.broadcast %cst_79 : f32 to vector<2x16xf32>
    %373 = arith.addf %372, %371 : vector<2x16xf32>
    %374 = arith.divf %372, %373 : vector<2x16xf32>
    %375 = vector.extract_strided_slice %362 {offsets = [0, 32], sizes = [2, 16], strides = [1, 1]} : vector<2x64xf32> to vector<2x16xf32>
    %376 = math.tanh %375 : vector<2x16xf32>
    %377 = vector.extract_strided_slice %362 {offsets = [0, 48], sizes = [2, 16], strides = [1, 1]} : vector<2x64xf32> to vector<2x16xf32>
    %378 = arith.negf %377 : vector<2x16xf32>
    %379 = math.exp %378 : vector<2x16xf32>
    %cst_80 = arith.constant 1.000000e+00 : f32
    %380 = vector.broadcast %cst_80 : f32 to vector<2x16xf32>
    %381 = arith.addf %380, %379 : vector<2x16xf32>
    %382 = arith.divf %380, %381 : vector<2x16xf32>
    %383 = arith.mulf %374, %327 : vector<2x16xf32>
    %384 = arith.mulf %368, %376 : vector<2x16xf32>
    %385 = arith.addf %383, %384 : vector<2x16xf32>
    %386 = math.tanh %385 : vector<2x16xf32>
    %387 = arith.mulf %382, %386 : vector<2x16xf32>
    %c12_81 = arith.constant 12 : index
    %c0_82 = arith.constant 0 : index
    %388 = vector.load %arg33[%c12_81, %c0_82] : memref<16x32xf32, #tpu.memory_space<vmem>>, vector<2x16xf32>
    tpu.vector_store %arg33[%c12_81, %c0_82], %387 {strides = array<i32>} : memref<16x32xf32, #tpu.memory_space<vmem>>, vector<2x16xf32>,
    %389 = vector.extract_strided_slice %7 {offsets = [2, 64], sizes = [2, 64], strides = [1, 1]} : vector<16x128xf32> to vector<2x64xf32>
    %cst_83 = arith.constant dense<0.000000e+00> : vector<2x64xf32>
    %390 = tpu.matmul %358, %4, %cst_83 {dimension_numbers = #tpu.dot_dimension_numbers<[1], [0], [0], [1], [0, 0, 1, 1], [], []>} : vector<2x16xf32>, vector<16x64xf32>, vector<2x64xf32> -> vector<2x64xf32>
    %391 = arith.addf %389, %390 : vector<2x64xf32>
    %392 = vector.extract_strided_slice %391 {offsets = [0, 0], sizes = [2, 16], strides = [1, 1]} : vector<2x64xf32> to vector<2x16xf32>
    %393 = arith.negf %392 : vector<2x16xf32>
    %394 = math.exp %393 : vector<2x16xf32>
    %cst_84 = arith.constant 1.000000e+00 : f32
    %395 = vector.broadcast %cst_84 : f32 to vector<2x16xf32>
    %396 = arith.addf %395, %394 : vector<2x16xf32>
    %397 = arith.divf %395, %396 : vector<2x16xf32>
    %398 = vector.extract_strided_slice %391 {offsets = [0, 16], sizes = [2, 16], strides = [1, 1]} : vector<2x64xf32> to vector<2x16xf32>
    %399 = arith.negf %398 : vector<2x16xf32>
    %400 = math.exp %399 : vector<2x16xf32>
    %cst_85 = arith.constant 1.000000e+00 : f32
    %401 = vector.broadcast %cst_85 : f32 to vector<2x16xf32>
    %402 = arith.addf %401, %400 : vector<2x16xf32>
    %403 = arith.divf %401, %402 : vector<2x16xf32>
    %404 = vector.extract_strided_slice %391 {offsets = [0, 32], sizes = [2, 16], strides = [1, 1]} : vector<2x64xf32> to vector<2x16xf32>
    %405 = math.tanh %404 : vector<2x16xf32>
    %406 = vector.extract_strided_slice %391 {offsets = [0, 48], sizes = [2, 16], strides = [1, 1]} : vector<2x64xf32> to vector<2x16xf32>
    %407 = arith.negf %406 : vector<2x16xf32>
    %408 = math.exp %407 : vector<2x16xf32>
    %cst_86 = arith.constant 1.000000e+00 : f32
    %409 = vector.broadcast %cst_86 : f32 to vector<2x16xf32>
    %410 = arith.addf %409, %408 : vector<2x16xf32>
    %411 = arith.divf %409, %410 : vector<2x16xf32>
    %412 = arith.mulf %403, %356 : vector<2x16xf32>
    %413 = arith.mulf %397, %405 : vector<2x16xf32>
    %414 = arith.addf %412, %413 : vector<2x16xf32>
    %415 = math.tanh %414 : vector<2x16xf32>
    %416 = arith.mulf %411, %415 : vector<2x16xf32>
    %c2_87 = arith.constant 2 : index
    %c16_88 = arith.constant 16 : index
    %417 = vector.load %arg33[%c2_87, %c16_88] : memref<16x32xf32, #tpu.memory_space<vmem>>, vector<2x16xf32>
    tpu.vector_store %arg33[%c2_87, %c16_88], %416 {strides = array<i32>} : memref<16x32xf32, #tpu.memory_space<vmem>>, vector<2x16xf32>,
    %418 = vector.extract_strided_slice %7 {offsets = [14, 0], sizes = [2, 64], strides = [1, 1]} : vector<16x128xf32> to vector<2x64xf32>
    %cst_89 = arith.constant dense<0.000000e+00> : vector<2x64xf32>
    %419 = tpu.matmul %387, %3, %cst_89 {dimension_numbers = #tpu.dot_dimension_numbers<[1], [0], [0], [1], [0, 0, 1, 1], [], []>} : vector<2x16xf32>, vector<16x64xf32>, vector<2x64xf32> -> vector<2x64xf32>
    %420 = arith.addf %418, %419 : vector<2x64xf32>
    %421 = vector.extract_strided_slice %420 {offsets = [0, 0], sizes = [2, 16], strides = [1, 1]} : vector<2x64xf32> to vector<2x16xf32>
    %422 = arith.negf %421 : vector<2x16xf32>
    %423 = math.exp %422 : vector<2x16xf32>
    %cst_90 = arith.constant 1.000000e+00 : f32
    %424 = vector.broadcast %cst_90 : f32 to vector<2x16xf32>
    %425 = arith.addf %424, %423 : vector<2x16xf32>
    %426 = arith.divf %424, %425 : vector<2x16xf32>
    %427 = vector.extract_strided_slice %420 {offsets = [0, 16], sizes = [2, 16], strides = [1, 1]} : vector<2x64xf32> to vector<2x16xf32>
    %428 = arith.negf %427 : vector<2x16xf32>
    %429 = math.exp %428 : vector<2x16xf32>
    %cst_91 = arith.constant 1.000000e+00 : f32
    %430 = vector.broadcast %cst_91 : f32 to vector<2x16xf32>
    %431 = arith.addf %430, %429 : vector<2x16xf32>
    %432 = arith.divf %430, %431 : vector<2x16xf32>
    %433 = vector.extract_strided_slice %420 {offsets = [0, 32], sizes = [2, 16], strides = [1, 1]} : vector<2x64xf32> to vector<2x16xf32>
    %434 = math.tanh %433 : vector<2x16xf32>
    %435 = vector.extract_strided_slice %420 {offsets = [0, 48], sizes = [2, 16], strides = [1, 1]} : vector<2x64xf32> to vector<2x16xf32>
    %436 = arith.negf %435 : vector<2x16xf32>
    %437 = math.exp %436 : vector<2x16xf32>
    %cst_92 = arith.constant 1.000000e+00 : f32
    %438 = vector.broadcast %cst_92 : f32 to vector<2x16xf32>
    %439 = arith.addf %438, %437 : vector<2x16xf32>
    %440 = arith.divf %438, %439 : vector<2x16xf32>
    %441 = arith.mulf %432, %385 : vector<2x16xf32>
    %442 = arith.mulf %426, %434 : vector<2x16xf32>
    %443 = arith.addf %441, %442 : vector<2x16xf32>
    %444 = math.tanh %443 : vector<2x16xf32>
    %445 = arith.mulf %440, %444 : vector<2x16xf32>
    %c14_93 = arith.constant 14 : index
    %c0_94 = arith.constant 0 : index
    %446 = vector.load %arg33[%c14_93, %c0_94] : memref<16x32xf32, #tpu.memory_space<vmem>>, vector<2x16xf32>
    tpu.vector_store %arg33[%c14_93, %c0_94], %445 {strides = array<i32>} : memref<16x32xf32, #tpu.memory_space<vmem>>, vector<2x16xf32>,
    %447 = vector.extract_strided_slice %7 {offsets = [0, 64], sizes = [2, 64], strides = [1, 1]} : vector<16x128xf32> to vector<2x64xf32>
    %cst_95 = arith.constant dense<0.000000e+00> : vector<2x64xf32>
    %448 = tpu.matmul %416, %4, %cst_95 {dimension_numbers = #tpu.dot_dimension_numbers<[1], [0], [0], [1], [0, 0, 1, 1], [], []>} : vector<2x16xf32>, vector<16x64xf32>, vector<2x64xf32> -> vector<2x64xf32>
    %449 = arith.addf %447, %448 : vector<2x64xf32>
    %450 = vector.extract_strided_slice %449 {offsets = [0, 0], sizes = [2, 16], strides = [1, 1]} : vector<2x64xf32> to vector<2x16xf32>
    %451 = arith.negf %450 : vector<2x16xf32>
    %452 = math.exp %451 : vector<2x16xf32>
    %cst_96 = arith.constant 1.000000e+00 : f32
    %453 = vector.broadcast %cst_96 : f32 to vector<2x16xf32>
    %454 = arith.addf %453, %452 : vector<2x16xf32>
    %455 = arith.divf %453, %454 : vector<2x16xf32>
    %456 = vector.extract_strided_slice %449 {offsets = [0, 16], sizes = [2, 16], strides = [1, 1]} : vector<2x64xf32> to vector<2x16xf32>
    %457 = arith.negf %456 : vector<2x16xf32>
    %458 = math.exp %457 : vector<2x16xf32>
    %cst_97 = arith.constant 1.000000e+00 : f32
    %459 = vector.broadcast %cst_97 : f32 to vector<2x16xf32>
    %460 = arith.addf %459, %458 : vector<2x16xf32>
    %461 = arith.divf %459, %460 : vector<2x16xf32>
    %462 = vector.extract_strided_slice %449 {offsets = [0, 32], sizes = [2, 16], strides = [1, 1]} : vector<2x64xf32> to vector<2x16xf32>
    %463 = math.tanh %462 : vector<2x16xf32>
    %464 = vector.extract_strided_slice %449 {offsets = [0, 48], sizes = [2, 16], strides = [1, 1]} : vector<2x64xf32> to vector<2x16xf32>
    %465 = arith.negf %464 : vector<2x16xf32>
    %466 = math.exp %465 : vector<2x16xf32>
    %cst_98 = arith.constant 1.000000e+00 : f32
    %467 = vector.broadcast %cst_98 : f32 to vector<2x16xf32>
    %468 = arith.addf %467, %466 : vector<2x16xf32>
    %469 = arith.divf %467, %468 : vector<2x16xf32>
    %470 = arith.mulf %461, %414 : vector<2x16xf32>
    %471 = arith.mulf %455, %463 : vector<2x16xf32>
    %472 = arith.addf %470, %471 : vector<2x16xf32>
    %473 = math.tanh %472 : vector<2x16xf32>
    %474 = arith.mulf %469, %473 : vector<2x16xf32>
    %c0_99 = arith.constant 0 : index
    %c16_100 = arith.constant 16 : index
    %475 = vector.load %arg33[%c0_99, %c16_100] : memref<16x32xf32, #tpu.memory_space<vmem>>, vector<2x16xf32>
    tpu.vector_store %arg33[%c0_99, %c16_100], %474 {strides = array<i32>} : memref<16x32xf32, #tpu.memory_space<vmem>>, vector<2x16xf32>,
    %c0_101 = arith.constant 0 : index
    %c0_102 = arith.constant 0 : index
    %476 = vector.load %arg33[%c0_101, %c0_102] : memref<16x32xf32, #tpu.memory_space<vmem>>, vector<16x32xf32>
    %c0_103 = arith.constant 0 : index
    %c0_104 = arith.constant 0 : index
    %477 = vector.load %arg5[%c0_103, %c0_104] : memref<32x128xf32, #tpu.memory_space<vmem>>, vector<32x128xf32>
    %c0_105 = arith.constant 0 : index
    %c0_106 = arith.constant 0 : index
    %478 = vector.load %arg6[%c0_105, %c0_106] : memref<1x128xf32, #tpu.memory_space<vmem>>, vector<1x128xf32>
    %c0_107 = arith.constant 0 : index
    %c0_108 = arith.constant 0 : index
    %479 = vector.load %arg7[%c0_107, %c0_108] : memref<16x64xf32, #tpu.memory_space<vmem>>, vector<16x64xf32>
    %c0_109 = arith.constant 0 : index
    %c0_110 = arith.constant 0 : index
    %480 = vector.load %arg8[%c0_109, %c0_110] : memref<16x64xf32, #tpu.memory_space<vmem>>, vector<16x64xf32>
    %cst_111 = arith.constant dense<0.000000e+00> : vector<16x128xf32>
    %481 = tpu.matmul %476, %477, %cst_111 {dimension_numbers = #tpu.dot_dimension_numbers<[1], [0], [0], [1], [0, 0, 1, 1], [], []>} : vector<16x32xf32>, vector<32x128xf32>, vector<16x128xf32> -> vector<16x128xf32>
    %482 = vector.broadcast %478 : vector<1x128xf32> to vector<16x128xf32>
    %483 = arith.addf %481, %482 : vector<16x128xf32>
    %cst_112 = arith.constant 0.000000e+00 : f32
    %484 = vector.broadcast %cst_112 : f32 to vector<2x16xf32>
    %cst_113 = arith.constant 0.000000e+00 : f32
    %485 = vector.broadcast %cst_113 : f32 to vector<2x16xf32>
    %cst_114 = arith.constant 0.000000e+00 : f32
    %486 = vector.broadcast %cst_114 : f32 to vector<2x16xf32>
    %cst_115 = arith.constant 0.000000e+00 : f32
    %487 = vector.broadcast %cst_115 : f32 to vector<2x16xf32>
    %488 = vector.extract_strided_slice %483 {offsets = [0, 0], sizes = [2, 64], strides = [1, 1]} : vector<16x128xf32> to vector<2x64xf32>
    %cst_116 = arith.constant dense<0.000000e+00> : vector<2x64xf32>
    %489 = tpu.matmul %484, %479, %cst_116 {dimension_numbers = #tpu.dot_dimension_numbers<[1], [0], [0], [1], [0, 0, 1, 1], [], []>} : vector<2x16xf32>, vector<16x64xf32>, vector<2x64xf32> -> vector<2x64xf32>
    %490 = arith.addf %488, %489 : vector<2x64xf32>
    %491 = vector.extract_strided_slice %490 {offsets = [0, 0], sizes = [2, 16], strides = [1, 1]} : vector<2x64xf32> to vector<2x16xf32>
    %492 = arith.negf %491 : vector<2x16xf32>
    %493 = math.exp %492 : vector<2x16xf32>
    %cst_117 = arith.constant 1.000000e+00 : f32
    %494 = vector.broadcast %cst_117 : f32 to vector<2x16xf32>
    %495 = arith.addf %494, %493 : vector<2x16xf32>
    %496 = arith.divf %494, %495 : vector<2x16xf32>
    %497 = vector.extract_strided_slice %490 {offsets = [0, 16], sizes = [2, 16], strides = [1, 1]} : vector<2x64xf32> to vector<2x16xf32>
    %498 = arith.negf %497 : vector<2x16xf32>
    %499 = math.exp %498 : vector<2x16xf32>
    %cst_118 = arith.constant 1.000000e+00 : f32
    %500 = vector.broadcast %cst_118 : f32 to vector<2x16xf32>
    %501 = arith.addf %500, %499 : vector<2x16xf32>
    %502 = arith.divf %500, %501 : vector<2x16xf32>
    %503 = vector.extract_strided_slice %490 {offsets = [0, 32], sizes = [2, 16], strides = [1, 1]} : vector<2x64xf32> to vector<2x16xf32>
    %504 = math.tanh %503 : vector<2x16xf32>
    %505 = vector.extract_strided_slice %490 {offsets = [0, 48], sizes = [2, 16], strides = [1, 1]} : vector<2x64xf32> to vector<2x16xf32>
    %506 = arith.negf %505 : vector<2x16xf32>
    %507 = math.exp %506 : vector<2x16xf32>
    %cst_119 = arith.constant 1.000000e+00 : f32
    %508 = vector.broadcast %cst_119 : f32 to vector<2x16xf32>
    %509 = arith.addf %508, %507 : vector<2x16xf32>
    %510 = arith.divf %508, %509 : vector<2x16xf32>
    %511 = arith.mulf %502, %485 : vector<2x16xf32>
    %512 = arith.mulf %496, %504 : vector<2x16xf32>
    %513 = arith.addf %511, %512 : vector<2x16xf32>
    %514 = math.tanh %513 : vector<2x16xf32>
    %515 = arith.mulf %510, %514 : vector<2x16xf32>
    %c0_120 = arith.constant 0 : index
    %c0_121 = arith.constant 0 : index
    %516 = vector.load %arg34[%c0_120, %c0_121] : memref<16x32xf32, #tpu.memory_space<vmem>>, vector<2x16xf32>
    tpu.vector_store %arg34[%c0_120, %c0_121], %515 {strides = array<i32>} : memref<16x32xf32, #tpu.memory_space<vmem>>, vector<2x16xf32>,
    %517 = vector.extract_strided_slice %483 {offsets = [14, 64], sizes = [2, 64], strides = [1, 1]} : vector<16x128xf32> to vector<2x64xf32>
    %cst_122 = arith.constant dense<0.000000e+00> : vector<2x64xf32>
    %518 = tpu.matmul %486, %480, %cst_122 {dimension_numbers = #tpu.dot_dimension_numbers<[1], [0], [0], [1], [0, 0, 1, 1], [], []>} : vector<2x16xf32>, vector<16x64xf32>, vector<2x64xf32> -> vector<2x64xf32>
    %519 = arith.addf %517, %518 : vector<2x64xf32>
    %520 = vector.extract_strided_slice %519 {offsets = [0, 0], sizes = [2, 16], strides = [1, 1]} : vector<2x64xf32> to vector<2x16xf32>
    %521 = arith.negf %520 : vector<2x16xf32>
    %522 = math.exp %521 : vector<2x16xf32>
    %cst_123 = arith.constant 1.000000e+00 : f32
    %523 = vector.broadcast %cst_123 : f32 to vector<2x16xf32>
    %524 = arith.addf %523, %522 : vector<2x16xf32>
    %525 = arith.divf %523, %524 : vector<2x16xf32>
    %526 = vector.extract_strided_slice %519 {offsets = [0, 16], sizes = [2, 16], strides = [1, 1]} : vector<2x64xf32> to vector<2x16xf32>
    %527 = arith.negf %526 : vector<2x16xf32>
    %528 = math.exp %527 : vector<2x16xf32>
    %cst_124 = arith.constant 1.000000e+00 : f32
    %529 = vector.broadcast %cst_124 : f32 to vector<2x16xf32>
    %530 = arith.addf %529, %528 : vector<2x16xf32>
    %531 = arith.divf %529, %530 : vector<2x16xf32>
    %532 = vector.extract_strided_slice %519 {offsets = [0, 32], sizes = [2, 16], strides = [1, 1]} : vector<2x64xf32> to vector<2x16xf32>
    %533 = math.tanh %532 : vector<2x16xf32>
    %534 = vector.extract_strided_slice %519 {offsets = [0, 48], sizes = [2, 16], strides = [1, 1]} : vector<2x64xf32> to vector<2x16xf32>
    %535 = arith.negf %534 : vector<2x16xf32>
    %536 = math.exp %535 : vector<2x16xf32>
    %cst_125 = arith.constant 1.000000e+00 : f32
    %537 = vector.broadcast %cst_125 : f32 to vector<2x16xf32>
    %538 = arith.addf %537, %536 : vector<2x16xf32>
    %539 = arith.divf %537, %538 : vector<2x16xf32>
    %540 = arith.mulf %531, %487 : vector<2x16xf32>
    %541 = arith.mulf %525, %533 : vector<2x16xf32>
    %542 = arith.addf %540, %541 : vector<2x16xf32>
    %543 = math.tanh %542 : vector<2x16xf32>
    %544 = arith.mulf %539, %543 : vector<2x16xf32>
    %c14_126 = arith.constant 14 : index
    %c16_127 = arith.constant 16 : index
    %545 = vector.load %arg34[%c14_126, %c16_127] : memref<16x32xf32, #tpu.memory_space<vmem>>, vector<2x16xf32>
    tpu.vector_store %arg34[%c14_126, %c16_127], %544 {strides = array<i32>} : memref<16x32xf32, #tpu.memory_space<vmem>>, vector<2x16xf32>,
    %546 = vector.extract_strided_slice %483 {offsets = [2, 0], sizes = [2, 64], strides = [1, 1]} : vector<16x128xf32> to vector<2x64xf32>
    %cst_128 = arith.constant dense<0.000000e+00> : vector<2x64xf32>
    %547 = tpu.matmul %515, %479, %cst_128 {dimension_numbers = #tpu.dot_dimension_numbers<[1], [0], [0], [1], [0, 0, 1, 1], [], []>} : vector<2x16xf32>, vector<16x64xf32>, vector<2x64xf32> -> vector<2x64xf32>
    %548 = arith.addf %546, %547 : vector<2x64xf32>
    %549 = vector.extract_strided_slice %548 {offsets = [0, 0], sizes = [2, 16], strides = [1, 1]} : vector<2x64xf32> to vector<2x16xf32>
    %550 = arith.negf %549 : vector<2x16xf32>
    %551 = math.exp %550 : vector<2x16xf32>
    %cst_129 = arith.constant 1.000000e+00 : f32
    %552 = vector.broadcast %cst_129 : f32 to vector<2x16xf32>
    %553 = arith.addf %552, %551 : vector<2x16xf32>
    %554 = arith.divf %552, %553 : vector<2x16xf32>
    %555 = vector.extract_strided_slice %548 {offsets = [0, 16], sizes = [2, 16], strides = [1, 1]} : vector<2x64xf32> to vector<2x16xf32>
    %556 = arith.negf %555 : vector<2x16xf32>
    %557 = math.exp %556 : vector<2x16xf32>
    %cst_130 = arith.constant 1.000000e+00 : f32
    %558 = vector.broadcast %cst_130 : f32 to vector<2x16xf32>
    %559 = arith.addf %558, %557 : vector<2x16xf32>
    %560 = arith.divf %558, %559 : vector<2x16xf32>
    %561 = vector.extract_strided_slice %548 {offsets = [0, 32], sizes = [2, 16], strides = [1, 1]} : vector<2x64xf32> to vector<2x16xf32>
    %562 = math.tanh %561 : vector<2x16xf32>
    %563 = vector.extract_strided_slice %548 {offsets = [0, 48], sizes = [2, 16], strides = [1, 1]} : vector<2x64xf32> to vector<2x16xf32>
    %564 = arith.negf %563 : vector<2x16xf32>
    %565 = math.exp %564 : vector<2x16xf32>
    %cst_131 = arith.constant 1.000000e+00 : f32
    %566 = vector.broadcast %cst_131 : f32 to vector<2x16xf32>
    %567 = arith.addf %566, %565 : vector<2x16xf32>
    %568 = arith.divf %566, %567 : vector<2x16xf32>
    %569 = arith.mulf %560, %513 : vector<2x16xf32>
    %570 = arith.mulf %554, %562 : vector<2x16xf32>
    %571 = arith.addf %569, %570 : vector<2x16xf32>
    %572 = math.tanh %571 : vector<2x16xf32>
    %573 = arith.mulf %568, %572 : vector<2x16xf32>
    %c2_132 = arith.constant 2 : index
    %c0_133 = arith.constant 0 : index
    %574 = vector.load %arg34[%c2_132, %c0_133] : memref<16x32xf32, #tpu.memory_space<vmem>>, vector<2x16xf32>
    tpu.vector_store %arg34[%c2_132, %c0_133], %573 {strides = array<i32>} : memref<16x32xf32, #tpu.memory_space<vmem>>, vector<2x16xf32>,
    %575 = vector.extract_strided_slice %483 {offsets = [12, 64], sizes = [2, 64], strides = [1, 1]} : vector<16x128xf32> to vector<2x64xf32>
    %cst_134 = arith.constant dense<0.000000e+00> : vector<2x64xf32>
    %576 = tpu.matmul %544, %480, %cst_134 {dimension_numbers = #tpu.dot_dimension_numbers<[1], [0], [0], [1], [0, 0, 1, 1], [], []>} : vector<2x16xf32>, vector<16x64xf32>, vector<2x64xf32> -> vector<2x64xf32>
    %577 = arith.addf %575, %576 : vector<2x64xf32>
    %578 = vector.extract_strided_slice %577 {offsets = [0, 0], sizes = [2, 16], strides = [1, 1]} : vector<2x64xf32> to vector<2x16xf32>
    %579 = arith.negf %578 : vector<2x16xf32>
    %580 = math.exp %579 : vector<2x16xf32>
    %cst_135 = arith.constant 1.000000e+00 : f32
    %581 = vector.broadcast %cst_135 : f32 to vector<2x16xf32>
    %582 = arith.addf %581, %580 : vector<2x16xf32>
    %583 = arith.divf %581, %582 : vector<2x16xf32>
    %584 = vector.extract_strided_slice %577 {offsets = [0, 16], sizes = [2, 16], strides = [1, 1]} : vector<2x64xf32> to vector<2x16xf32>
    %585 = arith.negf %584 : vector<2x16xf32>
    %586 = math.exp %585 : vector<2x16xf32>
    %cst_136 = arith.constant 1.000000e+00 : f32
    %587 = vector.broadcast %cst_136 : f32 to vector<2x16xf32>
    %588 = arith.addf %587, %586 : vector<2x16xf32>
    %589 = arith.divf %587, %588 : vector<2x16xf32>
    %590 = vector.extract_strided_slice %577 {offsets = [0, 32], sizes = [2, 16], strides = [1, 1]} : vector<2x64xf32> to vector<2x16xf32>
    %591 = math.tanh %590 : vector<2x16xf32>
    %592 = vector.extract_strided_slice %577 {offsets = [0, 48], sizes = [2, 16], strides = [1, 1]} : vector<2x64xf32> to vector<2x16xf32>
    %593 = arith.negf %592 : vector<2x16xf32>
    %594 = math.exp %593 : vector<2x16xf32>
    %cst_137 = arith.constant 1.000000e+00 : f32
    %595 = vector.broadcast %cst_137 : f32 to vector<2x16xf32>
    %596 = arith.addf %595, %594 : vector<2x16xf32>
    %597 = arith.divf %595, %596 : vector<2x16xf32>
    %598 = arith.mulf %589, %542 : vector<2x16xf32>
    %599 = arith.mulf %583, %591 : vector<2x16xf32>
    %600 = arith.addf %598, %599 : vector<2x16xf32>
    %601 = math.tanh %600 : vector<2x16xf32>
    %602 = arith.mulf %597, %601 : vector<2x16xf32>
    %c12_138 = arith.constant 12 : index
    %c16_139 = arith.constant 16 : index
    %603 = vector.load %arg34[%c12_138, %c16_139] : memref<16x32xf32, #tpu.memory_space<vmem>>, vector<2x16xf32>
    tpu.vector_store %arg34[%c12_138, %c16_139], %602 {strides = array<i32>} : memref<16x32xf32, #tpu.memory_space<vmem>>, vector<2x16xf32>,
    %604 = vector.extract_strided_slice %483 {offsets = [4, 0], sizes = [2, 64], strides = [1, 1]} : vector<16x128xf32> to vector<2x64xf32>
    %cst_140 = arith.constant dense<0.000000e+00> : vector<2x64xf32>
    %605 = tpu.matmul %573, %479, %cst_140 {dimension_numbers = #tpu.dot_dimension_numbers<[1], [0], [0], [1], [0, 0, 1, 1], [], []>} : vector<2x16xf32>, vector<16x64xf32>, vector<2x64xf32> -> vector<2x64xf32>
    %606 = arith.addf %604, %605 : vector<2x64xf32>
    %607 = vector.extract_strided_slice %606 {offsets = [0, 0], sizes = [2, 16], strides = [1, 1]} : vector<2x64xf32> to vector<2x16xf32>
    %608 = arith.negf %607 : vector<2x16xf32>
    %609 = math.exp %608 : vector<2x16xf32>
    %cst_141 = arith.constant 1.000000e+00 : f32
    %610 = vector.broadcast %cst_141 : f32 to vector<2x16xf32>
    %611 = arith.addf %610, %609 : vector<2x16xf32>
    %612 = arith.divf %610, %611 : vector<2x16xf32>
    %613 = vector.extract_strided_slice %606 {offsets = [0, 16], sizes = [2, 16], strides = [1, 1]} : vector<2x64xf32> to vector<2x16xf32>
    %614 = arith.negf %613 : vector<2x16xf32>
    %615 = math.exp %614 : vector<2x16xf32>
    %cst_142 = arith.constant 1.000000e+00 : f32
    %616 = vector.broadcast %cst_142 : f32 to vector<2x16xf32>
    %617 = arith.addf %616, %615 : vector<2x16xf32>
    %618 = arith.divf %616, %617 : vector<2x16xf32>
    %619 = vector.extract_strided_slice %606 {offsets = [0, 32], sizes = [2, 16], strides = [1, 1]} : vector<2x64xf32> to vector<2x16xf32>
    %620 = math.tanh %619 : vector<2x16xf32>
    %621 = vector.extract_strided_slice %606 {offsets = [0, 48], sizes = [2, 16], strides = [1, 1]} : vector<2x64xf32> to vector<2x16xf32>
    %622 = arith.negf %621 : vector<2x16xf32>
    %623 = math.exp %622 : vector<2x16xf32>
    %cst_143 = arith.constant 1.000000e+00 : f32
    %624 = vector.broadcast %cst_143 : f32 to vector<2x16xf32>
    %625 = arith.addf %624, %623 : vector<2x16xf32>
    %626 = arith.divf %624, %625 : vector<2x16xf32>
    %627 = arith.mulf %618, %571 : vector<2x16xf32>
    %628 = arith.mulf %612, %620 : vector<2x16xf32>
    %629 = arith.addf %627, %628 : vector<2x16xf32>
    %630 = math.tanh %629 : vector<2x16xf32>
    %631 = arith.mulf %626, %630 : vector<2x16xf32>
    %c4_144 = arith.constant 4 : index
    %c0_145 = arith.constant 0 : index
    %632 = vector.load %arg34[%c4_144, %c0_145] : memref<16x32xf32, #tpu.memory_space<vmem>>, vector<2x16xf32>
    tpu.vector_store %arg34[%c4_144, %c0_145], %631 {strides = array<i32>} : memref<16x32xf32, #tpu.memory_space<vmem>>, vector<2x16xf32>,
    %633 = vector.extract_strided_slice %483 {offsets = [10, 64], sizes = [2, 64], strides = [1, 1]} : vector<16x128xf32> to vector<2x64xf32>
    %cst_146 = arith.constant dense<0.000000e+00> : vector<2x64xf32>
    %634 = tpu.matmul %602, %480, %cst_146 {dimension_numbers = #tpu.dot_dimension_numbers<[1], [0], [0], [1], [0, 0, 1, 1], [], []>} : vector<2x16xf32>, vector<16x64xf32>, vector<2x64xf32> -> vector<2x64xf32>
    %635 = arith.addf %633, %634 : vector<2x64xf32>
    %636 = vector.extract_strided_slice %635 {offsets = [0, 0], sizes = [2, 16], strides = [1, 1]} : vector<2x64xf32> to vector<2x16xf32>
    %637 = arith.negf %636 : vector<2x16xf32>
    %638 = math.exp %637 : vector<2x16xf32>
    %cst_147 = arith.constant 1.000000e+00 : f32
    %639 = vector.broadcast %cst_147 : f32 to vector<2x16xf32>
    %640 = arith.addf %639, %638 : vector<2x16xf32>
    %641 = arith.divf %639, %640 : vector<2x16xf32>
    %642 = vector.extract_strided_slice %635 {offsets = [0, 16], sizes = [2, 16], strides = [1, 1]} : vector<2x64xf32> to vector<2x16xf32>
    %643 = arith.negf %642 : vector<2x16xf32>
    %644 = math.exp %643 : vector<2x16xf32>
    %cst_148 = arith.constant 1.000000e+00 : f32
    %645 = vector.broadcast %cst_148 : f32 to vector<2x16xf32>
    %646 = arith.addf %645, %644 : vector<2x16xf32>
    %647 = arith.divf %645, %646 : vector<2x16xf32>
    %648 = vector.extract_strided_slice %635 {offsets = [0, 32], sizes = [2, 16], strides = [1, 1]} : vector<2x64xf32> to vector<2x16xf32>
    %649 = math.tanh %648 : vector<2x16xf32>
    %650 = vector.extract_strided_slice %635 {offsets = [0, 48], sizes = [2, 16], strides = [1, 1]} : vector<2x64xf32> to vector<2x16xf32>
    %651 = arith.negf %650 : vector<2x16xf32>
    %652 = math.exp %651 : vector<2x16xf32>
    %cst_149 = arith.constant 1.000000e+00 : f32
    %653 = vector.broadcast %cst_149 : f32 to vector<2x16xf32>
    %654 = arith.addf %653, %652 : vector<2x16xf32>
    %655 = arith.divf %653, %654 : vector<2x16xf32>
    %656 = arith.mulf %647, %600 : vector<2x16xf32>
    %657 = arith.mulf %641, %649 : vector<2x16xf32>
    %658 = arith.addf %656, %657 : vector<2x16xf32>
    %659 = math.tanh %658 : vector<2x16xf32>
    %660 = arith.mulf %655, %659 : vector<2x16xf32>
    %c10_150 = arith.constant 10 : index
    %c16_151 = arith.constant 16 : index
    %661 = vector.load %arg34[%c10_150, %c16_151] : memref<16x32xf32, #tpu.memory_space<vmem>>, vector<2x16xf32>
    tpu.vector_store %arg34[%c10_150, %c16_151], %660 {strides = array<i32>} : memref<16x32xf32, #tpu.memory_space<vmem>>, vector<2x16xf32>,
    %662 = vector.extract_strided_slice %483 {offsets = [6, 0], sizes = [2, 64], strides = [1, 1]} : vector<16x128xf32> to vector<2x64xf32>
    %cst_152 = arith.constant dense<0.000000e+00> : vector<2x64xf32>
    %663 = tpu.matmul %631, %479, %cst_152 {dimension_numbers = #tpu.dot_dimension_numbers<[1], [0], [0], [1], [0, 0, 1, 1], [], []>} : vector<2x16xf32>, vector<16x64xf32>, vector<2x64xf32> -> vector<2x64xf32>
    %664 = arith.addf %662, %663 : vector<2x64xf32>
    %665 = vector.extract_strided_slice %664 {offsets = [0, 0], sizes = [2, 16], strides = [1, 1]} : vector<2x64xf32> to vector<2x16xf32>
    %666 = arith.negf %665 : vector<2x16xf32>
    %667 = math.exp %666 : vector<2x16xf32>
    %cst_153 = arith.constant 1.000000e+00 : f32
    %668 = vector.broadcast %cst_153 : f32 to vector<2x16xf32>
    %669 = arith.addf %668, %667 : vector<2x16xf32>
    %670 = arith.divf %668, %669 : vector<2x16xf32>
    %671 = vector.extract_strided_slice %664 {offsets = [0, 16], sizes = [2, 16], strides = [1, 1]} : vector<2x64xf32> to vector<2x16xf32>
    %672 = arith.negf %671 : vector<2x16xf32>
    %673 = math.exp %672 : vector<2x16xf32>
    %cst_154 = arith.constant 1.000000e+00 : f32
    %674 = vector.broadcast %cst_154 : f32 to vector<2x16xf32>
    %675 = arith.addf %674, %673 : vector<2x16xf32>
    %676 = arith.divf %674, %675 : vector<2x16xf32>
    %677 = vector.extract_strided_slice %664 {offsets = [0, 32], sizes = [2, 16], strides = [1, 1]} : vector<2x64xf32> to vector<2x16xf32>
    %678 = math.tanh %677 : vector<2x16xf32>
    %679 = vector.extract_strided_slice %664 {offsets = [0, 48], sizes = [2, 16], strides = [1, 1]} : vector<2x64xf32> to vector<2x16xf32>
    %680 = arith.negf %679 : vector<2x16xf32>
    %681 = math.exp %680 : vector<2x16xf32>
    %cst_155 = arith.constant 1.000000e+00 : f32
    %682 = vector.broadcast %cst_155 : f32 to vector<2x16xf32>
    %683 = arith.addf %682, %681 : vector<2x16xf32>
    %684 = arith.divf %682, %683 : vector<2x16xf32>
    %685 = arith.mulf %676, %629 : vector<2x16xf32>
    %686 = arith.mulf %670, %678 : vector<2x16xf32>
    %687 = arith.addf %685, %686 : vector<2x16xf32>
    %688 = math.tanh %687 : vector<2x16xf32>
    %689 = arith.mulf %684, %688 : vector<2x16xf32>
    %c6_156 = arith.constant 6 : index
    %c0_157 = arith.constant 0 : index
    %690 = vector.load %arg34[%c6_156, %c0_157] : memref<16x32xf32, #tpu.memory_space<vmem>>, vector<2x16xf32>
    tpu.vector_store %arg34[%c6_156, %c0_157], %689 {strides = array<i32>} : memref<16x32xf32, #tpu.memory_space<vmem>>, vector<2x16xf32>,
    %691 = vector.extract_strided_slice %483 {offsets = [8, 64], sizes = [2, 64], strides = [1, 1]} : vector<16x128xf32> to vector<2x64xf32>
    %cst_158 = arith.constant dense<0.000000e+00> : vector<2x64xf32>
    %692 = tpu.matmul %660, %480, %cst_158 {dimension_numbers = #tpu.dot_dimension_numbers<[1], [0], [0], [1], [0, 0, 1, 1], [], []>} : vector<2x16xf32>, vector<16x64xf32>, vector<2x64xf32> -> vector<2x64xf32>
    %693 = arith.addf %691, %692 : vector<2x64xf32>
    %694 = vector.extract_strided_slice %693 {offsets = [0, 0], sizes = [2, 16], strides = [1, 1]} : vector<2x64xf32> to vector<2x16xf32>
    %695 = arith.negf %694 : vector<2x16xf32>
    %696 = math.exp %695 : vector<2x16xf32>
    %cst_159 = arith.constant 1.000000e+00 : f32
    %697 = vector.broadcast %cst_159 : f32 to vector<2x16xf32>
    %698 = arith.addf %697, %696 : vector<2x16xf32>
    %699 = arith.divf %697, %698 : vector<2x16xf32>
    %700 = vector.extract_strided_slice %693 {offsets = [0, 16], sizes = [2, 16], strides = [1, 1]} : vector<2x64xf32> to vector<2x16xf32>
    %701 = arith.negf %700 : vector<2x16xf32>
    %702 = math.exp %701 : vector<2x16xf32>
    %cst_160 = arith.constant 1.000000e+00 : f32
    %703 = vector.broadcast %cst_160 : f32 to vector<2x16xf32>
    %704 = arith.addf %703, %702 : vector<2x16xf32>
    %705 = arith.divf %703, %704 : vector<2x16xf32>
    %706 = vector.extract_strided_slice %693 {offsets = [0, 32], sizes = [2, 16], strides = [1, 1]} : vector<2x64xf32> to vector<2x16xf32>
    %707 = math.tanh %706 : vector<2x16xf32>
    %708 = vector.extract_strided_slice %693 {offsets = [0, 48], sizes = [2, 16], strides = [1, 1]} : vector<2x64xf32> to vector<2x16xf32>
    %709 = arith.negf %708 : vector<2x16xf32>
    %710 = math.exp %709 : vector<2x16xf32>
    %cst_161 = arith.constant 1.000000e+00 : f32
    %711 = vector.broadcast %cst_161 : f32 to vector<2x16xf32>
    %712 = arith.addf %711, %710 : vector<2x16xf32>
    %713 = arith.divf %711, %712 : vector<2x16xf32>
    %714 = arith.mulf %705, %658 : vector<2x16xf32>
    %715 = arith.mulf %699, %707 : vector<2x16xf32>
    %716 = arith.addf %714, %715 : vector<2x16xf32>
    %717 = math.tanh %716 : vector<2x16xf32>
    %718 = arith.mulf %713, %717 : vector<2x16xf32>
    %c8_162 = arith.constant 8 : index
    %c16_163 = arith.constant 16 : index
    %719 = vector.load %arg34[%c8_162, %c16_163] : memref<16x32xf32, #tpu.memory_space<vmem>>, vector<2x16xf32>
    tpu.vector_store %arg34[%c8_162, %c16_163], %718 {strides = array<i32>} : memref<16x32xf32, #tpu.memory_space<vmem>>, vector<2x16xf32>,
    %720 = vector.extract_strided_slice %483 {offsets = [8, 0], sizes = [2, 64], strides = [1, 1]} : vector<16x128xf32> to vector<2x64xf32>
    %cst_164 = arith.constant dense<0.000000e+00> : vector<2x64xf32>
    %721 = tpu.matmul %689, %479, %cst_164 {dimension_numbers = #tpu.dot_dimension_numbers<[1], [0], [0], [1], [0, 0, 1, 1], [], []>} : vector<2x16xf32>, vector<16x64xf32>, vector<2x64xf32> -> vector<2x64xf32>
    %722 = arith.addf %720, %721 : vector<2x64xf32>
    %723 = vector.extract_strided_slice %722 {offsets = [0, 0], sizes = [2, 16], strides = [1, 1]} : vector<2x64xf32> to vector<2x16xf32>
    %724 = arith.negf %723 : vector<2x16xf32>
    %725 = math.exp %724 : vector<2x16xf32>
    %cst_165 = arith.constant 1.000000e+00 : f32
    %726 = vector.broadcast %cst_165 : f32 to vector<2x16xf32>
    %727 = arith.addf %726, %725 : vector<2x16xf32>
    %728 = arith.divf %726, %727 : vector<2x16xf32>
    %729 = vector.extract_strided_slice %722 {offsets = [0, 16], sizes = [2, 16], strides = [1, 1]} : vector<2x64xf32> to vector<2x16xf32>
    %730 = arith.negf %729 : vector<2x16xf32>
    %731 = math.exp %730 : vector<2x16xf32>
    %cst_166 = arith.constant 1.000000e+00 : f32
    %732 = vector.broadcast %cst_166 : f32 to vector<2x16xf32>
    %733 = arith.addf %732, %731 : vector<2x16xf32>
    %734 = arith.divf %732, %733 : vector<2x16xf32>
    %735 = vector.extract_strided_slice %722 {offsets = [0, 32], sizes = [2, 16], strides = [1, 1]} : vector<2x64xf32> to vector<2x16xf32>
    %736 = math.tanh %735 : vector<2x16xf32>
    %737 = vector.extract_strided_slice %722 {offsets = [0, 48], sizes = [2, 16], strides = [1, 1]} : vector<2x64xf32> to vector<2x16xf32>
    %738 = arith.negf %737 : vector<2x16xf32>
    %739 = math.exp %738 : vector<2x16xf32>
    %cst_167 = arith.constant 1.000000e+00 : f32
    %740 = vector.broadcast %cst_167 : f32 to vector<2x16xf32>
    %741 = arith.addf %740, %739 : vector<2x16xf32>
    %742 = arith.divf %740, %741 : vector<2x16xf32>
    %743 = arith.mulf %734, %687 : vector<2x16xf32>
    %744 = arith.mulf %728, %736 : vector<2x16xf32>
    %745 = arith.addf %743, %744 : vector<2x16xf32>
    %746 = math.tanh %745 : vector<2x16xf32>
    %747 = arith.mulf %742, %746 : vector<2x16xf32>
    %c8_168 = arith.constant 8 : index
    %c0_169 = arith.constant 0 : index
    %748 = vector.load %arg34[%c8_168, %c0_169] : memref<16x32xf32, #tpu.memory_space<vmem>>, vector<2x16xf32>
    tpu.vector_store %arg34[%c8_168, %c0_169], %747 {strides = array<i32>} : memref<16x32xf32, #tpu.memory_space<vmem>>, vector<2x16xf32>,
    %749 = vector.extract_strided_slice %483 {offsets = [6, 64], sizes = [2, 64], strides = [1, 1]} : vector<16x128xf32> to vector<2x64xf32>
    %cst_170 = arith.constant dense<0.000000e+00> : vector<2x64xf32>
    %750 = tpu.matmul %718, %480, %cst_170 {dimension_numbers = #tpu.dot_dimension_numbers<[1], [0], [0], [1], [0, 0, 1, 1], [], []>} : vector<2x16xf32>, vector<16x64xf32>, vector<2x64xf32> -> vector<2x64xf32>
    %751 = arith.addf %749, %750 : vector<2x64xf32>
    %752 = vector.extract_strided_slice %751 {offsets = [0, 0], sizes = [2, 16], strides = [1, 1]} : vector<2x64xf32> to vector<2x16xf32>
    %753 = arith.negf %752 : vector<2x16xf32>
    %754 = math.exp %753 : vector<2x16xf32>
    %cst_171 = arith.constant 1.000000e+00 : f32
    %755 = vector.broadcast %cst_171 : f32 to vector<2x16xf32>
    %756 = arith.addf %755, %754 : vector<2x16xf32>
    %757 = arith.divf %755, %756 : vector<2x16xf32>
    %758 = vector.extract_strided_slice %751 {offsets = [0, 16], sizes = [2, 16], strides = [1, 1]} : vector<2x64xf32> to vector<2x16xf32>
    %759 = arith.negf %758 : vector<2x16xf32>
    %760 = math.exp %759 : vector<2x16xf32>
    %cst_172 = arith.constant 1.000000e+00 : f32
    %761 = vector.broadcast %cst_172 : f32 to vector<2x16xf32>
    %762 = arith.addf %761, %760 : vector<2x16xf32>
    %763 = arith.divf %761, %762 : vector<2x16xf32>
    %764 = vector.extract_strided_slice %751 {offsets = [0, 32], sizes = [2, 16], strides = [1, 1]} : vector<2x64xf32> to vector<2x16xf32>
    %765 = math.tanh %764 : vector<2x16xf32>
    %766 = vector.extract_strided_slice %751 {offsets = [0, 48], sizes = [2, 16], strides = [1, 1]} : vector<2x64xf32> to vector<2x16xf32>
    %767 = arith.negf %766 : vector<2x16xf32>
    %768 = math.exp %767 : vector<2x16xf32>
    %cst_173 = arith.constant 1.000000e+00 : f32
    %769 = vector.broadcast %cst_173 : f32 to vector<2x16xf32>
    %770 = arith.addf %769, %768 : vector<2x16xf32>
    %771 = arith.divf %769, %770 : vector<2x16xf32>
    %772 = arith.mulf %763, %716 : vector<2x16xf32>
    %773 = arith.mulf %757, %765 : vector<2x16xf32>
    %774 = arith.addf %772, %773 : vector<2x16xf32>
    %775 = math.tanh %774 : vector<2x16xf32>
    %776 = arith.mulf %771, %775 : vector<2x16xf32>
    %c6_174 = arith.constant 6 : index
    %c16_175 = arith.constant 16 : index
    %777 = vector.load %arg34[%c6_174, %c16_175] : memref<16x32xf32, #tpu.memory_space<vmem>>, vector<2x16xf32>
    tpu.vector_store %arg34[%c6_174, %c16_175], %776 {strides = array<i32>} : memref<16x32xf32, #tpu.memory_space<vmem>>, vector<2x16xf32>,
    %778 = vector.extract_strided_slice %483 {offsets = [10, 0], sizes = [2, 64], strides = [1, 1]} : vector<16x128xf32> to vector<2x64xf32>
    %cst_176 = arith.constant dense<0.000000e+00> : vector<2x64xf32>
    %779 = tpu.matmul %747, %479, %cst_176 {dimension_numbers = #tpu.dot_dimension_numbers<[1], [0], [0], [1], [0, 0, 1, 1], [], []>} : vector<2x16xf32>, vector<16x64xf32>, vector<2x64xf32> -> vector<2x64xf32>
    %780 = arith.addf %778, %779 : vector<2x64xf32>
    %781 = vector.extract_strided_slice %780 {offsets = [0, 0], sizes = [2, 16], strides = [1, 1]} : vector<2x64xf32> to vector<2x16xf32>
    %782 = arith.negf %781 : vector<2x16xf32>
    %783 = math.exp %782 : vector<2x16xf32>
    %cst_177 = arith.constant 1.000000e+00 : f32
    %784 = vector.broadcast %cst_177 : f32 to vector<2x16xf32>
    %785 = arith.addf %784, %783 : vector<2x16xf32>
    %786 = arith.divf %784, %785 : vector<2x16xf32>
    %787 = vector.extract_strided_slice %780 {offsets = [0, 16], sizes = [2, 16], strides = [1, 1]} : vector<2x64xf32> to vector<2x16xf32>
    %788 = arith.negf %787 : vector<2x16xf32>
    %789 = math.exp %788 : vector<2x16xf32>
    %cst_178 = arith.constant 1.000000e+00 : f32
    %790 = vector.broadcast %cst_178 : f32 to vector<2x16xf32>
    %791 = arith.addf %790, %789 : vector<2x16xf32>
    %792 = arith.divf %790, %791 : vector<2x16xf32>
    %793 = vector.extract_strided_slice %780 {offsets = [0, 32], sizes = [2, 16], strides = [1, 1]} : vector<2x64xf32> to vector<2x16xf32>
    %794 = math.tanh %793 : vector<2x16xf32>
    %795 = vector.extract_strided_slice %780 {offsets = [0, 48], sizes = [2, 16], strides = [1, 1]} : vector<2x64xf32> to vector<2x16xf32>
    %796 = arith.negf %795 : vector<2x16xf32>
    %797 = math.exp %796 : vector<2x16xf32>
    %cst_179 = arith.constant 1.000000e+00 : f32
    %798 = vector.broadcast %cst_179 : f32 to vector<2x16xf32>
    %799 = arith.addf %798, %797 : vector<2x16xf32>
    %800 = arith.divf %798, %799 : vector<2x16xf32>
    %801 = arith.mulf %792, %745 : vector<2x16xf32>
    %802 = arith.mulf %786, %794 : vector<2x16xf32>
    %803 = arith.addf %801, %802 : vector<2x16xf32>
    %804 = math.tanh %803 : vector<2x16xf32>
    %805 = arith.mulf %800, %804 : vector<2x16xf32>
    %c10_180 = arith.constant 10 : index
    %c0_181 = arith.constant 0 : index
    %806 = vector.load %arg34[%c10_180, %c0_181] : memref<16x32xf32, #tpu.memory_space<vmem>>, vector<2x16xf32>
    tpu.vector_store %arg34[%c10_180, %c0_181], %805 {strides = array<i32>} : memref<16x32xf32, #tpu.memory_space<vmem>>, vector<2x16xf32>,
    %807 = vector.extract_strided_slice %483 {offsets = [4, 64], sizes = [2, 64], strides = [1, 1]} : vector<16x128xf32> to vector<2x64xf32>
    %cst_182 = arith.constant dense<0.000000e+00> : vector<2x64xf32>
    %808 = tpu.matmul %776, %480, %cst_182 {dimension_numbers = #tpu.dot_dimension_numbers<[1], [0], [0], [1], [0, 0, 1, 1], [], []>} : vector<2x16xf32>, vector<16x64xf32>, vector<2x64xf32> -> vector<2x64xf32>
    %809 = arith.addf %807, %808 : vector<2x64xf32>
    %810 = vector.extract_strided_slice %809 {offsets = [0, 0], sizes = [2, 16], strides = [1, 1]} : vector<2x64xf32> to vector<2x16xf32>
    %811 = arith.negf %810 : vector<2x16xf32>
    %812 = math.exp %811 : vector<2x16xf32>
    %cst_183 = arith.constant 1.000000e+00 : f32
    %813 = vector.broadcast %cst_183 : f32 to vector<2x16xf32>
    %814 = arith.addf %813, %812 : vector<2x16xf32>
    %815 = arith.divf %813, %814 : vector<2x16xf32>
    %816 = vector.extract_strided_slice %809 {offsets = [0, 16], sizes = [2, 16], strides = [1, 1]} : vector<2x64xf32> to vector<2x16xf32>
    %817 = arith.negf %816 : vector<2x16xf32>
    %818 = math.exp %817 : vector<2x16xf32>
    %cst_184 = arith.constant 1.000000e+00 : f32
    %819 = vector.broadcast %cst_184 : f32 to vector<2x16xf32>
    %820 = arith.addf %819, %818 : vector<2x16xf32>
    %821 = arith.divf %819, %820 : vector<2x16xf32>
    %822 = vector.extract_strided_slice %809 {offsets = [0, 32], sizes = [2, 16], strides = [1, 1]} : vector<2x64xf32> to vector<2x16xf32>
    %823 = math.tanh %822 : vector<2x16xf32>
    %824 = vector.extract_strided_slice %809 {offsets = [0, 48], sizes = [2, 16], strides = [1, 1]} : vector<2x64xf32> to vector<2x16xf32>
    %825 = arith.negf %824 : vector<2x16xf32>
    %826 = math.exp %825 : vector<2x16xf32>
    %cst_185 = arith.constant 1.000000e+00 : f32
    %827 = vector.broadcast %cst_185 : f32 to vector<2x16xf32>
    %828 = arith.addf %827, %826 : vector<2x16xf32>
    %829 = arith.divf %827, %828 : vector<2x16xf32>
    %830 = arith.mulf %821, %774 : vector<2x16xf32>
    %831 = arith.mulf %815, %823 : vector<2x16xf32>
    %832 = arith.addf %830, %831 : vector<2x16xf32>
    %833 = math.tanh %832 : vector<2x16xf32>
    %834 = arith.mulf %829, %833 : vector<2x16xf32>
    %c4_186 = arith.constant 4 : index
    %c16_187 = arith.constant 16 : index
    %835 = vector.load %arg34[%c4_186, %c16_187] : memref<16x32xf32, #tpu.memory_space<vmem>>, vector<2x16xf32>
    tpu.vector_store %arg34[%c4_186, %c16_187], %834 {strides = array<i32>} : memref<16x32xf32, #tpu.memory_space<vmem>>, vector<2x16xf32>,
    %836 = vector.extract_strided_slice %483 {offsets = [12, 0], sizes = [2, 64], strides = [1, 1]} : vector<16x128xf32> to vector<2x64xf32>
    %cst_188 = arith.constant dense<0.000000e+00> : vector<2x64xf32>
    %837 = tpu.matmul %805, %479, %cst_188 {dimension_numbers = #tpu.dot_dimension_numbers<[1], [0], [0], [1], [0, 0, 1, 1], [], []>} : vector<2x16xf32>, vector<16x64xf32>, vector<2x64xf32> -> vector<2x64xf32>
    %838 = arith.addf %836, %837 : vector<2x64xf32>
    %839 = vector.extract_strided_slice %838 {offsets = [0, 0], sizes = [2, 16], strides = [1, 1]} : vector<2x64xf32> to vector<2x16xf32>
    %840 = arith.negf %839 : vector<2x16xf32>
    %841 = math.exp %840 : vector<2x16xf32>
    %cst_189 = arith.constant 1.000000e+00 : f32
    %842 = vector.broadcast %cst_189 : f32 to vector<2x16xf32>
    %843 = arith.addf %842, %841 : vector<2x16xf32>
    %844 = arith.divf %842, %843 : vector<2x16xf32>
    %845 = vector.extract_strided_slice %838 {offsets = [0, 16], sizes = [2, 16], strides = [1, 1]} : vector<2x64xf32> to vector<2x16xf32>
    %846 = arith.negf %845 : vector<2x16xf32>
    %847 = math.exp %846 : vector<2x16xf32>
    %cst_190 = arith.constant 1.000000e+00 : f32
    %848 = vector.broadcast %cst_190 : f32 to vector<2x16xf32>
    %849 = arith.addf %848, %847 : vector<2x16xf32>
    %850 = arith.divf %848, %849 : vector<2x16xf32>
    %851 = vector.extract_strided_slice %838 {offsets = [0, 32], sizes = [2, 16], strides = [1, 1]} : vector<2x64xf32> to vector<2x16xf32>
    %852 = math.tanh %851 : vector<2x16xf32>
    %853 = vector.extract_strided_slice %838 {offsets = [0, 48], sizes = [2, 16], strides = [1, 1]} : vector<2x64xf32> to vector<2x16xf32>
    %854 = arith.negf %853 : vector<2x16xf32>
    %855 = math.exp %854 : vector<2x16xf32>
    %cst_191 = arith.constant 1.000000e+00 : f32
    %856 = vector.broadcast %cst_191 : f32 to vector<2x16xf32>
    %857 = arith.addf %856, %855 : vector<2x16xf32>
    %858 = arith.divf %856, %857 : vector<2x16xf32>
    %859 = arith.mulf %850, %803 : vector<2x16xf32>
    %860 = arith.mulf %844, %852 : vector<2x16xf32>
    %861 = arith.addf %859, %860 : vector<2x16xf32>
    %862 = math.tanh %861 : vector<2x16xf32>
    %863 = arith.mulf %858, %862 : vector<2x16xf32>
    %c12_192 = arith.constant 12 : index
    %c0_193 = arith.constant 0 : index
    %864 = vector.load %arg34[%c12_192, %c0_193] : memref<16x32xf32, #tpu.memory_space<vmem>>, vector<2x16xf32>
    tpu.vector_store %arg34[%c12_192, %c0_193], %863 {strides = array<i32>} : memref<16x32xf32, #tpu.memory_space<vmem>>, vector<2x16xf32>,
    %865 = vector.extract_strided_slice %483 {offsets = [2, 64], sizes = [2, 64], strides = [1, 1]} : vector<16x128xf32> to vector<2x64xf32>
    %cst_194 = arith.constant dense<0.000000e+00> : vector<2x64xf32>
    %866 = tpu.matmul %834, %480, %cst_194 {dimension_numbers = #tpu.dot_dimension_numbers<[1], [0], [0], [1], [0, 0, 1, 1], [], []>} : vector<2x16xf32>, vector<16x64xf32>, vector<2x64xf32> -> vector<2x64xf32>
    %867 = arith.addf %865, %866 : vector<2x64xf32>
    %868 = vector.extract_strided_slice %867 {offsets = [0, 0], sizes = [2, 16], strides = [1, 1]} : vector<2x64xf32> to vector<2x16xf32>
    %869 = arith.negf %868 : vector<2x16xf32>
    %870 = math.exp %869 : vector<2x16xf32>
    %cst_195 = arith.constant 1.000000e+00 : f32
    %871 = vector.broadcast %cst_195 : f32 to vector<2x16xf32>
    %872 = arith.addf %871, %870 : vector<2x16xf32>
    %873 = arith.divf %871, %872 : vector<2x16xf32>
    %874 = vector.extract_strided_slice %867 {offsets = [0, 16], sizes = [2, 16], strides = [1, 1]} : vector<2x64xf32> to vector<2x16xf32>
    %875 = arith.negf %874 : vector<2x16xf32>
    %876 = math.exp %875 : vector<2x16xf32>
    %cst_196 = arith.constant 1.000000e+00 : f32
    %877 = vector.broadcast %cst_196 : f32 to vector<2x16xf32>
    %878 = arith.addf %877, %876 : vector<2x16xf32>
    %879 = arith.divf %877, %878 : vector<2x16xf32>
    %880 = vector.extract_strided_slice %867 {offsets = [0, 32], sizes = [2, 16], strides = [1, 1]} : vector<2x64xf32> to vector<2x16xf32>
    %881 = math.tanh %880 : vector<2x16xf32>
    %882 = vector.extract_strided_slice %867 {offsets = [0, 48], sizes = [2, 16], strides = [1, 1]} : vector<2x64xf32> to vector<2x16xf32>
    %883 = arith.negf %882 : vector<2x16xf32>
    %884 = math.exp %883 : vector<2x16xf32>
    %cst_197 = arith.constant 1.000000e+00 : f32
    %885 = vector.broadcast %cst_197 : f32 to vector<2x16xf32>
    %886 = arith.addf %885, %884 : vector<2x16xf32>
    %887 = arith.divf %885, %886 : vector<2x16xf32>
    %888 = arith.mulf %879, %832 : vector<2x16xf32>
    %889 = arith.mulf %873, %881 : vector<2x16xf32>
    %890 = arith.addf %888, %889 : vector<2x16xf32>
    %891 = math.tanh %890 : vector<2x16xf32>
    %892 = arith.mulf %887, %891 : vector<2x16xf32>
    %c2_198 = arith.constant 2 : index
    %c16_199 = arith.constant 16 : index
    %893 = vector.load %arg34[%c2_198, %c16_199] : memref<16x32xf32, #tpu.memory_space<vmem>>, vector<2x16xf32>
    tpu.vector_store %arg34[%c2_198, %c16_199], %892 {strides = array<i32>} : memref<16x32xf32, #tpu.memory_space<vmem>>, vector<2x16xf32>,
    %894 = vector.extract_strided_slice %483 {offsets = [14, 0], sizes = [2, 64], strides = [1, 1]} : vector<16x128xf32> to vector<2x64xf32>
    %cst_200 = arith.constant dense<0.000000e+00> : vector<2x64xf32>
    %895 = tpu.matmul %863, %479, %cst_200 {dimension_numbers = #tpu.dot_dimension_numbers<[1], [0], [0], [1], [0, 0, 1, 1], [], []>} : vector<2x16xf32>, vector<16x64xf32>, vector<2x64xf32> -> vector<2x64xf32>
    %896 = arith.addf %894, %895 : vector<2x64xf32>
    %897 = vector.extract_strided_slice %896 {offsets = [0, 0], sizes = [2, 16], strides = [1, 1]} : vector<2x64xf32> to vector<2x16xf32>
    %898 = arith.negf %897 : vector<2x16xf32>
    %899 = math.exp %898 : vector<2x16xf32>
    %cst_201 = arith.constant 1.000000e+00 : f32
    %900 = vector.broadcast %cst_201 : f32 to vector<2x16xf32>
    %901 = arith.addf %900, %899 : vector<2x16xf32>
    %902 = arith.divf %900, %901 : vector<2x16xf32>
    %903 = vector.extract_strided_slice %896 {offsets = [0, 16], sizes = [2, 16], strides = [1, 1]} : vector<2x64xf32> to vector<2x16xf32>
    %904 = arith.negf %903 : vector<2x16xf32>
    %905 = math.exp %904 : vector<2x16xf32>
    %cst_202 = arith.constant 1.000000e+00 : f32
    %906 = vector.broadcast %cst_202 : f32 to vector<2x16xf32>
    %907 = arith.addf %906, %905 : vector<2x16xf32>
    %908 = arith.divf %906, %907 : vector<2x16xf32>
    %909 = vector.extract_strided_slice %896 {offsets = [0, 32], sizes = [2, 16], strides = [1, 1]} : vector<2x64xf32> to vector<2x16xf32>
    %910 = math.tanh %909 : vector<2x16xf32>
    %911 = vector.extract_strided_slice %896 {offsets = [0, 48], sizes = [2, 16], strides = [1, 1]} : vector<2x64xf32> to vector<2x16xf32>
    %912 = arith.negf %911 : vector<2x16xf32>
    %913 = math.exp %912 : vector<2x16xf32>
    %cst_203 = arith.constant 1.000000e+00 : f32
    %914 = vector.broadcast %cst_203 : f32 to vector<2x16xf32>
    %915 = arith.addf %914, %913 : vector<2x16xf32>
    %916 = arith.divf %914, %915 : vector<2x16xf32>
    %917 = arith.mulf %908, %861 : vector<2x16xf32>
    %918 = arith.mulf %902, %910 : vector<2x16xf32>
    %919 = arith.addf %917, %918 : vector<2x16xf32>
    %920 = math.tanh %919 : vector<2x16xf32>
    %921 = arith.mulf %916, %920 : vector<2x16xf32>
    %c14_204 = arith.constant 14 : index
    %c0_205 = arith.constant 0 : index
    %922 = vector.load %arg34[%c14_204, %c0_205] : memref<16x32xf32, #tpu.memory_space<vmem>>, vector<2x16xf32>
    tpu.vector_store %arg34[%c14_204, %c0_205], %921 {strides = array<i32>} : memref<16x32xf32, #tpu.memory_space<vmem>>, vector<2x16xf32>,
    %923 = vector.extract_strided_slice %483 {offsets = [0, 64], sizes = [2, 64], strides = [1, 1]} : vector<16x128xf32> to vector<2x64xf32>
    %cst_206 = arith.constant dense<0.000000e+00> : vector<2x64xf32>
    %924 = tpu.matmul %892, %480, %cst_206 {dimension_numbers = #tpu.dot_dimension_numbers<[1], [0], [0], [1], [0, 0, 1, 1], [], []>} : vector<2x16xf32>, vector<16x64xf32>, vector<2x64xf32> -> vector<2x64xf32>
    %925 = arith.addf %923, %924 : vector<2x64xf32>
    %926 = vector.extract_strided_slice %925 {offsets = [0, 0], sizes = [2, 16], strides = [1, 1]} : vector<2x64xf32> to vector<2x16xf32>
    %927 = arith.negf %926 : vector<2x16xf32>
    %928 = math.exp %927 : vector<2x16xf32>
    %cst_207 = arith.constant 1.000000e+00 : f32
    %929 = vector.broadcast %cst_207 : f32 to vector<2x16xf32>
    %930 = arith.addf %929, %928 : vector<2x16xf32>
    %931 = arith.divf %929, %930 : vector<2x16xf32>
    %932 = vector.extract_strided_slice %925 {offsets = [0, 16], sizes = [2, 16], strides = [1, 1]} : vector<2x64xf32> to vector<2x16xf32>
    %933 = arith.negf %932 : vector<2x16xf32>
    %934 = math.exp %933 : vector<2x16xf32>
    %cst_208 = arith.constant 1.000000e+00 : f32
    %935 = vector.broadcast %cst_208 : f32 to vector<2x16xf32>
    %936 = arith.addf %935, %934 : vector<2x16xf32>
    %937 = arith.divf %935, %936 : vector<2x16xf32>
    %938 = vector.extract_strided_slice %925 {offsets = [0, 32], sizes = [2, 16], strides = [1, 1]} : vector<2x64xf32> to vector<2x16xf32>
    %939 = math.tanh %938 : vector<2x16xf32>
    %940 = vector.extract_strided_slice %925 {offsets = [0, 48], sizes = [2, 16], strides = [1, 1]} : vector<2x64xf32> to vector<2x16xf32>
    %941 = arith.negf %940 : vector<2x16xf32>
    %942 = math.exp %941 : vector<2x16xf32>
    %cst_209 = arith.constant 1.000000e+00 : f32
    %943 = vector.broadcast %cst_209 : f32 to vector<2x16xf32>
    %944 = arith.addf %943, %942 : vector<2x16xf32>
    %945 = arith.divf %943, %944 : vector<2x16xf32>
    %946 = arith.mulf %937, %890 : vector<2x16xf32>
    %947 = arith.mulf %931, %939 : vector<2x16xf32>
    %948 = arith.addf %946, %947 : vector<2x16xf32>
    %949 = math.tanh %948 : vector<2x16xf32>
    %950 = arith.mulf %945, %949 : vector<2x16xf32>
    %c0_210 = arith.constant 0 : index
    %c16_211 = arith.constant 16 : index
    %951 = vector.load %arg34[%c0_210, %c16_211] : memref<16x32xf32, #tpu.memory_space<vmem>>, vector<2x16xf32>
    tpu.vector_store %arg34[%c0_210, %c16_211], %950 {strides = array<i32>} : memref<16x32xf32, #tpu.memory_space<vmem>>, vector<2x16xf32>,
    %c0_212 = arith.constant 0 : index
    %c0_213 = arith.constant 0 : index
    %952 = vector.load %arg34[%c0_212, %c0_213] : memref<16x32xf32, #tpu.memory_space<vmem>>, vector<16x32xf32>
    %c0_214 = arith.constant 0 : index
    %c0_215 = arith.constant 0 : index
    %953 = vector.load %arg9[%c0_214, %c0_215] : memref<16x16xf32, #tpu.memory_space<vmem>>, vector<16x16xf32>
    %cst_216 = arith.constant dense<0.000000e+00> : vector<16x32xf32>
    %954 = tpu.matmul %953, %952, %cst_216 {dimension_numbers = #tpu.dot_dimension_numbers<[1], [0], [0], [1], [0, 0, 1, 1], [], []>} : vector<16x16xf32>, vector<16x32xf32>, vector<16x32xf32> -> vector<16x32xf32>
    %c0_217 = arith.constant 0 : index
    %c0_218 = arith.constant 0 : index
    %955 = vector.load %arg13[%c0_217, %c0_218] : memref<32x8xf32, #tpu.memory_space<vmem>>, vector<32x8xf32>
    %cst_219 = arith.constant dense<0.000000e+00> : vector<16x8xf32>
    %956 = tpu.matmul %954, %955, %cst_219 {dimension_numbers = #tpu.dot_dimension_numbers<[1], [0], [0], [1], [0, 0, 1, 1], [], []>} : vector<16x32xf32>, vector<32x8xf32>, vector<16x8xf32> -> vector<16x8xf32>
    %cst_220 = arith.constant dense<0xFF800000> : vector<8xf32>
    %957 = vector.multi_reduction <maximumf>, %956, %cst_220 [0] : vector<16x8xf32> to vector<8xf32>
    %958 = vector.shape_cast %957 : vector<8xf32> to vector<1x8xf32>
    %959 = vector.broadcast %958 : vector<1x8xf32> to vector<16x8xf32>
    %960 = arith.subf %956, %959 : vector<16x8xf32>
    %961 = math.exp %960 : vector<16x8xf32>
    %c0_221 = arith.constant 0 : index
    %c0_222 = arith.constant 0 : index
    %962 = vector.load %arg12[%c0_221, %c0_222] : memref<16x16xf32, #tpu.memory_space<vmem>>, vector<16x16xf32>
    %cst_223 = arith.constant dense<0.000000e+00> : vector<16x8xf32>
    %963 = tpu.matmul %962, %961, %cst_223 {dimension_numbers = #tpu.dot_dimension_numbers<[1], [0], [0], [1], [0, 0, 1, 1], [], []>} : vector<16x16xf32>, vector<16x8xf32>, vector<16x8xf32> -> vector<16x8xf32>
    %cst_224 = arith.constant 1.000000e-30 : f32
    %964 = vector.broadcast %cst_224 : f32 to vector<16x8xf32>
    %965 = arith.maximumf %963, %964 : vector<16x8xf32>
    %966 = tpu.reciprocal %965 {approx = true} : vector<16x8xf32> -> vector<16x8xf32>
    %967 = arith.mulf %961, %966 : vector<16x8xf32>
    %c0_225 = arith.constant 0 : index
    %c0_226 = arith.constant 0 : index
    %968 = vector.load %arg14[%c0_225, %c0_226] : memref<16x8xf32, #tpu.memory_space<vmem>>, vector<16x8xf32>
    %969 = arith.mulf %967, %968 : vector<16x8xf32>
    %cst_227 = arith.constant dense<0.000000e+00> : vector<16x8xf32>
    %970 = tpu.matmul %962, %969, %cst_227 {dimension_numbers = #tpu.dot_dimension_numbers<[1], [0], [0], [1], [0, 0, 1, 1], [], []>} : vector<16x16xf32>, vector<16x8xf32>, vector<16x8xf32> -> vector<16x8xf32>
    %cst_228 = arith.constant 1.000000e-30 : f32
    %971 = vector.broadcast %cst_228 : f32 to vector<16x8xf32>
    %972 = arith.maximumf %970, %971 : vector<16x8xf32>
    %973 = tpu.reciprocal %972 {approx = true} : vector<16x8xf32> -> vector<16x8xf32>
    %974 = arith.mulf %969, %973 : vector<16x8xf32>
    %c0_229 = arith.constant 0 : index
    %c0_230 = arith.constant 0 : index
    %975 = vector.load %arg15[%c0_229, %c0_230] : memref<16x8xf32, #tpu.memory_space<vmem>>, vector<16x8xf32>
    %976 = arith.mulf %974, %975 : vector<16x8xf32>
    %c0_231 = arith.constant 0 : index
    %c0_232 = arith.constant 0 : index
    %977 = vector.load %arg32[%c0_231, %c0_232] : memref<16x8xf32, #tpu.memory_space<vmem>>, vector<16x8xf32>
    tpu.vector_store %arg32[%c0_231, %c0_232], %976 {strides = array<i32>} : memref<16x8xf32, #tpu.memory_space<vmem>>, vector<16x8xf32>,
    %c0_233 = arith.constant 0 : index
    %c0_234 = arith.constant 0 : index
    %978 = vector.load %arg16[%c0_233, %c0_234] : memref<8x16xf32, #tpu.memory_space<vmem>>, vector<8x16xf32>
    %cst_235 = arith.constant dense<0.000000e+00> : vector<16x16xf32>
    %979 = tpu.matmul %976, %978, %cst_235 {dimension_numbers = #tpu.dot_dimension_numbers<[1], [0], [0], [1], [0, 0, 1, 1], [], []>} : vector<16x8xf32>, vector<8x16xf32>, vector<16x16xf32> -> vector<16x16xf32>
    %c0_236 = arith.constant 0 : index
    %c0_237 = arith.constant 0 : index
    %980 = vector.load %arg19[%c0_236, %c0_237] : memref<32x256xf32, #tpu.memory_space<vmem>>, vector<32x256xf32>
    %cst_238 = arith.constant dense<0.000000e+00> : vector<16x256xf32>
    %981 = tpu.matmul %954, %980, %cst_238 {dimension_numbers = #tpu.dot_dimension_numbers<[1], [0], [0], [1], [0, 0, 1, 1], [], []>} : vector<16x32xf32>, vector<32x256xf32>, vector<16x256xf32> -> vector<16x256xf32>
    %cst_239 = arith.constant 0.000000e+00 : f32
    %982 = vector.broadcast %cst_239 : f32 to vector<16x32xf32>
    %c0_240 = arith.constant 0 : index
    %c0_241 = arith.constant 0 : index
    %c0_242 = arith.constant 0 : index
    %983 = vector.load %arg17[%c0_240, %c0_241, %c0_242] : memref<8x16x16xf32, #tpu.memory_space<vmem>>, vector<1x16x16xf32>
    %984 = vector.shape_cast %983 : vector<1x16x16xf32> to vector<16x16xf32>
    %985 = arith.mulf %984, %979 : vector<16x16xf32>
    %986 = vector.extract_strided_slice %981 {offsets = [0, 0], sizes = [16, 32], strides = [1, 1]} : vector<16x256xf32> to vector<16x32xf32>
    %cst_243 = arith.constant dense<0.000000e+00> : vector<16x32xf32>
    %987 = tpu.matmul %985, %986, %cst_243 {dimension_numbers = #tpu.dot_dimension_numbers<[1], [0], [0], [1], [0, 0, 1, 1], [], []>} : vector<16x16xf32>, vector<16x32xf32>, vector<16x32xf32> -> vector<16x32xf32>
    %988 = arith.addf %982, %987 : vector<16x32xf32>
    %c1 = arith.constant 1 : index
    %c0_244 = arith.constant 0 : index
    %c0_245 = arith.constant 0 : index
    %989 = vector.load %arg17[%c1, %c0_244, %c0_245] : memref<8x16x16xf32, #tpu.memory_space<vmem>>, vector<1x16x16xf32>
    %990 = vector.shape_cast %989 : vector<1x16x16xf32> to vector<16x16xf32>
    %991 = arith.mulf %990, %979 : vector<16x16xf32>
    %992 = vector.extract_strided_slice %981 {offsets = [0, 32], sizes = [16, 32], strides = [1, 1]} : vector<16x256xf32> to vector<16x32xf32>
    %cst_246 = arith.constant dense<0.000000e+00> : vector<16x32xf32>
    %993 = tpu.matmul %991, %992, %cst_246 {dimension_numbers = #tpu.dot_dimension_numbers<[1], [0], [0], [1], [0, 0, 1, 1], [], []>} : vector<16x16xf32>, vector<16x32xf32>, vector<16x32xf32> -> vector<16x32xf32>
    %994 = arith.addf %988, %993 : vector<16x32xf32>
    %c2_247 = arith.constant 2 : index
    %c0_248 = arith.constant 0 : index
    %c0_249 = arith.constant 0 : index
    %995 = vector.load %arg17[%c2_247, %c0_248, %c0_249] : memref<8x16x16xf32, #tpu.memory_space<vmem>>, vector<1x16x16xf32>
    %996 = vector.shape_cast %995 : vector<1x16x16xf32> to vector<16x16xf32>
    %997 = arith.mulf %996, %979 : vector<16x16xf32>
    %998 = vector.extract_strided_slice %981 {offsets = [0, 64], sizes = [16, 32], strides = [1, 1]} : vector<16x256xf32> to vector<16x32xf32>
    %cst_250 = arith.constant dense<0.000000e+00> : vector<16x32xf32>
    %999 = tpu.matmul %997, %998, %cst_250 {dimension_numbers = #tpu.dot_dimension_numbers<[1], [0], [0], [1], [0, 0, 1, 1], [], []>} : vector<16x16xf32>, vector<16x32xf32>, vector<16x32xf32> -> vector<16x32xf32>
    %1000 = arith.addf %994, %999 : vector<16x32xf32>
    %c3 = arith.constant 3 : index
    %c0_251 = arith.constant 0 : index
    %c0_252 = arith.constant 0 : index
    %1001 = vector.load %arg17[%c3, %c0_251, %c0_252] : memref<8x16x16xf32, #tpu.memory_space<vmem>>, vector<1x16x16xf32>
    %1002 = vector.shape_cast %1001 : vector<1x16x16xf32> to vector<16x16xf32>
    %1003 = arith.mulf %1002, %979 : vector<16x16xf32>
    %1004 = vector.extract_strided_slice %981 {offsets = [0, 96], sizes = [16, 32], strides = [1, 1]} : vector<16x256xf32> to vector<16x32xf32>
    %cst_253 = arith.constant dense<0.000000e+00> : vector<16x32xf32>
    %1005 = tpu.matmul %1003, %1004, %cst_253 {dimension_numbers = #tpu.dot_dimension_numbers<[1], [0], [0], [1], [0, 0, 1, 1], [], []>} : vector<16x16xf32>, vector<16x32xf32>, vector<16x32xf32> -> vector<16x32xf32>
    %1006 = arith.addf %1000, %1005 : vector<16x32xf32>
    %c4_254 = arith.constant 4 : index
    %c0_255 = arith.constant 0 : index
    %c0_256 = arith.constant 0 : index
    %1007 = vector.load %arg17[%c4_254, %c0_255, %c0_256] : memref<8x16x16xf32, #tpu.memory_space<vmem>>, vector<1x16x16xf32>
    %1008 = vector.shape_cast %1007 : vector<1x16x16xf32> to vector<16x16xf32>
    %1009 = arith.mulf %1008, %979 : vector<16x16xf32>
    %1010 = vector.extract_strided_slice %981 {offsets = [0, 128], sizes = [16, 32], strides = [1, 1]} : vector<16x256xf32> to vector<16x32xf32>
    %cst_257 = arith.constant dense<0.000000e+00> : vector<16x32xf32>
    %1011 = tpu.matmul %1009, %1010, %cst_257 {dimension_numbers = #tpu.dot_dimension_numbers<[1], [0], [0], [1], [0, 0, 1, 1], [], []>} : vector<16x16xf32>, vector<16x32xf32>, vector<16x32xf32> -> vector<16x32xf32>
    %1012 = arith.addf %1006, %1011 : vector<16x32xf32>
    %c5 = arith.constant 5 : index
    %c0_258 = arith.constant 0 : index
    %c0_259 = arith.constant 0 : index
    %1013 = vector.load %arg17[%c5, %c0_258, %c0_259] : memref<8x16x16xf32, #tpu.memory_space<vmem>>, vector<1x16x16xf32>
    %1014 = vector.shape_cast %1013 : vector<1x16x16xf32> to vector<16x16xf32>
    %1015 = arith.mulf %1014, %979 : vector<16x16xf32>
    %1016 = vector.extract_strided_slice %981 {offsets = [0, 160], sizes = [16, 32], strides = [1, 1]} : vector<16x256xf32> to vector<16x32xf32>
    %cst_260 = arith.constant dense<0.000000e+00> : vector<16x32xf32>
    %1017 = tpu.matmul %1015, %1016, %cst_260 {dimension_numbers = #tpu.dot_dimension_numbers<[1], [0], [0], [1], [0, 0, 1, 1], [], []>} : vector<16x16xf32>, vector<16x32xf32>, vector<16x32xf32> -> vector<16x32xf32>
    %1018 = arith.addf %1012, %1017 : vector<16x32xf32>
    %c6_261 = arith.constant 6 : index
    %c0_262 = arith.constant 0 : index
    %c0_263 = arith.constant 0 : index
    %1019 = vector.load %arg17[%c6_261, %c0_262, %c0_263] : memref<8x16x16xf32, #tpu.memory_space<vmem>>, vector<1x16x16xf32>
    %1020 = vector.shape_cast %1019 : vector<1x16x16xf32> to vector<16x16xf32>
    %1021 = arith.mulf %1020, %979 : vector<16x16xf32>
    %1022 = vector.extract_strided_slice %981 {offsets = [0, 192], sizes = [16, 32], strides = [1, 1]} : vector<16x256xf32> to vector<16x32xf32>
    %cst_264 = arith.constant dense<0.000000e+00> : vector<16x32xf32>
    %1023 = tpu.matmul %1021, %1022, %cst_264 {dimension_numbers = #tpu.dot_dimension_numbers<[1], [0], [0], [1], [0, 0, 1, 1], [], []>} : vector<16x16xf32>, vector<16x32xf32>, vector<16x32xf32> -> vector<16x32xf32>
    %1024 = arith.addf %1018, %1023 : vector<16x32xf32>
    %c7 = arith.constant 7 : index
    %c0_265 = arith.constant 0 : index
    %c0_266 = arith.constant 0 : index
    %1025 = vector.load %arg17[%c7, %c0_265, %c0_266] : memref<8x16x16xf32, #tpu.memory_space<vmem>>, vector<1x16x16xf32>
    %1026 = vector.shape_cast %1025 : vector<1x16x16xf32> to vector<16x16xf32>
    %1027 = arith.mulf %1026, %979 : vector<16x16xf32>
    %1028 = vector.extract_strided_slice %981 {offsets = [0, 224], sizes = [16, 32], strides = [1, 1]} : vector<16x256xf32> to vector<16x32xf32>
    %cst_267 = arith.constant dense<0.000000e+00> : vector<16x32xf32>
    %1029 = tpu.matmul %1027, %1028, %cst_267 {dimension_numbers = #tpu.dot_dimension_numbers<[1], [0], [0], [1], [0, 0, 1, 1], [], []>} : vector<16x16xf32>, vector<16x32xf32>, vector<16x32xf32> -> vector<16x32xf32>
    %1030 = arith.addf %1024, %1029 : vector<16x32xf32>
    %c0_268 = arith.constant 0 : index
    %c0_269 = arith.constant 0 : index
    %1031 = vector.load %arg20[%c0_268, %c0_269] : memref<32x32xf32, #tpu.memory_space<vmem>>, vector<32x32xf32>
    %cst_270 = arith.constant dense<0.000000e+00> : vector<16x32xf32>
    %1032 = tpu.matmul %954, %1031, %cst_270 {dimension_numbers = #tpu.dot_dimension_numbers<[1], [0], [0], [1], [0, 0, 1, 1], [], []>} : vector<16x32xf32>, vector<32x32xf32>, vector<16x32xf32> -> vector<16x32xf32>
    %1033 = arith.addf %1030, %1032 : vector<16x32xf32>
    %c0_271 = arith.constant 0 : index
    %c0_272 = arith.constant 0 : index
    %1034 = vector.load %arg21[%c0_271, %c0_272] : memref<1x32xf32, #tpu.memory_space<vmem>>, vector<1x32xf32>
    %1035 = vector.broadcast %1034 : vector<1x32xf32> to vector<16x32xf32>
    %1036 = arith.addf %1033, %1035 : vector<16x32xf32>
    %c0_273 = arith.constant 0 : index
    %c0_274 = arith.constant 0 : index
    %1037 = vector.load %arg22[%c0_273, %c0_274] : memref<32x32xf32, #tpu.memory_space<vmem>>, vector<32x32xf32>
    %cst_275 = arith.constant dense<0.000000e+00> : vector<16x32xf32>
    %1038 = tpu.matmul %1036, %1037, %cst_275 {dimension_numbers = #tpu.dot_dimension_numbers<[1], [0], [0], [1], [0, 0, 1, 1], [], []>} : vector<16x32xf32>, vector<32x32xf32>, vector<16x32xf32> -> vector<16x32xf32>
    %c0_276 = arith.constant 0 : index
    %c0_277 = arith.constant 0 : index
    %1039 = vector.load %arg18[%c0_276, %c0_277] : memref<16x16xf32, #tpu.memory_space<vmem>>, vector<16x16xf32>
    %cst_278 = arith.constant dense<0.000000e+00> : vector<16x32xf32>
    %1040 = tpu.matmul %1039, %1038, %cst_278 {dimension_numbers = #tpu.dot_dimension_numbers<[1], [0], [0], [1], [0, 0, 1, 1], [], []>} : vector<16x16xf32>, vector<16x32xf32>, vector<16x32xf32> -> vector<16x32xf32>
    %c0_279 = arith.constant 0 : index
    %c0_280 = arith.constant 0 : index
    %1041 = vector.load %arg23[%c0_279, %c0_280] : memref<32x32xf32, #tpu.memory_space<vmem>>, vector<32x32xf32>
    %cst_281 = arith.constant dense<0.000000e+00> : vector<16x32xf32>
    %1042 = tpu.matmul %1036, %1041, %cst_281 {dimension_numbers = #tpu.dot_dimension_numbers<[1], [0], [0], [1], [0, 0, 1, 1], [], []>} : vector<16x32xf32>, vector<32x32xf32>, vector<16x32xf32> -> vector<16x32xf32>
    %1043 = arith.addf %1040, %1042 : vector<16x32xf32>
    %c0_282 = arith.constant 0 : index
    %c0_283 = arith.constant 0 : index
    %1044 = vector.load %arg24[%c0_282, %c0_283] : memref<1x32xf32, #tpu.memory_space<vmem>>, vector<1x32xf32>
    %1045 = vector.broadcast %1044 : vector<1x32xf32> to vector<16x32xf32>
    %1046 = arith.addf %1043, %1045 : vector<16x32xf32>
    %1047 = tpu.concatenate %954, %1046 in 1 : vector<16x32xf32>, vector<16x32xf32> -> vector<16x64xf32>
    %c0_284 = arith.constant 0 : index
    %c0_285 = arith.constant 0 : index
    %1048 = vector.load %arg10[%c0_284, %c0_285] : memref<16x1xf32, #tpu.memory_space<vmem>>, vector<16x1xf32>
    %c0_286 = arith.constant 0 : index
    %c0_287 = arith.constant 0 : index
    %1049 = vector.load %arg11[%c0_286, %c0_287] : memref<1x16xf32, #tpu.memory_space<vmem>>, vector<1x16xf32>
    %1050 = vector.broadcast %1048 : vector<16x1xf32> to vector<16x64xf32>
    %1051 = arith.mulf %1047, %1050 : vector<16x64xf32>
    %c0_288 = arith.constant 0 : index
    %c0_289 = arith.constant 0 : index
    %1052 = vector.load %arg25[%c0_288, %c0_289] : memref<64x64xf32, #tpu.memory_space<vmem>>, vector<64x64xf32>
    %cst_290 = arith.constant dense<0.000000e+00> : vector<16x64xf32>
    %1053 = tpu.matmul %1047, %1052, %cst_290 {dimension_numbers = #tpu.dot_dimension_numbers<[1], [0], [0], [1], [0, 0, 1, 1], [], []>} : vector<16x64xf32>, vector<64x64xf32>, vector<16x64xf32> -> vector<16x64xf32>
    %c0_291 = arith.constant 0 : index
    %c0_292 = arith.constant 0 : index
    %1054 = vector.load %arg26[%c0_291, %c0_292] : memref<1x64xf32, #tpu.memory_space<vmem>>, vector<1x64xf32>
    %1055 = vector.broadcast %1054 : vector<1x64xf32> to vector<16x64xf32>
    %1056 = arith.addf %1053, %1055 : vector<16x64xf32>
    %cst_293 = arith.constant dense<0.000000e+00> : vector<16x16xf32>
    %1057 = tpu.matmul %1056, %1051, %cst_293 {dimension_numbers = #tpu.dot_dimension_numbers<[1], [1], [0], [0], [0, 0, 1, 0], [], []>} : vector<16x64xf32>, vector<16x64xf32>, vector<16x16xf32> -> vector<16x16xf32>
    %1058 = vector.broadcast %1049 : vector<1x16xf32> to vector<16x16xf32>
    %1059 = arith.mulf %1057, %1058 : vector<16x16xf32>
    %1060 = math.tanh %1059 : vector<16x16xf32>
    %1061 = vector.broadcast %1049 : vector<1x16xf32> to vector<16x16xf32>
    %1062 = arith.mulf %962, %1061 : vector<16x16xf32>
    %1063 = math.exp %1060 : vector<16x16xf32>
    %1064 = arith.mulf %1063, %1062 : vector<16x16xf32>
    %cst_294 = arith.constant dense<0.000000e+00> : vector<16xf32>
    %1065 = vector.multi_reduction <add>, %1064, %cst_294 [1] : vector<16x16xf32> to vector<16xf32>
    %1066 = vector.shape_cast %1065 : vector<16xf32> to vector<16x1xf32>
    %cst_295 = arith.constant 1.000000e-30 : f32
    %1067 = vector.broadcast %cst_295 : f32 to vector<16x1xf32>
    %1068 = arith.maximumf %1066, %1067 : vector<16x1xf32>
    %1069 = tpu.reciprocal %1068 {approx = true} : vector<16x1xf32> -> vector<16x1xf32>
    %1070 = vector.broadcast %1069 : vector<16x1xf32> to vector<16x16xf32>
    %1071 = arith.mulf %1064, %1070 : vector<16x16xf32>
    %cst_296 = arith.constant dense<0.000000e+00> : vector<16x64xf32>
    %1072 = tpu.matmul %1071, %1047, %cst_296 {dimension_numbers = #tpu.dot_dimension_numbers<[1], [0], [0], [1], [0, 0, 1, 1], [], []>} : vector<16x16xf32>, vector<16x64xf32>, vector<16x64xf32> -> vector<16x64xf32>
    %c0_297 = arith.constant 0 : index
    %c0_298 = arith.constant 0 : index
    %1073 = vector.load %arg27[%c0_297, %c0_298] : memref<64x32xf32, #tpu.memory_space<vmem>>, vector<64x32xf32>
    %cst_299 = arith.constant dense<0.000000e+00> : vector<16x32xf32>
    %1074 = tpu.matmul %1072, %1073, %cst_299 {dimension_numbers = #tpu.dot_dimension_numbers<[1], [0], [0], [1], [0, 0, 1, 1], [], []>} : vector<16x64xf32>, vector<64x32xf32>, vector<16x32xf32> -> vector<16x32xf32>
    %c0_300 = arith.constant 0 : index
    %c0_301 = arith.constant 0 : index
    %1075 = vector.load %arg28[%c0_300, %c0_301] : memref<1x32xf32, #tpu.memory_space<vmem>>, vector<1x32xf32>
    %1076 = vector.broadcast %1075 : vector<1x32xf32> to vector<16x32xf32>
    %1077 = arith.addf %1074, %1076 : vector<16x32xf32>
    %cst_302 = arith.constant 0.000000e+00 : f32
    %1078 = vector.broadcast %cst_302 : f32 to vector<16x32xf32>
    %1079 = arith.maximumf %1077, %1078 : vector<16x32xf32>
    %c0_303 = arith.constant 0 : index
    %c0_304 = arith.constant 0 : index
    %1080 = vector.load %arg29[%c0_303, %c0_304] : memref<32x128xf32, #tpu.memory_space<vmem>>, vector<32x128xf32>
    %cst_305 = arith.constant dense<0.000000e+00> : vector<16x128xf32>
    %1081 = tpu.matmul %1079, %1080, %cst_305 {dimension_numbers = #tpu.dot_dimension_numbers<[1], [0], [0], [1], [0, 0, 1, 1], [], []>} : vector<16x32xf32>, vector<32x128xf32>, vector<16x128xf32> -> vector<16x128xf32>
    %c0_306 = arith.constant 0 : index
    %c0_307 = arith.constant 0 : index
    %1082 = vector.load %arg30[%c0_306, %c0_307] : memref<1x128xf32, #tpu.memory_space<vmem>>, vector<1x128xf32>
    %1083 = vector.broadcast %1082 : vector<1x128xf32> to vector<16x128xf32>
    %1084 = arith.addf %1081, %1083 : vector<16x128xf32>
    %cst_308 = arith.constant dense<0xFF800000> : vector<16xf32>
    %1085 = vector.multi_reduction <maximumf>, %1084, %cst_308 [1] : vector<16x128xf32> to vector<16xf32>
    %1086 = vector.shape_cast %1085 : vector<16xf32> to vector<16x1xf32>
    %1087 = vector.broadcast %1086 : vector<16x1xf32> to vector<16x128xf32>
    %1088 = arith.subf %1084, %1087 : vector<16x128xf32>
    %1089 = math.exp %1088 : vector<16x128xf32>
    %cst_309 = arith.constant dense<0.000000e+00> : vector<16xf32>
    %1090 = vector.multi_reduction <add>, %1089, %cst_309 [1] : vector<16x128xf32> to vector<16xf32>
    %1091 = vector.shape_cast %1090 : vector<16xf32> to vector<16x1xf32>
    %1092 = math.log %1091 : vector<16x1xf32>
    %1093 = arith.addf %1086, %1092 : vector<16x1xf32>
    %1094 = vector.broadcast %1093 : vector<16x1xf32> to vector<16x128xf32>
    %1095 = arith.subf %1084, %1094 : vector<16x128xf32>
    %c0_310 = arith.constant 0 : index
    %c0_311 = arith.constant 0 : index
    %1096 = vector.load %arg31[%c0_310, %c0_311] : memref<16x128xf32, #tpu.memory_space<vmem>>, vector<16x128xf32>
    tpu.vector_store %arg31[%c0_310, %c0_311], %1095 {strides = array<i32>} : memref<16x128xf32, #tpu.memory_space<vmem>>, vector<16x128xf32>,
    return
  }
}

</mosaic_0001>

<bundles_post_ra>
// kernel: custom-call.2
= control target key start
LH: loop header
LB: loop body
LE: loop exit
PB: predicated region body
PF: predicated region fallthrough
CT: control target
= control target key end

     0   :  { %s6_s0 = inlined_call_operand.vmem [shape: f32[14,7], index: 0, kind: output, shape index: {}]  }

// kernel: dialogue_gcn_forward.1
= control target key start
LH: loop header
LB: loop body
LE: loop exit
PB: predicated region body
PF: predicated region fallthrough
CT: control target
= control target key end

     0   :  { %v7177_v0 = vmov 0.0   ;;  %s7178_s3 = smov 1   ;;  %vm7179_vm0 = vmmov 0   ;;  %s7180_s7 = smov 3   ;;  %vm150_vm1 = vcmask 261120   ;;  %vm232_vm2 = vcmask 130048   ;;  %s8194_s0 = inlined_call_operand.smem [shape: u32[33], index: -1, kind: input, shape index: {}] }
   0x1   :  { %6418 = vmatprep.subr.mxu1 %v7177_v0  ;;  %s6024_s6 = sld [smem:[%s8194_s0 + %s7178_s3]]   ;;  %6422 = vmatprep.mubr.msk.f32.mxu1 %vm7179_vm0, %v7177_v0  ;;  %s7181_s11 = smov 4   ;;  %vm335_vm3 = vcmask 123904   ;;  %vm776_vm4 = vcmask 128004   ;;  %vm441_vm5 = vcmask 261254   ;;  %vm890_vm6 = vcmask 257154  }
   0x2   :  { %s6026_s10 = sld [smem:[%s8194_s0 + %s7180_s7]]   ;;  %s7182_s18 = smov 64   ;;  %vm550_vm7 = vcmask 125954   ;;  %vm1002_vm8 = vcmask 130054   ;;  %vm664_vm9 = vcmask 259204   ;;  %vm1115_vm10 = vcmask 255104  }
   0x3   :  { %s6027_s14 = sld [smem:[%s8194_s0 + %s7181_s11]]   ;;  %s7183_s19 = smov 2   ;;  %vm4034_vm11 = vcmask 64512   ;;  %vm5522_vm12 = vcmask 523264  }
   0x4   :  { %s1_s17 = sld [smem:[%s8194_s0]]   ;;  %s7184_s23 = smov 96  }
   0x5   :  { %s6025_s22 = sld [smem:[%s8194_s0 + %s7183_s19]]   ;;  %s7185_s24 = smov 16  }
   0x6   :  { %s7186_s25 = smov 32   ;;  %s7187_s26 = smov 80  }
   0x7   :  { %v138_v1 = vld [vmem:[%s6024_s6 + $0x18] sm:$0xff]  ;;  %v137_v2 = vld [vmem:[%s6024_s6 + $0x10] sm:$0xff]  ;;  %v136_v5 = vld [vmem:[%s6024_s6 + $0x8] sm:$0xff]  ;;  %s7188_s27 = smov 7   ;;  %s7189_s1 = smov 8  }
   0x8   :  { %6407 = vmatprep.subr.mxu0 %v138_v1  ;;  %v7235_v3 = vld [vmem:[%s6026_s10 + $0x8] sm:$0xff]  ;;  %v7237_v4 = vld [vmem:[%s6026_s10] sm:$0xff]  ;;  %s6030_s30 = sld [smem:[%s8194_s0 + %s7188_s27]]   ;;  %s7190_s5 = smov 5  }
   0x9   :  { %6419 = vmatpush3.msra.mxu1 %v7235_v3  ;;  %6408 = vmatpush3.msra.mxu0 %v138_v1  ;;  %v7241_v6 = vld [vmem:[%s6027_s14 + $0x8] sm:$0xff]  ;;  %v135_v7 = vld [vmem:[%s6024_s6] sm:$0xff]  ;;  %s6031_s4 = sld [smem:[%s8194_s0 + %s7189_s1]]   ;;  %s7191_s9 = smov 6  }
   0xa   :  { %6420 = vmatprep.subr.mxu1 %v7177_v0  ;;  %6409 = vmatprep.subr.mxu0 %v137_v2  ;;  %v7246_v8 = vld [vmem:[%s6027_s14] sm:$0xff]  ;;  %v134_v10 = vld [vmem:[%s1_s17 + $0x8] sm:$0xff]  ;;  %s6028_s8 = sld [smem:[%s8194_s0 + %s7190_s5]]   ;;  %s7192_s13 = smov 9  }
   0xb   :  { %6421 = vmatpush3.msra.mxu1 %v7237_v4  ;;  %6410 = vmatpush3.msra.mxu0 %v137_v2  ;;  %v133_v9 = vld [vmem:[%s1_s17] sm:$0xff]  ;;  %s6029_s12 = sld [smem:[%s8194_s0 + %s7191_s9]]   ;;  %s7193_s17 = smov 13  }
   0xc   :  { %6423 = vmatmul.mubr.f32.vlgmr.msra.gmra.mxu1 %v7177_v0  ;;  %6425 = vmatprep.subr.mxu1 %v7177_v0  ;;  %v6056_v17 = vld [vmem:[%s6025_s22] ss:$0 sm:$0xff]  ;;  %s7911_s16 = sld [smem:[%s8194_s0 + %s7192_s13]]   ;;  %s7194_s22 = smov 12  }
   0xd   :  { %6411 = vmatprep.subr.mxu0 %v136_v5  ;;  %6426 = vmatpush3.msra.mxu1 %v7241_v6  ;;  %s7918_s21 = sld [smem:[%s8194_s0 + %s7193_s17]]   ;;  %s7195_s29 = smov 14  }
   0xe   :  { %6412 = vmatpush3.msra.mxu0 %v136_v5  ;;  %6427 = vmatprep.subr.mxu1 %v7177_v0  ;;  %s6035_s28 = sld [smem:[%s8194_s0 + %s7194_s22]]   ;;  %s7196_s3 = smov 19  }
   0xf   :  { %6413 = vmatprep.subr.mxu0 %v135_v7  ;;  %6428 = vmatpush3.msra.mxu1 %v7246_v8  ;;  %s6037_s2 = sld [smem:[%s8194_s0 + %s7195_s29]]   ;;  %s7197_s10 = smov 15  }
  0x10   :  { %6429 = vmatprep.mubr.msk.f32.mxu1 %vm7179_vm0, %v7177_v0  ;;  %6414 = vmatpush3.msra.mxu0 %v135_v7  ;;  %s6042_s6 = sld [smem:[%s8194_s0 + %s7196_s3]]   ;;  %s7199_s19 = smov 20  }
  0x11   :  { %6415 = vmatprep.mubr.msk.f32.mxu0 %vm150_vm1, %v133_v9  ;;  %6430 = vmatmul.mubr.f32.vlgmr.msra.gmra.mxu1 %v7177_v0  ;;  %s6039_s9 = sld [smem:[%s8194_s0 + %s7185_s24]]  }
  0x12   :  { %6416 = vmatmul.mubr.msk.f32.vlgmr.msra.gmra.mxu0 %vm150_vm1, %v134_v10  ;;  %6439 = vmatprep.subr.mxu1 %v7177_v0  ;;  %s6038_s13 = sld [smem:[%s8194_s0 + %s7197_s10]]   ;;  %s7212_s10 = smov 28  }
  0x13   :  { %6440 = vmatpush3.msra.mxu1 %v7241_v6  ;;  %6443 = vmatprep.mubr.msk.f32.mxu1 %vm7179_vm0, %v7177_v0  ;;  %s6055_s15 = sld [smem:[%s8194_s0 + %s7186_s25]]  }
  0x14   :  { %6441 = vmatprep.subr.mxu1 %v7177_v0  ;;  %6432 = vmatprep.subr.mxu0 %v7177_v0  ;;  %s8077_s22 = sld [smem:[%s8194_s0 + %s7199_s19]]  }
  0x15   :  { %6442 = vmatpush3.msra.mxu1 %v7246_v8  ;;  %6433 = vmatpush3.msra.mxu0 %v7235_v3 }
  0x16   :  { %6434 = vmatprep.subr.mxu0 %v7177_v0  ;;  %6436 = vmatprep.mubr.msk.f32.mxu0 %vm7179_vm0, %v7177_v0 }
  0x17   :  { %6435 = vmatpush3.msra.mxu0 %v7237_v4  ;;  %6453 = vmatprep.subr.mxu1 %v7177_v0 }
  0x18   :  { %6446 = vmatprep.subr.mxu0 %v7177_v0 }
  0xcc   :  { %v302_v11 = vpop.f32.mrf.mxu1 }
  0xce   :  { %v6424_v12 = vpop.f32.mrf.mxu1 }
  0xd1   :  { %v403_v13 = vpop.f32.mrf.mxu1 }
  0xd2   :  { %v408_v14 = vrot.slane %v403_v13, 2  ;;  %v6417_v16 = vpop.f32.mrf.mxu0 }
  0xd3   :  { %v6431_v15 = vpop.f32.mrf.mxu1  ;;  %v7274_v18 = vadd.f32 %v6417_v16, %v6056_v17 }
  0xd4   :  { %409 = vrot.lane.b32.xlu0 %v408_v14, %s7182_s18  ;;  %v223_v28 = vpop.f32.mrf.mxu0 }
  0xd5   :  { %v7279_v29 = vadd.f32 %v6056_v17, %v223_v28 }
  0xd7   :  { %v306_v33 = vadd.f32 %v302_v11, %v7279_v29 }
  0xd9   :  { %v6059_v36 = vmul.f32 -1.442695, %v306_v33 }
 0x146   :  { %v410_v19 = vpop.permute.xlu0 %409 }
 0x147   :  { %v412_v20 = vadd.f32 %v410_v19, %v7274_v18 }
 0x149   :  { %6889 = vtanh.f32 %v412_v20  ;;  %v6060_v22 = vmul.f32 -1.442695, %v412_v20 }
 0x14b   :  { %6891 = vpow2.f32 %v6060_v22 }
 0x156   :  { %v6890_v21 = vpop.eup %6889 }
 0x157   :  { %422 = vrot.lane.b32.xlu0 %v6890_v21, %s7184_s23 }
 0x158   :  { %v6892_v23 = vpop.eup %6891 }
 0x159   :  { %v416_v24 = vadd.f32 1.0, %v6892_v23 }
 0x15b   :  { %6893 = vrcp.f32 %v416_v24 }
 0x168   :  { %v6894_v25 = vpop.eup %6893 }
 0x169   :  { %v420_v30 = vmul.f32 0.0, %v6894_v25 }
 0x1c9   :  { %v423_v26 = vpop.permute.xlu0 %422 }
 0x1ca   :  { %v425_v27 = vmul.f32 %v6894_v25, %v423_v26 }
 0x1cc   :  { %427 = vrot.lane.b32.xlu1 %v425_v27, %s7185_s24 }
 0x23e   :  { %v428_v31 = vpop.permute.xlu1 %427 }
 0x23f   :  { %v7281_v32 = vadd.f32 %v428_v31, %v420_v30 }
 0x241   :  { %6895 = vtanh.f32 %v7281_v32  ;;  %v641_v7 = vrot.slane %v7281_v32, 2 }
 0x242   :  { %6897 = vtanh.f32 %v306_v33 }
 0x243   :  { %6899 = vpow2.f32 %v6059_v36 }
 0x24e   :  { %v6896_v34 = vpop.eup %6895 }
 0x24f   :  { %433 = vrot.lane.b32.xlu1 %v6896_v34, %s7186_s25  ;;  %v6898_v35 = vpop.eup %6897 }
 0x250   :  { %v6900_v37 = vpop.eup %6899 }
 0x251   :  { %v310_v38 = vadd.f32 1.0, %v6900_v37 }
 0x253   :  { %316 = vrot.lane.b32.xlu1 %v6898_v35, %s7184_s23  ;;  %6901 = vrcp.f32 %v310_v38 }
 0x260   :  { %v6902_v42 = vpop.eup %6901 }
 0x261   :  { %v314_v46 = vmul.f32 0.0, %v6902_v42 }
 0x2c1   :  { %v434_v39 = vpop.permute.xlu1 %433 }
 0x2c2   :  { %v7287_v40 = vmul.f32 %v6894_v25, %v434_v39 }
 0x2c4   :  { %v552_v41 = vrot.slane %v7287_v40, 6 }
 0x2c5   :  { %v317_v43 = vpop.permute.xlu1 %316 }
 0x2c6   :  { %v319_v44 = vmul.f32 %v6902_v42, %v317_v43  ;;  %553 = vrot.lane.b32.xlu0 %v552_v41, %s7185_s24 }
 0x2c8   :  { %321 = vrot.lane.b32.xlu1 %v319_v44, %s7185_s24 }
 0x338   :  { %v554_v45 = vpop.permute.xlu0 %553 }
 0x339   :  { %6444 = vmatmul.mubr.msk.f32.vlgmr.msra.gmra.mxu1 %vm232_vm2, %v554_v45 }
 0x33a   :  { %v322_v47 = vpop.permute.xlu1 %321  ;;  %6454 = vmatpush3.msra.mxu1 %v7241_v6  ;;  %6457 = vmatprep.mubr.msk.f32.mxu1 %vm7179_vm0, %v7177_v0 }
 0x33b   :  { %v7296_v48 = vadd.f32 %v322_v47, %v314_v46  ;;  %6455 = vmatprep.subr.mxu1 %v7177_v0 }
 0x33c   :  { %6456 = vmatpush3.msra.mxu1 %v7246_v8 }
 0x33d   :  { %6903 = vtanh.f32 %v7296_v48  ;;  %6467 = vmatprep.subr.mxu1 %v7177_v0  ;;  %v527_v27 = vrot.slane %v7296_v48, 6 }
 0x34a   :  { %v6904_v49 = vpop.eup %6903 }
 0x34b   :  { %327 = vrot.lane.b32.xlu1 %v6904_v49, %s7186_s25 }
 0x3bd   :  { %v328_v50 = vpop.permute.xlu1 %327 }
 0x3be   :  { %v330_v51 = vmul.f32 %v6902_v42, %v328_v50 }
 0x3c0   :  { %332 = vrot.lane.b32.xlu1 %v330_v51, %s7187_s26 }
 0x3f9   :  { %v623_v52 = vpop.f32.mrf.mxu1 }
 0x3fa   :  { %v628_v53 = vrot.slane %v623_v52, 4 }
 0x3fb   :  { %v6445_v54 = vpop.f32.mrf.mxu1 }
 0x3fc   :  { %629 = vrot.lane.b32.xlu0 %v628_v53, %s7182_s18 }
 0x432   :  { %v333_v55 = vpop.permute.xlu1 %332 }
 0x433   :  { %336 = vst.msk [vmem:[#allocation2] sm:$0x3] %vm335_vm3, %v333_v55  ;;  %6437 = vmatmul.mubr.msk.f32.vlgmr.msra.gmra.mxu0 %vm232_vm2, %v333_v55 }
 0x434   :  { %6447 = vmatpush3.msra.mxu0 %v7235_v3  ;;  %6450 = vmatprep.mubr.msk.f32.mxu0 %vm7179_vm0, %v7177_v0 }
 0x435   :  { %6448 = vmatprep.subr.mxu0 %v7177_v0 }
 0x436   :  { %6449 = vmatpush3.msra.mxu0 %v7237_v4 }
 0x437   :  { %6460 = vmatprep.subr.mxu0 %v7177_v0 }
 0x46e   :  { %v630_v56 = vpop.permute.xlu0 %629 }
 0x46f   :  { %v632_v57 = vadd.f32 %v630_v56, %v7274_v18 }
 0x471   :  { %6905 = vtanh.f32 %v632_v57  ;;  %v6064_v59 = vmul.f32 -1.442695, %v632_v57 }
 0x473   :  { %6907 = vpow2.f32 %v6064_v59 }
 0x47e   :  { %v6906_v58 = vpop.eup %6905 }
 0x47f   :  { %645 = vrot.lane.b32.xlu0 %v6906_v58, %s7184_s23 }
 0x480   :  { %v6908_v60 = vpop.eup %6907 }
 0x481   :  { %v636_v61 = vadd.f32 1.0, %v6908_v60 }
 0x483   :  { %6909 = vrcp.f32 %v636_v61 }
 0x490   :  { %v6910_v62 = vpop.eup %6909 }
 0x491   :  { %v643_v10 = vmul.f32 %v6910_v62, %v641_v7 }
 0x4f1   :  { %v646_v63 = vpop.permute.xlu0 %645 }
 0x4f2   :  { %v648_v1 = vmul.f32 %v6910_v62, %v646_v63 }
 0x4f3   :  { %v511_v2 = vpop.f32.mrf.mxu0 }
 0x4f4   :  { %650 = vrot.lane.b32.xlu0 %v648_v1, %s7185_s24  ;;  %v516_v9 = vrot.slane %v511_v2, 6 }
 0x4f5   :  { %v6438_v5 = vpop.f32.mrf.mxu0 }
 0x4f6   :  { %v518_v13 = vadd.f32 %v516_v9, %v7279_v29 }
 0x4f8   :  { %v6062_v16 = vmul.f32 -1.442695, %v518_v13 }
 0x566   :  { %v651_v11 = vpop.permute.xlu0 %650 }
 0x567   :  { %v7317_v12 = vadd.f32 %v651_v11, %v643_v10 }
 0x569   :  { %6911 = vtanh.f32 %v7317_v12  ;;  %v867_v52 = vrot.slane %v7317_v12, 2 }
 0x56a   :  { %6913 = vtanh.f32 %v518_v13 }
 0x56b   :  { %6915 = vpow2.f32 %v6062_v16 }
 0x576   :  { %v6912_v14 = vpop.eup %6911 }
 0x577   :  { %656 = vrot.lane.b32.xlu0 %v6912_v14, %s7186_s25  ;;  %v6914_v15 = vpop.eup %6913 }
 0x578   :  { %v6916_v17 = vpop.eup %6915 }
 0x579   :  { %v522_v19 = vadd.f32 1.0, %v6916_v17 }
 0x57b   :  { %531 = vrot.lane.b32.xlu0 %v6914_v15, %s7184_s23  ;;  %6917 = vrcp.f32 %v522_v19 }
 0x588   :  { %v6918_v24 = vpop.eup %6917 }
 0x589   :  { %v529_v28 = vmul.f32 %v6918_v24, %v527_v27 }
 0x5e9   :  { %v657_v20 = vpop.permute.xlu0 %656 }
 0x5ea   :  { %v7323_v21 = vmul.f32 %v6910_v62, %v657_v20 }
 0x5ec   :  { %v778_v22 = vrot.slane %v7323_v21, 4 }
 0x5ed   :  { %v532_v23 = vpop.permute.xlu0 %531 }
 0x5ee   :  { %779 = vrot.lane.b32.xlu1 %v778_v22, %s7185_s24  ;;  %v534_v25 = vmul.f32 %v6918_v24, %v532_v23 }
 0x5f2   :  { %536 = vrot.lane.b32.xlu1 %v534_v25, %s7185_s24 }
 0x660   :  { %v780_v26 = vpop.permute.xlu1 %779 }
 0x661   :  { %6458 = vmatmul.mubr.msk.f32.vlgmr.msra.gmra.mxu1 %vm232_vm2, %v780_v26 }
 0x662   :  { %6468 = vmatpush3.msra.mxu1 %v7241_v6  ;;  %6471 = vmatprep.mubr.msk.f32.mxu1 %vm7179_vm0, %v7177_v0 }
 0x663   :  { %6469 = vmatprep.subr.mxu1 %v7177_v0 }
 0x664   :  { %v537_v30 = vpop.permute.xlu1 %536  ;;  %6470 = vmatpush3.msra.mxu1 %v7246_v8 }
 0x665   :  { %v7335_v31 = vadd.f32 %v537_v30, %v529_v28  ;;  %6481 = vmatprep.subr.mxu1 %v7177_v0 }
 0x667   :  { %6919 = vtanh.f32 %v7335_v31  ;;  %v753_v11 = vrot.slane %v7335_v31, 6 }
 0x674   :  { %v6920_v32 = vpop.eup %6919 }
 0x675   :  { %542 = vrot.lane.b32.xlu1 %v6920_v32, %s7186_s25 }
 0x6e7   :  { %v543_v33 = vpop.permute.xlu1 %542 }
 0x6e8   :  { %v7340_v34 = vmul.f32 %v6918_v24, %v543_v33 }
 0x6ea   :  { %v666_v35 = vrot.slane %v7340_v34, 2 }
 0x6ec   :  { %667 = vrot.lane.b32.xlu1 %v666_v35, %s7187_s26 }
 0x721   :  { %v849_v36 = vpop.f32.mrf.mxu1 }
 0x722   :  { %v854_v37 = vrot.slane %v849_v36, 6 }
 0x723   :  { %v6459_v38 = vpop.f32.mrf.mxu1 }
 0x724   :  { %855 = vrot.lane.b32.xlu0 %v854_v37, %s7182_s18 }
 0x75e   :  { %v668_v39 = vpop.permute.xlu1 %667 }
 0x75f   :  { %6451 = vmatmul.mubr.msk.f32.vlgmr.msra.gmra.mxu0 %vm232_vm2, %v668_v39 }
 0x760   :  { %6461 = vmatpush3.msra.mxu0 %v7235_v3  ;;  %6464 = vmatprep.mubr.msk.f32.mxu0 %vm7179_vm0, %v7177_v0 }
 0x761   :  { %6462 = vmatprep.subr.mxu0 %v7177_v0 }
 0x762   :  { %6463 = vmatpush3.msra.mxu0 %v7237_v4 }
 0x763   :  { %6474 = vmatprep.subr.mxu0 %v7177_v0 }
 0x796   :  { %v856_v41 = vpop.permute.xlu0 %855 }
 0x797   :  { %v858_v42 = vadd.f32 %v856_v41, %v7274_v18 }
 0x799   :  { %6921 = vtanh.f32 %v858_v42  ;;  %v6068_v44 = vmul.f32 -1.442695, %v858_v42 }
 0x79b   :  { %6923 = vpow2.f32 %v6068_v44 }
 0x7a6   :  { %v6922_v43 = vpop.eup %6921 }
 0x7a7   :  { %871 = vrot.lane.b32.xlu0 %v6922_v43, %s7184_s23 }
 0x7a8   :  { %v6924_v45 = vpop.eup %6923 }
 0x7a9   :  { %v862_v46 = vadd.f32 1.0, %v6924_v45 }
 0x7ab   :  { %6925 = vrcp.f32 %v862_v46 }
 0x7b8   :  { %v6926_v47 = vpop.eup %6925 }
 0x7b9   :  { %v869_v54 = vmul.f32 %v6926_v47, %v867_v52 }
 0x819   :  { %v872_v48 = vpop.permute.xlu0 %871 }
 0x81a   :  { %v874_v49 = vmul.f32 %v6926_v47, %v872_v48 }
 0x81c   :  { %876 = vrot.lane.b32.xlu0 %v874_v49, %s7185_s24 }
 0x81f   :  { %v737_v50 = vpop.f32.mrf.mxu0 }
 0x820   :  { %v742_v53 = vrot.slane %v737_v50, 4 }
 0x821   :  { %v6452_v51 = vpop.f32.mrf.mxu0 }
 0x822   :  { %v744_v57 = vadd.f32 %v742_v53, %v7279_v29 }
 0x824   :  { %v6066_v60 = vmul.f32 -1.442695, %v744_v57 }
 0x88e   :  { %v877_v55 = vpop.permute.xlu0 %876 }
 0x88f   :  { %v7356_v56 = vadd.f32 %v877_v55, %v869_v54 }
 0x891   :  { %6927 = vtanh.f32 %v7356_v56  ;;  %v1092_v37 = vrot.slane %v7356_v56, 2 }
 0x892   :  { %6929 = vtanh.f32 %v744_v57 }
 0x893   :  { %6931 = vpow2.f32 %v6066_v60 }
 0x89e   :  { %v6928_v58 = vpop.eup %6927 }
 0x89f   :  { %882 = vrot.lane.b32.xlu1 %v6928_v58, %s7186_s25  ;;  %v6930_v59 = vpop.eup %6929 }
 0x8a0   :  { %v6932_v61 = vpop.eup %6931 }
 0x8a1   :  { %v748_v62 = vadd.f32 1.0, %v6932_v61 }
 0x8a3   :  { %757 = vrot.lane.b32.xlu1 %v6930_v59, %s7184_s23  ;;  %6933 = vrcp.f32 %v748_v62 }
 0x8b0   :  { %v6934_v7 = vpop.eup %6933 }
 0x8b1   :  { %v755_v12 = vmul.f32 %v6934_v7, %v753_v11 }
 0x911   :  { %v883_v63 = vpop.permute.xlu1 %882 }
 0x912   :  { %v7362_v1 = vmul.f32 %v6926_v47, %v883_v63 }
 0x914   :  { %v1004_v2 = vrot.slane %v7362_v1, 2 }
 0x915   :  { %v758_v5 = vpop.permute.xlu1 %757 }
 0x916   :  { %1005 = vrot.lane.b32.xlu0 %v1004_v2, %s7185_s24  ;;  %v760_v9 = vmul.f32 %v6934_v7, %v758_v5 }
 0x91a   :  { %762 = vrot.lane.b32.xlu0 %v760_v9, %s7185_s24 }
 0x988   :  { %v1006_v10 = vpop.permute.xlu0 %1005 }
 0x989   :  { %6472 = vmatmul.mubr.msk.f32.vlgmr.msra.gmra.mxu1 %vm232_vm2, %v1006_v10 }
 0x98a   :  { %6482 = vmatpush3.msra.mxu1 %v7241_v6  ;;  %6485 = vmatprep.mubr.msk.f32.mxu1 %vm7179_vm0, %v7177_v0 }
 0x98b   :  { %6483 = vmatprep.subr.mxu1 %v7177_v0 }
 0x98c   :  { %v763_v13 = vpop.permute.xlu0 %762  ;;  %6484 = vmatpush3.msra.mxu1 %v7246_v8 }
 0x98d   :  { %v7374_v14 = vadd.f32 %v763_v13, %v755_v12  ;;  %6495 = vmatprep.subr.mxu1 %v7177_v0 }
 0x98f   :  { %6935 = vtanh.f32 %v7374_v14  ;;  %v979_v55 = vrot.slane %v7374_v14, 6 }
 0x99c   :  { %v6936_v15 = vpop.eup %6935 }
 0x99d   :  { %768 = vrot.lane.b32.xlu1 %v6936_v15, %s7186_s25 }
 0xa0f   :  { %v769_v16 = vpop.permute.xlu1 %768 }
 0xa10   :  { %v7379_v17 = vmul.f32 %v6934_v7, %v769_v16 }
 0xa12   :  { %v892_v19 = vrot.slane %v7379_v17, 4 }
 0xa14   :  { %893 = vrot.lane.b32.xlu1 %v892_v19, %s7187_s26 }
 0xa49   :  { %v1075_v20 = vpop.f32.mrf.mxu1 }
 0xa4a   :  { %1080 = vrot.lane.b32.xlu0 %v1075_v20, %s7182_s18 }
 0xa4b   :  { %v6473_v22 = vpop.f32.mrf.mxu1 }
 0xa86   :  { %v894_v23 = vpop.permute.xlu1 %893 }
 0xa87   :  { %6465 = vmatmul.mubr.msk.f32.vlgmr.msra.gmra.mxu0 %vm232_vm2, %v894_v23 }
 0xa88   :  { %6475 = vmatpush3.msra.mxu0 %v7235_v3  ;;  %6478 = vmatprep.mubr.msk.f32.mxu0 %vm7179_vm0, %v7177_v0 }
 0xa89   :  { %6476 = vmatprep.subr.mxu0 %v7177_v0 }
 0xa8a   :  { %6477 = vmatpush3.msra.mxu0 %v7237_v4 }
 0xa8b   :  { %6488 = vmatprep.subr.mxu0 %v7177_v0 }
 0xabc   :  { %v1081_v24 = vpop.permute.xlu0 %1080 }
 0xabd   :  { %v1083_v25 = vadd.f32 %v1081_v24, %v7274_v18 }
 0xabf   :  { %6937 = vtanh.f32 %v1083_v25  ;;  %v6072_v27 = vmul.f32 -1.442695, %v1083_v25 }
 0xac1   :  { %6939 = vpow2.f32 %v6072_v27 }
 0xacc   :  { %v6938_v26 = vpop.eup %6937 }
 0xacd   :  { %1096 = vrot.lane.b32.xlu0 %v6938_v26, %s7184_s23 }
 0xace   :  { %v6940_v28 = vpop.eup %6939 }
 0xacf   :  { %v1087_v30 = vadd.f32 1.0, %v6940_v28 }
 0xad1   :  { %6941 = vrcp.f32 %v1087_v30 }
 0xade   :  { %v6942_v31 = vpop.eup %6941 }
 0xadf   :  { %v1094_v39 = vmul.f32 %v6942_v31, %v1092_v37 }
 0xb3f   :  { %v1097_v32 = vpop.permute.xlu0 %1096 }
 0xb40   :  { %v1099_v33 = vmul.f32 %v6942_v31, %v1097_v32 }
 0xb42   :  { %1101 = vrot.lane.b32.xlu1 %v1099_v33, %s7185_s24 }
 0xb47   :  { %v963_v35 = vpop.f32.mrf.mxu0 }
 0xb48   :  { %v968_v38 = vrot.slane %v963_v35, 2 }
 0xb49   :  { %v6466_v36 = vpop.f32.mrf.mxu0 }
 0xb4a   :  { %v970_v43 = vadd.f32 %v968_v38, %v7279_v29 }
 0xb4c   :  { %v6070_v46 = vmul.f32 -1.442695, %v970_v43 }
 0xbb4   :  { %v1102_v41 = vpop.permute.xlu1 %1101 }
 0xbb5   :  { %v7395_v42 = vadd.f32 %v1102_v41, %v1094_v39 }
 0xbb7   :  { %6943 = vtanh.f32 %v7395_v42  ;;  %v1313_v26 = vrot.slane %v7395_v42, 2 }
 0xbb8   :  { %6945 = vtanh.f32 %v970_v43 }
 0xbb9   :  { %6947 = vpow2.f32 %v6070_v46 }
 0xbc4   :  { %v6944_v44 = vpop.eup %6943 }
 0xbc5   :  { %1107 = vrot.lane.b32.xlu0 %v6944_v44, %s7186_s25  ;;  %v6946_v45 = vpop.eup %6945 }
 0xbc6   :  { %v6948_v47 = vpop.eup %6947 }
 0xbc7   :  { %v974_v48 = vadd.f32 1.0, %v6948_v47 }
 0xbc9   :  { %983 = vrot.lane.b32.xlu0 %v6946_v45, %s7184_s23  ;;  %6949 = vrcp.f32 %v974_v48 }
 0xbd6   :  { %v6950_v51 = vpop.eup %6949 }
 0xbd7   :  { %v981_v56 = vmul.f32 %v6950_v51, %v979_v55 }
 0xc37   :  { %v1108_v49 = vpop.permute.xlu0 %1107 }
 0xc38   :  { %v7401_v50 = vmul.f32 %v6942_v31, %v1108_v49 }
 0xc3a   :  { %1225 = vrot.lane.b32.xlu1 %v7401_v50, %s7185_s24 }
 0xc3b   :  { %v984_v52 = vpop.permute.xlu0 %983 }
 0xc3c   :  { %v986_v53 = vmul.f32 %v6950_v51, %v984_v52 }
 0xc3e   :  { %988 = vrot.lane.b32.xlu1 %v986_v53, %s7185_s24 }
 0xcac   :  { %v1226_v54 = vpop.permute.xlu1 %1225 }
 0xcad   :  { %6486 = vmatmul.mubr.msk.f32.vlgmr.msra.gmra.mxu1 %vm232_vm2, %v1226_v54 }
 0xcae   :  { %6496 = vmatpush3.msra.mxu1 %v7241_v6  ;;  %6499 = vmatprep.mubr.msk.f32.mxu1 %vm7179_vm0, %v7177_v0 }
 0xcaf   :  { %6497 = vmatprep.subr.mxu1 %v7177_v0 }
 0xcb0   :  { %v989_v57 = vpop.permute.xlu1 %988  ;;  %6498 = vmatpush3.msra.mxu1 %v7246_v8 }
 0xcb1   :  { %v991_v58 = vadd.f32 %v989_v57, %v981_v56  ;;  %6509 = vmatprep.subr.mxu1 %v7177_v0 }
 0xcb3   :  { %6951 = vtanh.f32 %v991_v58  ;;  %v1201_v41 = vrot.slane %v991_v58, 6 }
 0xcc0   :  { %v6952_v59 = vpop.eup %6951 }
 0xcc1   :  { %994 = vrot.lane.b32.xlu0 %v6952_v59, %s7186_s25 }
 0xd33   :  { %v995_v60 = vpop.permute.xlu0 %994 }
 0xd34   :  { %v7415_v61 = vmul.f32 %v6950_v51, %v995_v60 }
 0xd36   :  { %v1117_v62 = vrot.slane %v7415_v61, 6 }
 0xd38   :  { %1118 = vrot.lane.b32.xlu1 %v1117_v62, %s7187_s26 }
 0xd6d   :  { %v1295_v63 = vpop.f32.mrf.mxu1 }
 0xd6e   :  { %v1300_v2 = vrot.slane %v1295_v63, 2 }
 0xd6f   :  { %v6487_v5 = vpop.f32.mrf.mxu1 }
 0xd70   :  { %1301 = vrot.lane.b32.xlu0 %v1300_v2, %s7182_s18 }
 0xdaa   :  { %v1119_v7 = vpop.permute.xlu1 %1118 }
 0xdab   :  { %6479 = vmatmul.mubr.msk.f32.vlgmr.msra.gmra.mxu0 %vm232_vm2, %v1119_v7 }
 0xdac   :  { %6489 = vmatpush3.msra.mxu0 %v7235_v3  ;;  %6492 = vmatprep.mubr.msk.f32.mxu0 %vm7179_vm0, %v7177_v0 }
 0xdad   :  { %6490 = vmatprep.subr.mxu0 %v7177_v0 }
 0xdae   :  { %6491 = vmatpush3.msra.mxu0 %v7237_v4 }
 0xdaf   :  { %6502 = vmatprep.subr.mxu0 %v7177_v0 }
 0xde2   :  { %v1302_v9 = vpop.permute.xlu0 %1301 }
 0xde3   :  { %v1304_v10 = vadd.f32 %v1302_v9, %v7279_v29 }
 0xde5   :  { %6953 = vtanh.f32 %v1304_v10  ;;  %v6076_v12 = vmul.f32 -1.442695, %v1304_v10 }
 0xde7   :  { %6955 = vpow2.f32 %v6076_v12 }
 0xdf2   :  { %v6954_v11 = vpop.eup %6953 }
 0xdf3   :  { %1317 = vrot.lane.b32.xlu1 %v6954_v11, %s7184_s23 }
 0xdf4   :  { %v6956_v13 = vpop.eup %6955 }
 0xdf5   :  { %v1308_v14 = vadd.f32 1.0, %v6956_v13 }
 0xdf7   :  { %6957 = vrcp.f32 %v1308_v14 }
 0xe04   :  { %v6958_v15 = vpop.eup %6957 }
 0xe05   :  { %v1315_v27 = vmul.f32 %v6958_v15, %v1313_v26 }
 0xe65   :  { %v1318_v16 = vpop.permute.xlu1 %1317 }
 0xe66   :  { %v1320_v19 = vmul.f32 %v6958_v15, %v1318_v16 }
 0xe68   :  { %1322 = vrot.lane.b32.xlu0 %v1320_v19, %s7185_s24 }
 0xe6b   :  { %v1188_v20 = vpop.f32.mrf.mxu0 }
 0xe6c   :  { %v1192_v22 = vadd.f32 %v1188_v20, %v7274_v18 }
 0xe6d   :  { %v6480_v23 = vpop.f32.mrf.mxu0 }
 0xe6e   :  { %6959 = vtanh.f32 %v1192_v22  ;;  %v6074_v25 = vmul.f32 -1.442695, %v1192_v22 }
 0xe70   :  { %6961 = vpow2.f32 %v6074_v25 }
 0xe7b   :  { %v6960_v24 = vpop.eup %6959 }
 0xe7c   :  { %1205 = vrot.lane.b32.xlu0 %v6960_v24, %s7184_s23 }
 0xe7d   :  { %v6962_v28 = vpop.eup %6961 }
 0xe7e   :  { %v1196_v32 = vadd.f32 1.0, %v6962_v28 }
 0xeda   :  { %v1323_v30 = vpop.permute.xlu0 %1322 }
 0xedb   :  { %v7433_v31 = vadd.f32 %v1323_v30, %v1315_v27 }
 0xedd   :  { %6963 = vtanh.f32 %v7433_v31  ;;  %v1534_v20 = vrot.slane %v7433_v31, 2 }
 0xede   :  { %6965 = vrcp.f32 %v1196_v32 }
 0xeea   :  { %v6964_v33 = vpop.eup %6963 }
 0xeeb   :  { %1328 = vrot.lane.b32.xlu1 %v6964_v33, %s7186_s25  ;;  %v6966_v35 = vpop.eup %6965 }
 0xeec   :  { %v1203_v43 = vmul.f32 %v6966_v35, %v1201_v41 }
 0xeee   :  { %v1206_v36 = vpop.permute.xlu0 %1205 }
 0xeef   :  { %v1208_v37 = vmul.f32 %v6966_v35, %v1206_v36 }
 0xef1   :  { %1210 = vrot.lane.b32.xlu0 %v1208_v37, %s7185_s24 }
 0xf5d   :  { %v1329_v38 = vpop.permute.xlu1 %1328 }
 0xf5e   :  { %v7438_v39 = vmul.f32 %v6958_v15, %v1329_v38 }
 0xf60   :  { %v1445_v42 = vrot.slane %v7438_v39, 6 }
 0xf62   :  { %1446 = vrot.lane.b32.xlu1 %v1445_v42, %s7185_s24 }
 0xf63   :  { %v1211_v44 = vpop.permute.xlu0 %1210 }
 0xf64   :  { %v7442_v45 = vadd.f32 %v1211_v44, %v1203_v43 }
 0xf66   :  { %6967 = vtanh.f32 %v7442_v45  ;;  %v1421_v26 = vrot.slane %v7442_v45, 6 }
 0xf73   :  { %v6968_v46 = vpop.eup %6967 }
 0xf74   :  { %1216 = vrot.lane.b32.xlu1 %v6968_v46, %s7186_s25 }
 0xfd4   :  { %v1447_v47 = vpop.permute.xlu1 %1446 }
 0xfd5   :  { %6500 = vmatmul.mubr.msk.f32.vlgmr.msra.gmra.mxu1 %vm232_vm2, %v1447_v47 }
 0xfd6   :  { %6510 = vmatpush3.msra.mxu1 %v7241_v6  ;;  %6513 = vmatprep.mubr.msk.f32.mxu1 %vm7179_vm0, %v7177_v0 }
 0xfd7   :  { %6511 = vmatprep.subr.mxu1 %v7177_v0 }
 0xfd8   :  { %6512 = vmatpush3.msra.mxu1 %v7246_v8 }
 0xfd9   :  { %6523 = vmatprep.subr.mxu1 %v7177_v0 }
 0xfe6   :  { %v1217_v48 = vpop.permute.xlu1 %1216 }
 0xfe7   :  { %v1219_v49 = vmul.f32 %v6966_v35, %v1217_v48 }
 0xfe9   :  { %1221 = vrot.lane.b32.xlu0 %v1219_v49, %s7187_s26 }
0x105b   :  { %v7454_v51 = vpop.permute.xlu0 %1221 }
0x105c   :  { %6493 = vmatmul.mubr.msk.f32.vlgmr.msra.gmra.mxu0 %vm232_vm2, %v7454_v51 }
0x105d   :  { %6503 = vmatpush3.msra.mxu0 %v7235_v3  ;;  %6506 = vmatprep.mubr.msk.f32.mxu0 %vm7179_vm0, %v7177_v0 }
0x105e   :  { %6504 = vmatprep.subr.mxu0 %v7177_v0 }
0x105f   :  { %6505 = vmatpush3.msra.mxu0 %v7237_v4 }
0x1060   :  { %6516 = vmatprep.subr.mxu0 %v7177_v0 }
0x1095   :  { %v1516_v52 = vpop.f32.mrf.mxu1 }
0x1096   :  { %v1521_v53 = vrot.slane %v1516_v52, 4 }
0x1097   :  { %v6501_v54 = vpop.f32.mrf.mxu1 }
0x1098   :  { %1522 = vrot.lane.b32.xlu1 %v1521_v53, %s7182_s18 }
0x110a   :  { %v1523_v55 = vpop.permute.xlu1 %1522 }
0x110b   :  { %v1525_v56 = vadd.f32 %v1523_v55, %v7279_v29 }
0x110d   :  { %6969 = vtanh.f32 %v1525_v56  ;;  %v6080_v2 = vmul.f32 -1.442695, %v1525_v56 }
0x111a   :  { %v6970_v57 = vpop.eup %6969 }
0x111b   :  { %1538 = vrot.lane.b32.xlu0 %v6970_v57, %s7184_s23 }
0x111c   :  { %v1405_v58 = vpop.f32.mrf.mxu0 }
0x111d   :  { %v1410_v59 = vrot.slane %v1405_v58, 6 }
0x111e   :  { %v6494_v60 = vpop.f32.mrf.mxu0 }
0x111f   :  { %v1412_v62 = vadd.f32 %v1410_v59, %v7274_v18 }
0x1121   :  { %6971 = vtanh.f32 %v1412_v62  ;;  %v6078_v9 = vmul.f32 -1.442695, %v1412_v62 }
0x1122   :  { %6973 = vpow2.f32 %v6080_v2 }
0x112e   :  { %v6972_v63 = vpop.eup %6971 }
0x112f   :  { %1425 = vrot.lane.b32.xlu0 %v6972_v63, %s7184_s23  ;;  %v6974_v5 = vpop.eup %6973 }
0x1130   :  { %v1529_v7 = vadd.f32 1.0, %v6974_v5 }
0x1132   :  { %6975 = vrcp.f32 %v1529_v7 }
0x1133   :  { %6977 = vpow2.f32 %v6078_v9 }
0x113f   :  { %v6976_v10 = vpop.eup %6975 }
0x1140   :  { %v6978_v11 = vpop.eup %6977  ;;  %v1536_v22 = vmul.f32 %v6976_v10, %v1534_v20 }
0x1141   :  { %v1416_v14 = vadd.f32 1.0, %v6978_v11 }
0x1143   :  { %6979 = vrcp.f32 %v1416_v14 }
0x1150   :  { %v6980_v15 = vpop.eup %6979 }
0x1151   :  { %v1423_v27 = vmul.f32 %v6980_v15, %v1421_v26 }
0x118d   :  { %v1539_v12 = vpop.permute.xlu0 %1538 }
0x118e   :  { %v1541_v13 = vmul.f32 %v6976_v10, %v1539_v12 }
0x1190   :  { %1543 = vrot.lane.b32.xlu1 %v1541_v13, %s7185_s24 }
0x11a1   :  { %v1426_v16 = vpop.permute.xlu0 %1425 }
0x11a2   :  { %v1428_v19 = vmul.f32 %v6980_v15, %v1426_v16 }
0x11a4   :  { %1430 = vrot.lane.b32.xlu0 %v1428_v19, %s7185_s24 }
0x1202   :  { %v1544_v23 = vpop.permute.xlu1 %1543 }
0x1203   :  { %v7472_v24 = vadd.f32 %v1544_v23, %v1536_v22 }
0x1205   :  { %6981 = vtanh.f32 %v7472_v24  ;;  %v1758_v12 = vrot.slane %v7472_v24, 2 }
0x1212   :  { %v6982_v25 = vpop.eup %6981 }
0x1213   :  { %1549 = vrot.lane.b32.xlu1 %v6982_v25, %s7186_s25 }
0x1216   :  { %v1431_v28 = vpop.permute.xlu0 %1430 }
0x1217   :  { %v1433_v30 = vadd.f32 %v1431_v28, %v1423_v27 }
0x1219   :  { %6983 = vtanh.f32 %v1433_v30  ;;  %v1645_v5 = vrot.slane %v1433_v30, 6 }
0x1226   :  { %v6984_v32 = vpop.eup %6983 }
0x1227   :  { %1436 = vrot.lane.b32.xlu0 %v6984_v32, %s7186_s25 }
0x1285   :  { %v1550_v33 = vpop.permute.xlu1 %1549 }
0x1286   :  { %v7478_v31 = vmul.f32 %v6976_v10, %v1550_v33 }
0x1288   :  { %v1669_v35 = vrot.slane %v7478_v31, 4 }
0x128a   :  { %1670 = vrot.lane.b32.xlu1 %v1669_v35, %s7185_s24 }
0x1299   :  { %v1437_v36 = vpop.permute.xlu0 %1436 }
0x129a   :  { %v7482_v37 = vmul.f32 %v6980_v15, %v1437_v36 }
0x129c   :  { %v1558_v38 = vrot.slane %v7482_v37, 2 }
0x129e   :  { %1559 = vrot.lane.b32.xlu1 %v1558_v38, %s7187_s26 }
0x12fc   :  { %v1671_v41 = vpop.permute.xlu1 %1670 }
0x12fd   :  { %6514 = vmatmul.mubr.msk.f32.vlgmr.msra.gmra.mxu1 %vm232_vm2, %v1671_v41 }
0x12fe   :  { %6524 = vmatpush3.msra.mxu1 %v7241_v6  ;;  %6527 = vmatprep.mubr.msk.f32.mxu1 %vm7179_vm0, %v7177_v0 }
0x12ff   :  { %6525 = vmatprep.subr.mxu1 %v7177_v0 }
0x1300   :  { %6526 = vmatpush3.msra.mxu1 %v7246_v8 }
0x1301   :  { %6541 = vmatprep.subr.mxu1 %v7177_v0 }
0x1310   :  { %v1560_v42 = vpop.permute.xlu1 %1559 }
0x1311   :  { %6507 = vmatmul.mubr.msk.f32.vlgmr.msra.gmra.mxu0 %vm232_vm2, %v1560_v42 }
0x1312   :  { %6517 = vmatpush3.msra.mxu0 %v7235_v3  ;;  %6520 = vmatprep.mubr.msk.f32.mxu0 %vm7179_vm0, %v7177_v0 }
0x1313   :  { %6518 = vmatprep.subr.mxu0 %v7177_v0 }
0x1314   :  { %6519 = vmatpush3.msra.mxu0 %v7237_v4 }
0x13bd   :  { %v1740_v6 = vpop.f32.mrf.mxu1 }
0x13be   :  { %v1745_v43 = vrot.slane %v1740_v6, 6 }
0x13bf   :  { %v6515_v44 = vpop.f32.mrf.mxu1 }
0x13c0   :  { %1746 = vrot.lane.b32.xlu0 %v1745_v43, %s7182_s18 }
0x13d1   :  { %v1629_v8 = vpop.f32.mrf.mxu0 }
0x13d2   :  { %v1634_v45 = vrot.slane %v1629_v8, 4 }
0x13d3   :  { %v6508_v46 = vpop.f32.mrf.mxu0 }
0x13d4   :  { %v1636_v47 = vadd.f32 %v1634_v45, %v7274_v18 }
0x13d6   :  { %6985 = vtanh.f32 %v1636_v47  ;;  %v6082_v3 = vmul.f32 -1.442695, %v1636_v47 }
0x13d8   :  { %6987 = vpow2.f32 %v6082_v3 }
0x13e3   :  { %v6986_v48 = vpop.eup %6985 }
0x13e4   :  { %1649 = vrot.lane.b32.xlu0 %v6986_v48, %s7184_s23 }
0x13e5   :  { %v6988_v4 = vpop.eup %6987 }
0x13e6   :  { %v1640_v54 = vadd.f32 1.0, %v6988_v4 }
0x1432   :  { %v1747_v49 = vpop.permute.xlu0 %1746 }
0x1433   :  { %v1749_v52 = vadd.f32 %v1747_v49, %v7279_v29 }
0x1435   :  { %6989 = vtanh.f32 %v1749_v52  ;;  %v6084_v58 = vmul.f32 -1.442695, %v1749_v52 }
0x1436   :  { %6991 = vrcp.f32 %v1640_v54 }
0x1437   :  { %6993 = vpow2.f32 %v6084_v58 }
0x1442   :  { %v6990_v53 = vpop.eup %6989 }
0x1443   :  { %1762 = vrot.lane.b32.xlu1 %v6990_v53, %s7184_s23  ;;  %v6992_v55 = vpop.eup %6991 }
0x1444   :  { %v6994_v59 = vpop.eup %6993  ;;  %v1647_v7 = vmul.f32 %v6992_v55, %v1645_v5 }
0x1445   :  { %v1753_v60 = vadd.f32 1.0, %v6994_v59 }
0x1447   :  { %6995 = vrcp.f32 %v1753_v60  ;;  %v7557_v60 = vld [vmem:[%s6030_s30] sm:$0xff] }
0x1454   :  { %v6996_v62 = vpop.eup %6995 }
0x1455   :  { %v1760_v13 = vmul.f32 %v6996_v62, %v1758_v12  ;;  %v2009_v12 = vld [vmem:[%s6028_s8 + $0x10] sm:$0xff] }
0x1456   :  { %v1650_v56 = vpop.permute.xlu0 %1649 }
0x1457   :  { %v1652_v57 = vmul.f32 %v6992_v55, %v1650_v56 }
0x1459   :  { %1654 = vrot.lane.b32.xlu0 %v1652_v57, %s7185_s24 }
0x14b5   :  { %v1763_v63 = vpop.permute.xlu1 %1762 }
0x14b6   :  { %v1765_v2 = vmul.f32 %v6996_v62, %v1763_v63  ;;  %v7562_v63 = vld [vmem:[%s6031_s4 + $0x8] sm:$0xff] }
0x14b8   :  { %1767 = vrot.lane.b32.xlu1 %v1765_v2, %s7185_s24  ;;  %v7566_v2 = vld [vmem:[%s6031_s4] sm:$0xff]  ;;  %s7202_s4 = smov 21  }
0x14b9   :  { %s6044_s7 = sld [smem:[%s8194_s0 + %s7202_s4]]  }
0x14cb   :  { %v1655_v9 = vpop.permute.xlu0 %1654 }
0x14cc   :  { %v1657_v10 = vadd.f32 %v1655_v9, %v1647_v7 }
0x14ce   :  { %6997 = vtanh.f32 %v1657_v10  ;;  %v1869_v49 = vrot.slane %v1657_v10, 6 }
0x14db   :  { %v6998_v11 = vpop.eup %6997 }
0x14dc   :  { %1660 = vrot.lane.b32.xlu0 %v6998_v11, %s7186_s25 }
0x152a   :  { %v1768_v14 = vpop.permute.xlu1 %1767 }
0x152b   :  { %v7508_v15 = vadd.f32 %v1768_v14, %v1760_v13 }
0x152d   :  { %6999 = vtanh.f32 %v7508_v15  ;;  %v1981_v57 = vrot.slane %v7508_v15, 2 }
0x153a   :  { %v7000_v16 = vpop.eup %6999 }
0x153b   :  { %1773 = vrot.lane.b32.xlu1 %v7000_v16, %s7186_s25 }
0x154e   :  { %v1661_v19 = vpop.permute.xlu0 %1660 }
0x154f   :  { %v7512_v20 = vmul.f32 %v6992_v55, %v1661_v19 }
0x1551   :  { %v1782_v22 = vrot.slane %v7512_v20, 4 }
0x1553   :  { %1783 = vrot.lane.b32.xlu0 %v1782_v22, %s7187_s26 }
0x15ad   :  { %v1774_v23 = vpop.permute.xlu1 %1773 }
0x15ae   :  { %v1776_v25 = vmul.f32 %v6996_v62, %v1774_v23 }
0x15b0   :  { %v1893_v26 = vrot.slane %v1776_v25, 2 }
0x15b2   :  { %1894 = vrot.lane.b32.xlu1 %v1893_v26, %s7185_s24 }
0x15c5   :  { %v1784_v24 = vpop.permute.xlu0 %1783 }
0x15c6   :  { %6521 = vmatmul.mubr.msk.f32.vlgmr.msra.gmra.mxu0 %vm232_vm2, %v1784_v24 }
0x1624   :  { %v1895_v27 = vpop.permute.xlu1 %1894 }
0x1625   :  { %6528 = vmatmul.mubr.msk.f32.vlgmr.msra.gmra.mxu1 %vm232_vm2, %v1895_v27 }
0x1626   :  { %6545 = vmatprep.mubr.msk.f32.mxu1 %vm7179_vm0, %v7177_v0 }
0x1686   :  { %v1853_v28 = vpop.f32.mrf.mxu0 }
0x1687   :  { %v1858_v32 = vrot.slane %v1853_v28, 2 }
0x1688   :  { %v6522_v30 = vpop.f32.mrf.mxu0 }
0x1689   :  { %v1860_v33 = vadd.f32 %v1858_v32, %v7274_v18  ;;  %v6089_v32 = vld [vmem:[%s6029_s12] ss:$0 sm:$0xff]  ;;  %s7205_s12 = smov 25  }
0x168a   :  { %s6048_s14 = sld [smem:[%s8194_s0 + %s7205_s12]]  }
0x168b   :  { %7001 = vtanh.f32 %v1860_v33  ;;  %v6086_v41 = vmul.f32 -1.442695, %v1860_v33 }
0x168d   :  { %7003 = vpow2.f32 %v6086_v41 }
0x1698   :  { %v7002_v38 = vpop.eup %7001 }
0x169a   :  { %v7004_v42 = vpop.eup %7003 }
0x169b   :  { %v1864_v6 = vadd.f32 1.0, %v7004_v42 }
0x169d   :  { %7005 = vrcp.f32 %v1864_v6 }
0x16aa   :  { %v7006_v8 = vpop.eup %7005 }
0x16ab   :  { %v1871_v52 = vmul.f32 %v7006_v8, %v1869_v49 }
0x16e5   :  { %v1964_v35 = vpop.f32.mrf.mxu1 }
0x16e6   :  { %1969 = vrot.lane.b32.xlu1 %v1964_v35, %s7182_s18 }
0x16e7   :  { %v6529_v36 = vpop.f32.mrf.mxu1 }
0x16ea   :  { %1873 = vrot.lane.b32.xlu1 %v7002_v38, %s7184_s23 }
0x1758   :  { %v1970_v43 = vpop.permute.xlu1 %1969 }
0x1759   :  { %v1972_v44 = vadd.f32 %v1970_v43, %v7279_v29 }
0x175b   :  { %7007 = vtanh.f32 %v1972_v44  ;;  %v6088_v47 = vmul.f32 -1.442695, %v1972_v44 }
0x175c   :  { %v1874_v45 = vpop.permute.xlu1 %1873 }
0x175d   :  { %v1876_v18 = vmul.f32 %v7006_v8, %v1874_v45  ;;  %7009 = vpow2.f32 %v6088_v47 }
0x175f   :  { %1878 = vrot.lane.b32.xlu1 %v1876_v18, %s7185_s24 }
0x1768   :  { %v7008_v46 = vpop.eup %7007 }
0x1769   :  { %1985 = vrot.lane.b32.xlu0 %v7008_v46, %s7184_s23 }
0x176a   :  { %v7010_v48 = vpop.eup %7009 }
0x176b   :  { %v1976_v3 = vadd.f32 1.0, %v7010_v48 }
0x176d   :  { %7011 = vrcp.f32 %v1976_v3 }
0x177a   :  { %v7527_v29 = vpop.eup %7011 }
0x177b   :  { %v1983_v58 = vmul.f32 %v7527_v29, %v1981_v57 }
0x17d1   :  { %v1879_v4 = vpop.permute.xlu1 %1878 }
0x17d2   :  { %v1881_v53 = vadd.f32 %v1879_v4, %v1871_v52 }
0x17d4   :  { %7013 = vtanh.f32 %v1881_v53 }
0x17db   :  { %v1986_v54 = vpop.permute.xlu0 %1985 }
0x17dc   :  { %v1988_v55 = vmul.f32 %v7527_v29, %v1986_v54 }
0x17de   :  { %1990 = vrot.lane.b32.xlu0 %v1988_v55, %s7185_s24 }
0x17e1   :  { %v7014_v56 = vpop.eup %7013 }
0x17e2   :  { %1884 = vrot.lane.b32.xlu1 %v7014_v56, %s7186_s25 }
0x17e6   :  { %773 = vrot.lane.b32.xlu1 %v7379_v17, %s7187_s26 }
0x17ea   :  { %438 = vrot.lane.b32.xlu1 %v7287_v40, %s7186_s25 }
0x17ee   :  { %887 = vrot.lane.b32.xlu1 %v7362_v1, %s7186_s25 }
0x17f2   :  { %1333 = vrot.lane.b32.xlu1 %v7438_v39, %s7186_s25 }
0x17f6   :  { %1778 = vrot.lane.b32.xlu1 %v1776_v25, %s7186_s25 }
0x17fa   :  { %1441 = vrot.lane.b32.xlu1 %v7482_v37, %s7187_s26  ;;  %v7552_v37 = vld [vmem:[%s6030_s30 + $0x8] sm:$0xff]  ;;  %s7201_s30 = smov 23  }
0x17fb   :  { %6542 = vmatpush3.msra.mxu1 %v7552_v37  ;;  %s6046_s3 = sld [smem:[%s8194_s0 + %s7201_s30]]  }
0x17fc   :  { %6543 = vmatprep.subr.mxu1 %v7177_v0 }
0x17fd   :  { %6544 = vmatpush3.msra.mxu1 %v7557_v60 }
0x17fe   :  { %6546 = vmatmul.mubr.f32.vlgmr.msra.gmra.mxu1 %v7177_v0  ;;  %6548 = vmatprep.subr.mxu1 %v7177_v0 }
0x17ff   :  { %6549 = vmatpush3.msra.mxu1 %v7562_v63  ;;  %6552 = vmatprep.mubr.msk.f32.mxu1 %vm7179_vm0, %v7177_v0 }
0x1800   :  { %6550 = vmatprep.subr.mxu1 %v7177_v0 }
0x1801   :  { %6551 = vmatpush3.msra.mxu1 %v7566_v2 }
0x1802   :  { %6553 = vmatmul.mubr.f32.vlgmr.msra.gmra.mxu1 %v7177_v0  ;;  %6562 = vmatprep.subr.mxu1 %v7177_v0 }
0x1803   :  { %6563 = vmatpush3.msra.mxu1 %v7562_v63  ;;  %6566 = vmatprep.mubr.msk.f32.mxu1 %vm7179_vm0, %v7177_v0 }
0x1804   :  { %6564 = vmatprep.subr.mxu1 %v7177_v0 }
0x1805   :  { %6565 = vmatpush3.msra.mxu1 %v7566_v2 }
0x1806   :  { %6576 = vmatprep.subr.mxu1 %v7177_v0 }
0x1850   :  { %v1991_v59 = vpop.permute.xlu0 %1990 }
0x1851   :  { %v1993_v17 = vadd.f32 %v1991_v59, %v1983_v58 }
0x1853   :  { %7015 = vtanh.f32 %v1993_v17 }
0x1854   :  { %v1885_v40 = vpop.permute.xlu1 %1884 }
0x1855   :  { %v1887_v1 = vmul.f32 %v7006_v8, %v1885_v40 }
0x1857   :  { %1889 = vrot.lane.b32.xlu1 %v1887_v1, %s7187_s26 }
0x1858   :  { %v774_v39 = vpop.permute.xlu1 %773 }
0x1859   :  { %777 = vst.msk [vmem:[#allocation2] sm:$0x30] %vm776_vm4, %v774_v39 }
0x185c   :  { %v439_v62 = vpop.permute.xlu1 %438 }
0x185d   :  { %442 = vst.msk [vmem:[#allocation2 + $0x8] sm:$0xc0] %vm441_vm5, %v439_v62 }
0x1860   :  { %v7016_v5 = vpop.eup %7015  ;;  %v888_v7 = vpop.permute.xlu1 %887 }
0x1861   :  { %891 = vst.msk [vmem:[#allocation2 + $0x8] sm:$0xc] %vm890_vm6, %v888_v7  ;;  %1996 = vrot.lane.b32.xlu0 %v7016_v5, %s7186_s25 }
0x1864   :  { %v1334_v9 = vpop.permute.xlu1 %1333 }
0x1865   :  { %547 = vrot.lane.b32.xlu0 %v7340_v34, %s7187_s26 }
0x1868   :  { %v1779_v10 = vpop.permute.xlu1 %1778 }
0x1869   :  { %999 = vrot.lane.b32.xlu0 %v7415_v61, %s7187_s26  ;;  %v2010_v61 = vld [vmem:[%s6028_s8 + $0x18] sm:$0xff] }
0x186a   :  { %6530 = vmatprep.subr.mxu0 %v2010_v61 }
0x186b   :  { %6531 = vmatpush3.msra.mxu0 %v2010_v61 }
0x186c   :  { %v1442_v11 = vpop.permute.xlu1 %1441  ;;  %6532 = vmatprep.subr.mxu0 %v2009_v12 }
0x186d   :  { %1444 = vst.msk [vmem:[#allocation2 + $0x8] sm:$0xc] %vm550_vm7, %v1442_v11  ;;  %661 = vrot.lane.b32.xlu0 %v7323_v21, %s7186_s25  ;;  %v2008_v21 = vld [vmem:[%s6028_s8 + $0x8] sm:$0xff]  ;;  %6533 = vmatpush3.msra.mxu0 %v2009_v12 }
0x186e   :  { %6534 = vmatprep.subr.mxu0 %v2008_v21 }
0x186f   :  { %6535 = vmatpush3.msra.mxu0 %v2008_v21 }
0x1871   :  { %1112 = vrot.lane.b32.xlu0 %v7401_v50, %s7186_s25  ;;  %v2007_v50 = vld [vmem:[%s6028_s8] sm:$0xff]  ;;  %s7203_s8 = smov 18  }
0x1872   :  { %6536 = vmatprep.subr.mxu0 %v2007_v50  ;;  %s6041_s11 = sld [smem:[%s8194_s0 + %s7203_s8]]  }
0x1873   :  { %6537 = vmatpush3.msra.mxu0 %v2007_v50 }
0x1874   :  { %6555 = vmatprep.subr.mxu0 %v7177_v0 }
0x1875   :  { %1554 = vrot.lane.b32.xlu0 %v7478_v31, %s7186_s25 }
0x18c9   :  { %v1890_v34 = vpop.permute.xlu1 %1889 }
0x18ca   :  { %1892 = vst.msk [vmem:[#allocation2 + $0x8] sm:$0xc0] %vm1002_vm8, %v1890_v34 }
0x18d3   :  { %v1997_v31 = vpop.permute.xlu0 %1996 }
0x18d4   :  { %v1999_v13 = vmul.f32 %v7527_v29, %v1997_v31 }
0x18d6   :  { %2001 = vrot.lane.b32.xlu0 %v1999_v13, %s7186_s25 }
0x18d7   :  { %v548_v14 = vpop.permute.xlu0 %547 }
0x18d8   :  { %551 = vst.msk [vmem:[#allocation2] sm:$0xc] %vm550_vm7, %v548_v14 }
0x18d9   :  { %1781 = vst.msk [vmem:[#allocation2] sm:$0xc] %vm890_vm6, %v1779_v10 }
0x18da   :  { %1665 = vrot.lane.b32.xlu0 %v7512_v20, %s7187_s26  ;;  %v2169_v20 = vpop.f32.mrf.mxu1 }
0x18db   :  { %v1000_v15 = vpop.permute.xlu0 %999 }
0x18dc   :  { %1003 = vst.msk [vmem:[#allocation2] sm:$0xc0] %vm1002_vm8, %v1000_v15  ;;  %v6547_v23 = vpop.f32.mrf.mxu1 }
0x18dd   :  { %1336 = vst.msk [vmem:[#allocation2] sm:$0xc0] %vm441_vm5, %v1334_v9 }
0x18de   :  { %v2269_v25 = vpop.f32.mrf.mxu1 }
0x18df   :  { %v662_v16 = vpop.permute.xlu0 %661  ;;  %v2274_v26 = vrot.slane %v2269_v25, 2 }
0x18e0   :  { %665 = vst.msk [vmem:[#allocation2 + $0x8] sm:$0x30] %vm664_vm9, %v662_v16  ;;  %v6554_v24 = vpop.f32.mrf.mxu1 }
0x18e1   :  { %2275 = vrot.lane.b32.xlu0 %v2274_v26, %s7182_s18 }
0x18e3   :  { %v1113_v19 = vpop.permute.xlu0 %1112 }
0x18e4   :  { %1116 = vst.msk [vmem:[#allocation2 + $0x8] sm:$0x3] %vm1115_vm10, %v1113_v19 }
0x18e5   :  { %1224 = vst.msk [vmem:[#allocation2 + $0x8] sm:$0x3] %vm335_vm3, %v7454_v51 }
0x18e7   :  { %v1555_v22 = vpop.permute.xlu0 %1554 }
0x18e8   :  { %1557 = vst.msk [vmem:[#allocation2] sm:$0x30] %vm664_vm9, %v1555_v22 }
0x1948   :  { %v2002_v27 = vpop.permute.xlu0 %2001 }
0x1949   :  { %2004 = vst.msk [vmem:[#allocation2] sm:$0x3] %vm1115_vm10, %v2002_v27 }
0x194c   :  { %v1666_v28 = vpop.permute.xlu0 %1665 }
0x194d   :  { %1668 = vst.msk [vmem:[#allocation2 + $0x8] sm:$0x30] %vm776_vm4, %v1666_v28 }
0x1950   :  { %v2005_v30 = vld [vmem:[#allocation2] sm:$0xff] }
0x1951   :  { %6538 = vmatprep.mubr.msk.f32.mxu0 %vm150_vm1, %v2005_v30 }
0x1953   :  { %v2276_v35 = vpop.permute.xlu0 %2275 }
0x1954   :  { %v2006_v51 = vld [vmem:[#allocation2 + $0x8] sm:$0xff] }
0x1955   :  { %6539 = vmatmul.mubr.msk.f32.vlgmr.msra.gmra.mxu0 %vm150_vm1, %v2006_v51 }
0x1956   :  { %6556 = vmatpush3.msra.mxu0 %v7552_v37  ;;  %6559 = vmatprep.mubr.msk.f32.mxu0 %vm7179_vm0, %v7177_v0 }
0x1957   :  { %6557 = vmatprep.subr.mxu0 %v7177_v0 }
0x1958   :  { %6558 = vmatpush3.msra.mxu0 %v7557_v60 }
0x1959   :  { %6569 = vmatprep.subr.mxu0 %v7177_v0 }
0x1a15   :  { %v6540_v33 = vpop.f32.mrf.mxu0 }
0x1a16   :  { %v7625_v36 = vadd.f32 %v6540_v33, %v6089_v32 }
0x1a17   :  { %v2094_v18 = vpop.f32.mrf.mxu0 }
0x1a18   :  { %v2278_v38 = vadd.f32 %v2276_v35, %v7625_v36  ;;  %v7630_v46 = vadd.f32 %v6089_v32, %v2094_v18 }
0x1a1a   :  { %7017 = vtanh.f32 %v2278_v38  ;;  %v6093_v42 = vmul.f32 -1.442695, %v2278_v38  ;;  %v2173_v49 = vadd.f32 %v2169_v20, %v7630_v46 }
0x1a1c   :  { %7019 = vpow2.f32 %v6093_v42  ;;  %v6092_v53 = vmul.f32 -1.442695, %v2173_v49 }
0x1a27   :  { %v7018_v41 = vpop.eup %7017 }
0x1a28   :  { %2288 = vrot.lane.b32.xlu1 %v7018_v41, %s7184_s23 }
0x1a29   :  { %v7020_v6 = vpop.eup %7019 }
0x1a2a   :  { %v2282_v43 = vadd.f32 1.0, %v7020_v6 }
0x1a2c   :  { %7021 = vrcp.f32 %v2282_v43 }
0x1a39   :  { %v7022_v44 = vpop.eup %7021 }
0x1a3a   :  { %v2286_v47 = vmul.f32 0.0, %v7022_v44 }
0x1a9a   :  { %v2289_v8 = vpop.permute.xlu1 %2288 }
0x1a9b   :  { %v2291_v45 = vmul.f32 %v7022_v44, %v2289_v8 }
0x1a9d   :  { %2293 = vrot.lane.b32.xlu0 %v2291_v45, %s7185_s24 }
0x1b0f   :  { %v2294_v48 = vpop.permute.xlu0 %2293 }
0x1b10   :  { %v7632_v3 = vadd.f32 %v2294_v48, %v2286_v47 }
0x1b12   :  { %7023 = vtanh.f32 %v7632_v3  ;;  %v2505_v23 = vrot.slane %v7632_v3, 2 }
0x1b13   :  { %7025 = vtanh.f32 %v2173_v49 }
0x1b14   :  { %7027 = vpow2.f32 %v6092_v53 }
0x1b1f   :  { %v7024_v52 = vpop.eup %7023 }
0x1b20   :  { %2299 = vrot.lane.b32.xlu1 %v7024_v52, %s7186_s25  ;;  %v7026_v4 = vpop.eup %7025 }
0x1b21   :  { %v7028_v29 = vpop.eup %7027 }
0x1b22   :  { %v2177_v54 = vadd.f32 1.0, %v7028_v29 }
0x1b24   :  { %2183 = vrot.lane.b32.xlu1 %v7026_v4, %s7184_s23  ;;  %7029 = vrcp.f32 %v2177_v54 }
0x1b31   :  { %v7030_v58 = vpop.eup %7029 }
0x1b32   :  { %v2181_v1 = vmul.f32 0.0, %v7030_v58 }
0x1b92   :  { %v2300_v55 = vpop.permute.xlu1 %2299 }
0x1b93   :  { %v7638_v56 = vmul.f32 %v7022_v44, %v2300_v55 }
0x1b95   :  { %v2416_v57 = vrot.slane %v7638_v56, 6 }
0x1b96   :  { %v2184_v59 = vpop.permute.xlu1 %2183 }
0x1b97   :  { %v2186_v17 = vmul.f32 %v7030_v58, %v2184_v59  ;;  %2417 = vrot.lane.b32.xlu0 %v2416_v57, %s7185_s24 }
0x1b99   :  { %2188 = vrot.lane.b32.xlu1 %v2186_v17, %s7185_s24 }
0x1c09   :  { %v2418_v40 = vpop.permute.xlu0 %2417 }
0x1c0a   :  { %6567 = vmatmul.mubr.msk.f32.vlgmr.msra.gmra.mxu1 %vm232_vm2, %v2418_v40 }
0x1c0b   :  { %v2189_v39 = vpop.permute.xlu1 %2188  ;;  %6577 = vmatpush3.msra.mxu1 %v7562_v63  ;;  %6580 = vmatprep.mubr.msk.f32.mxu1 %vm7179_vm0, %v7177_v0 }
0x1c0c   :  { %v7647_v62 = vadd.f32 %v2189_v39, %v2181_v1  ;;  %6578 = vmatprep.subr.mxu1 %v7177_v0 }
0x1c0d   :  { %6579 = vmatpush3.msra.mxu1 %v7566_v2 }
0x1c0e   :  { %7031 = vtanh.f32 %v7647_v62  ;;  %6590 = vmatprep.subr.mxu1 %v7177_v0  ;;  %v2392_v45 = vrot.slane %v7647_v62, 6 }
0x1c1b   :  { %v7032_v5 = vpop.eup %7031 }
0x1c1c   :  { %2194 = vrot.lane.b32.xlu1 %v7032_v5, %s7186_s25 }
0x1c8e   :  { %v2195_v7 = vpop.permute.xlu1 %2194 }
0x1c8f   :  { %v2197_v9 = vmul.f32 %v7030_v58, %v2195_v7 }
0x1c91   :  { %2199 = vrot.lane.b32.xlu1 %v2197_v9, %s7187_s26 }
0x1cca   :  { %v2487_v10 = vpop.f32.mrf.mxu1 }
0x1ccb   :  { %v2492_v11 = vrot.slane %v2487_v10, 4 }
0x1ccc   :  { %v6568_v34 = vpop.f32.mrf.mxu1 }
0x1ccd   :  { %2493 = vrot.lane.b32.xlu0 %v2492_v11, %s7182_s18 }
0x1d03   :  { %v2200_v61 = vpop.permute.xlu1 %2199 }
0x1d04   :  { %2202 = vst.msk [vmem:[#allocation3] sm:$0x3] %vm335_vm3, %v2200_v61  ;;  %6560 = vmatmul.mubr.msk.f32.vlgmr.msra.gmra.mxu0 %vm232_vm2, %v2200_v61 }
0x1d05   :  { %6570 = vmatpush3.msra.mxu0 %v7552_v37  ;;  %6573 = vmatprep.mubr.msk.f32.mxu0 %vm7179_vm0, %v7177_v0 }
0x1d06   :  { %6571 = vmatprep.subr.mxu0 %v7177_v0 }
0x1d07   :  { %6572 = vmatpush3.msra.mxu0 %v7557_v60 }
0x1d08   :  { %6583 = vmatprep.subr.mxu0 %v7177_v0 }
0x1d3f   :  { %v2494_v12 = vpop.permute.xlu0 %2493 }
0x1d40   :  { %v2496_v21 = vadd.f32 %v2494_v12, %v7625_v36 }
0x1d42   :  { %7033 = vtanh.f32 %v2496_v21  ;;  %v6097_v31 = vmul.f32 -1.442695, %v2496_v21 }
0x1d44   :  { %7035 = vpow2.f32 %v6097_v31 }
0x1d4f   :  { %v7034_v50 = vpop.eup %7033 }
0x1d50   :  { %2509 = vrot.lane.b32.xlu0 %v7034_v50, %s7184_s23 }
0x1d51   :  { %v7036_v13 = vpop.eup %7035 }
0x1d52   :  { %v2500_v14 = vadd.f32 1.0, %v7036_v13 }
0x1d54   :  { %7037 = vrcp.f32 %v2500_v14 }
0x1d61   :  { %v7038_v15 = vpop.eup %7037 }
0x1d62   :  { %v2507_v26 = vmul.f32 %v7038_v15, %v2505_v23 }
0x1dc2   :  { %v2510_v16 = vpop.permute.xlu0 %2509 }
0x1dc3   :  { %v2512_v19 = vmul.f32 %v7038_v15, %v2510_v16 }
0x1dc4   :  { %v2376_v22 = vpop.f32.mrf.mxu0 }
0x1dc5   :  { %2514 = vrot.lane.b32.xlu0 %v2512_v19, %s7185_s24  ;;  %v2381_v25 = vrot.slane %v2376_v22, 6 }
0x1dc6   :  { %v6561_v20 = vpop.f32.mrf.mxu0 }
0x1dc7   :  { %v2383_v28 = vadd.f32 %v2381_v25, %v7630_v46 }
0x1dc9   :  { %v6095_v32 = vmul.f32 -1.442695, %v2383_v28 }
0x1e37   :  { %v2515_v24 = vpop.permute.xlu0 %2514 }
0x1e38   :  { %v7668_v27 = vadd.f32 %v2515_v24, %v2507_v26 }
0x1e3a   :  { %7039 = vtanh.f32 %v7668_v27  ;;  %v2729_v10 = vrot.slane %v7668_v27, 2 }
0x1e3b   :  { %7041 = vtanh.f32 %v2383_v28 }
0x1e3c   :  { %7043 = vpow2.f32 %v6095_v32 }
0x1e47   :  { %v7040_v30 = vpop.eup %7039 }
0x1e48   :  { %2520 = vrot.lane.b32.xlu0 %v7040_v30, %s7186_s25  ;;  %v7042_v51 = vpop.eup %7041 }
0x1e49   :  { %v7044_v33 = vpop.eup %7043 }
0x1e4a   :  { %v2387_v35 = vadd.f32 1.0, %v7044_v33 }
0x1e4c   :  { %2396 = vrot.lane.b32.xlu0 %v7042_v51, %s7184_s23  ;;  %7045 = vrcp.f32 %v2387_v35 }
0x1e59   :  { %v7046_v43 = vpop.eup %7045 }
0x1e5a   :  { %v2394_v18 = vmul.f32 %v7046_v43, %v2392_v45 }
0x1eba   :  { %v2521_v38 = vpop.permute.xlu0 %2520 }
0x1ebb   :  { %v7674_v41 = vmul.f32 %v7038_v15, %v2521_v38 }
0x1ebd   :  { %v2640_v42 = vrot.slane %v7674_v41, 4 }
0x1ebe   :  { %v2397_v6 = vpop.permute.xlu0 %2396 }
0x1ebf   :  { %2641 = vrot.lane.b32.xlu1 %v2640_v42, %s7185_s24  ;;  %v2399_v44 = vmul.f32 %v7046_v43, %v2397_v6 }
0x1ec3   :  { %2401 = vrot.lane.b32.xlu1 %v2399_v44, %s7185_s24 }
0x1f31   :  { %v2642_v8 = vpop.permute.xlu1 %2641 }
0x1f32   :  { %6581 = vmatmul.mubr.msk.f32.vlgmr.msra.gmra.mxu1 %vm232_vm2, %v2642_v8 }
0x1f33   :  { %6591 = vmatpush3.msra.mxu1 %v7562_v63  ;;  %6594 = vmatprep.mubr.msk.f32.mxu1 %vm7179_vm0, %v7177_v0 }
0x1f34   :  { %6592 = vmatprep.subr.mxu1 %v7177_v0 }
0x1f35   :  { %v2402_v47 = vpop.permute.xlu1 %2401  ;;  %6593 = vmatpush3.msra.mxu1 %v7566_v2 }
0x1f36   :  { %v7686_v48 = vadd.f32 %v2402_v47, %v2394_v18  ;;  %6604 = vmatprep.subr.mxu1 %v7177_v0 }
0x1f38   :  { %7047 = vtanh.f32 %v7686_v48  ;;  %v2616_v24 = vrot.slane %v7686_v48, 6 }
0x1f45   :  { %v7048_v3 = vpop.eup %7047 }
0x1f46   :  { %2407 = vrot.lane.b32.xlu1 %v7048_v3, %s7186_s25 }
0x1fb8   :  { %v2408_v49 = vpop.permute.xlu1 %2407 }
0x1fb9   :  { %v7691_v52 = vmul.f32 %v7046_v43, %v2408_v49 }
0x1fbb   :  { %v2529_v4 = vrot.slane %v7691_v52, 2 }
0x1fbd   :  { %2530 = vrot.lane.b32.xlu1 %v2529_v4, %s7187_s26 }
0x1ff2   :  { %v2711_v53 = vpop.f32.mrf.mxu1 }
0x1ff3   :  { %v2716_v29 = vrot.slane %v2711_v53, 6 }
0x1ff4   :  { %v6582_v54 = vpop.f32.mrf.mxu1 }
0x1ff5   :  { %2717 = vrot.lane.b32.xlu0 %v2716_v29, %s7182_s18 }
0x202f   :  { %v2531_v55 = vpop.permute.xlu1 %2530 }
0x2030   :  { %6574 = vmatmul.mubr.msk.f32.vlgmr.msra.gmra.mxu0 %vm232_vm2, %v2531_v55 }
0x2031   :  { %6584 = vmatpush3.msra.mxu0 %v7552_v37  ;;  %6587 = vmatprep.mubr.msk.f32.mxu0 %vm7179_vm0, %v7177_v0 }
0x2032   :  { %6585 = vmatprep.subr.mxu0 %v7177_v0 }
0x2033   :  { %6586 = vmatpush3.msra.mxu0 %v7557_v60 }
0x2034   :  { %6597 = vmatprep.subr.mxu0 %v7177_v0 }
0x2067   :  { %v2718_v57 = vpop.permute.xlu0 %2717 }
0x2068   :  { %v2720_v58 = vadd.f32 %v2718_v57, %v7625_v36 }
0x206a   :  { %7049 = vtanh.f32 %v2720_v58  ;;  %v6101_v17 = vmul.f32 -1.442695, %v2720_v58 }
0x206c   :  { %7051 = vpow2.f32 %v6101_v17 }
0x2077   :  { %v7050_v59 = vpop.eup %7049 }
0x2078   :  { %2733 = vrot.lane.b32.xlu0 %v7050_v59, %s7184_s23 }
0x2079   :  { %v7052_v40 = vpop.eup %7051 }
0x207a   :  { %v2724_v1 = vadd.f32 1.0, %v7052_v40 }
0x207c   :  { %7053 = vrcp.f32 %v2724_v1 }
0x2089   :  { %v7054_v39 = vpop.eup %7053 }
0x208a   :  { %v2731_v34 = vmul.f32 %v7054_v39, %v2729_v10 }
0x20ea   :  { %v2734_v62 = vpop.permute.xlu0 %2733 }
0x20eb   :  { %v2736_v5 = vmul.f32 %v7054_v39, %v2734_v62 }
0x20ed   :  { %2738 = vrot.lane.b32.xlu0 %v2736_v5, %s7185_s24 }
0x20f0   :  { %v2600_v7 = vpop.f32.mrf.mxu0 }
0x20f1   :  { %v2605_v11 = vrot.slane %v2600_v7, 4 }
0x20f2   :  { %v6575_v9 = vpop.f32.mrf.mxu0 }
0x20f3   :  { %v2607_v21 = vadd.f32 %v2605_v11, %v7630_v46 }
0x20f5   :  { %v6099_v13 = vmul.f32 -1.442695, %v2607_v21 }
0x215f   :  { %v2739_v61 = vpop.permute.xlu0 %2738 }
0x2160   :  { %v7707_v12 = vadd.f32 %v2739_v61, %v2731_v34 }
0x2162   :  { %7055 = vtanh.f32 %v7707_v12  ;;  %v2952_v29 = vrot.slane %v7707_v12, 2 }
0x2163   :  { %7057 = vtanh.f32 %v2607_v21 }
0x2164   :  { %7059 = vpow2.f32 %v6099_v13 }
0x216f   :  { %v7056_v50 = vpop.eup %7055 }
0x2170   :  { %2744 = vrot.lane.b32.xlu1 %v7056_v50, %s7186_s25  ;;  %v7058_v31 = vpop.eup %7057 }
0x2171   :  { %v7060_v14 = vpop.eup %7059 }
0x2172   :  { %v2611_v15 = vadd.f32 1.0, %v7060_v14 }
0x2174   :  { %2620 = vrot.lane.b32.xlu1 %v7058_v31, %s7184_s23  ;;  %7061 = vrcp.f32 %v2611_v15 }
0x2181   :  { %v7062_v23 = vpop.eup %7061 }
0x2182   :  { %v2618_v27 = vmul.f32 %v7062_v23, %v2616_v24 }
0x21e2   :  { %v2745_v16 = vpop.permute.xlu1 %2744 }
0x21e3   :  { %v7713_v19 = vmul.f32 %v7054_v39, %v2745_v16 }
0x21e5   :  { %v2864_v22 = vrot.slane %v7713_v19, 2 }
0x21e6   :  { %v2621_v20 = vpop.permute.xlu1 %2620 }
0x21e7   :  { %2865 = vrot.lane.b32.xlu0 %v2864_v22, %s7185_s24  ;;  %v2623_v25 = vmul.f32 %v7062_v23, %v2621_v20 }
0x21eb   :  { %2625 = vrot.lane.b32.xlu0 %v2623_v25, %s7185_s24 }
0x2259   :  { %v2866_v26 = vpop.permute.xlu0 %2865 }
0x225a   :  { %6595 = vmatmul.mubr.msk.f32.vlgmr.msra.gmra.mxu1 %vm232_vm2, %v2866_v26 }
0x225b   :  { %6605 = vmatpush3.msra.mxu1 %v7562_v63  ;;  %6608 = vmatprep.mubr.msk.f32.mxu1 %vm7179_vm0, %v7177_v0 }
0x225c   :  { %6606 = vmatprep.subr.mxu1 %v7177_v0 }
0x225d   :  { %v2626_v28 = vpop.permute.xlu0 %2625  ;;  %6607 = vmatpush3.msra.mxu1 %v7566_v2 }
0x225e   :  { %v7725_v30 = vadd.f32 %v2626_v28, %v2618_v27  ;;  %6618 = vmatprep.subr.mxu1 %v7177_v0 }
0x2260   :  { %7063 = vtanh.f32 %v7725_v30  ;;  %v2840_v61 = vrot.slane %v7725_v30, 6 }
0x226d   :  { %v7064_v51 = vpop.eup %7063 }
0x226e   :  { %2631 = vrot.lane.b32.xlu1 %v7064_v51, %s7186_s25 }
0x22e0   :  { %v2632_v32 = vpop.permute.xlu1 %2631 }
0x22e1   :  { %v7730_v33 = vmul.f32 %v7062_v23, %v2632_v32 }
0x22e3   :  { %v2753_v35 = vrot.slane %v7730_v33, 4 }
0x22e5   :  { %2754 = vrot.lane.b32.xlu1 %v2753_v35, %s7187_s26 }
0x231a   :  { %v2935_v38 = vpop.f32.mrf.mxu1 }
0x231b   :  { %2940 = vrot.lane.b32.xlu0 %v2935_v38, %s7182_s18 }
0x231c   :  { %v6596_v42 = vpop.f32.mrf.mxu1 }
0x2357   :  { %v2755_v6 = vpop.permute.xlu1 %2754 }
0x2358   :  { %6588 = vmatmul.mubr.msk.f32.vlgmr.msra.gmra.mxu0 %vm232_vm2, %v2755_v6 }
0x2359   :  { %6598 = vmatpush3.msra.mxu0 %v7552_v37  ;;  %6601 = vmatprep.mubr.msk.f32.mxu0 %vm7179_vm0, %v7177_v0 }
0x235a   :  { %6599 = vmatprep.subr.mxu0 %v7177_v0 }
0x235b   :  { %6600 = vmatpush3.msra.mxu0 %v7557_v60 }
0x235c   :  { %6611 = vmatprep.subr.mxu0 %v7177_v0 }
0x238d   :  { %v2941_v43 = vpop.permute.xlu0 %2940 }
0x238e   :  { %v2943_v44 = vadd.f32 %v2941_v43, %v7625_v36 }
0x2390   :  { %7065 = vtanh.f32 %v2943_v44  ;;  %v6105_v45 = vmul.f32 -1.442695, %v2943_v44 }
0x2392   :  { %7067 = vpow2.f32 %v6105_v45 }
0x239d   :  { %v7066_v8 = vpop.eup %7065 }
0x239e   :  { %2956 = vrot.lane.b32.xlu0 %v7066_v8, %s7184_s23 }
0x239f   :  { %v7068_v18 = vpop.eup %7067 }
0x23a0   :  { %v2947_v47 = vadd.f32 1.0, %v7068_v18 }
0x23a2   :  { %7069 = vrcp.f32 %v2947_v47 }
0x23af   :  { %v7070_v48 = vpop.eup %7069 }
0x23b0   :  { %v2954_v55 = vmul.f32 %v7070_v48, %v2952_v29 }
0x2410   :  { %v2957_v3 = vpop.permute.xlu0 %2956 }
0x2411   :  { %v2959_v49 = vmul.f32 %v7070_v48, %v2957_v3 }
0x2413   :  { %2961 = vrot.lane.b32.xlu1 %v2959_v49, %s7185_s24 }
0x2418   :  { %v2824_v4 = vpop.f32.mrf.mxu0 }
0x2419   :  { %v2829_v54 = vrot.slane %v2824_v4, 2 }
0x241a   :  { %v6589_v53 = vpop.f32.mrf.mxu0 }
0x241b   :  { %v2831_v59 = vadd.f32 %v2829_v54, %v7630_v46 }
0x241d   :  { %v6103_v1 = vmul.f32 -1.442695, %v2831_v59 }
0x2485   :  { %v2962_v57 = vpop.permute.xlu1 %2961 }
0x2486   :  { %v7746_v58 = vadd.f32 %v2962_v57, %v2954_v55 }
0x2488   :  { %7071 = vtanh.f32 %v7746_v58  ;;  %v3172_v8 = vrot.slane %v7746_v58, 2 }
0x2489   :  { %7073 = vtanh.f32 %v2831_v59 }
0x248a   :  { %7075 = vpow2.f32 %v6103_v1 }
0x2495   :  { %v7072_v17 = vpop.eup %7071 }
0x2496   :  { %2967 = vrot.lane.b32.xlu0 %v7072_v17, %s7186_s25  ;;  %v7074_v40 = vpop.eup %7073 }
0x2497   :  { %v7076_v39 = vpop.eup %7075 }
0x2498   :  { %v2835_v62 = vadd.f32 1.0, %v7076_v39 }
0x249a   :  { %2844 = vrot.lane.b32.xlu0 %v7074_v40, %s7184_s23  ;;  %7077 = vrcp.f32 %v2835_v62 }
0x24a7   :  { %v7078_v9 = vpop.eup %7077 }
0x24a8   :  { %v2842_v12 = vmul.f32 %v7078_v9, %v2840_v61 }
0x2508   :  { %v2968_v5 = vpop.permute.xlu0 %2967 }
0x2509   :  { %v7752_v7 = vmul.f32 %v7070_v48, %v2968_v5 }
0x250b   :  { %3084 = vrot.lane.b32.xlu1 %v7752_v7, %s7185_s24 }
0x250c   :  { %v2845_v10 = vpop.permute.xlu0 %2844 }
0x250d   :  { %v2847_v11 = vmul.f32 %v7078_v9, %v2845_v10 }
0x250f   :  { %2849 = vrot.lane.b32.xlu1 %v2847_v11, %s7185_s24 }
0x257d   :  { %v3085_v34 = vpop.permute.xlu1 %3084 }
0x257e   :  { %6609 = vmatmul.mubr.msk.f32.vlgmr.msra.gmra.mxu1 %vm232_vm2, %v3085_v34 }
0x257f   :  { %6619 = vmatpush3.msra.mxu1 %v7562_v63  ;;  %6622 = vmatprep.mubr.msk.f32.mxu1 %vm7179_vm0, %v7177_v0 }
0x2580   :  { %6620 = vmatprep.subr.mxu1 %v7177_v0 }
0x2581   :  { %v2850_v21 = vpop.permute.xlu1 %2849  ;;  %6621 = vmatpush3.msra.mxu1 %v7566_v2 }
0x2582   :  { %v2852_v50 = vadd.f32 %v2850_v21, %v2842_v12  ;;  %6632 = vmatprep.subr.mxu1 %v7177_v0 }
0x2584   :  { %7079 = vtanh.f32 %v2852_v50  ;;  %v3060_v57 = vrot.slane %v2852_v50, 6 }
0x2591   :  { %v7080_v31 = vpop.eup %7079 }
0x2592   :  { %2855 = vrot.lane.b32.xlu0 %v7080_v31, %s7186_s25 }
0x2604   :  { %v2856_v13 = vpop.permute.xlu0 %2855 }
0x2605   :  { %v7766_v14 = vmul.f32 %v7078_v9, %v2856_v13 }
0x2607   :  { %v2976_v15 = vrot.slane %v7766_v14, 6 }
0x2609   :  { %2977 = vrot.lane.b32.xlu1 %v2976_v15, %s7187_s26 }
0x263e   :  { %v3154_v16 = vpop.f32.mrf.mxu1 }
0x263f   :  { %v3159_v22 = vrot.slane %v3154_v16, 2 }
0x2640   :  { %v6610_v20 = vpop.f32.mrf.mxu1 }
0x2641   :  { %3160 = vrot.lane.b32.xlu0 %v3159_v22, %s7182_s18 }
0x267b   :  { %v2978_v23 = vpop.permute.xlu1 %2977 }
0x267c   :  { %6602 = vmatmul.mubr.msk.f32.vlgmr.msra.gmra.mxu0 %vm232_vm2, %v2978_v23 }
0x267d   :  { %6612 = vmatpush3.msra.mxu0 %v7552_v37  ;;  %6615 = vmatprep.mubr.msk.f32.mxu0 %vm7179_vm0, %v7177_v0 }
0x267e   :  { %6613 = vmatprep.subr.mxu0 %v7177_v0 }
0x267f   :  { %6614 = vmatpush3.msra.mxu0 %v7557_v60 }
0x2680   :  { %6625 = vmatprep.subr.mxu0 %v7177_v0 }
0x26b3   :  { %v3161_v25 = vpop.permute.xlu0 %3160 }
0x26b4   :  { %v3163_v26 = vadd.f32 %v3161_v25, %v7630_v46 }
0x26b6   :  { %7081 = vtanh.f32 %v3163_v26  ;;  %v6109_v27 = vmul.f32 -1.442695, %v3163_v26 }
0x26b8   :  { %7083 = vpow2.f32 %v6109_v27 }
0x26c3   :  { %v7082_v24 = vpop.eup %7081 }
0x26c4   :  { %3176 = vrot.lane.b32.xlu1 %v7082_v24, %s7184_s23 }
0x26c5   :  { %v7084_v28 = vpop.eup %7083 }
0x26c6   :  { %v3167_v30 = vadd.f32 1.0, %v7084_v28 }
0x26c8   :  { %7085 = vrcp.f32 %v3167_v30 }
0x26d5   :  { %v7086_v51 = vpop.eup %7085 }
0x26d6   :  { %v3174_v45 = vmul.f32 %v7086_v51, %v3172_v8 }
0x2736   :  { %v3177_v32 = vpop.permute.xlu1 %3176 }
0x2737   :  { %v3179_v35 = vmul.f32 %v7086_v51, %v3177_v32 }
0x2739   :  { %3181 = vrot.lane.b32.xlu0 %v3179_v35, %s7185_s24 }
0x273c   :  { %v3047_v38 = vpop.f32.mrf.mxu0 }
0x273d   :  { %v3051_v42 = vadd.f32 %v3047_v38, %v7625_v36 }
0x273e   :  { %v6603_v6 = vpop.f32.mrf.mxu0 }
0x273f   :  { %7087 = vtanh.f32 %v3051_v42  ;;  %v6107_v44 = vmul.f32 -1.442695, %v3051_v42 }
0x2741   :  { %7089 = vpow2.f32 %v6107_v44 }
0x274c   :  { %v7088_v43 = vpop.eup %7087 }
0x274d   :  { %3064 = vrot.lane.b32.xlu0 %v7088_v43, %s7184_s23 }
0x274e   :  { %v7090_v18 = vpop.eup %7089 }
0x274f   :  { %v3055_v3 = vadd.f32 1.0, %v7090_v18 }
0x27ab   :  { %v3182_v47 = vpop.permute.xlu0 %3181 }
0x27ac   :  { %v7784_v48 = vadd.f32 %v3182_v47, %v3174_v45 }
0x27ae   :  { %7091 = vtanh.f32 %v7784_v48  ;;  %v3393_v38 = vrot.slane %v7784_v48, 2 }
0x27af   :  { %7093 = vrcp.f32 %v3055_v3 }
0x27bb   :  { %v7092_v49 = vpop.eup %7091 }
0x27bc   :  { %3187 = vrot.lane.b32.xlu1 %v7092_v49, %s7186_s25  ;;  %v7094_v4 = vpop.eup %7093 }
0x27bd   :  { %v3062_v59 = vmul.f32 %v7094_v4, %v3060_v57 }
0x27bf   :  { %v3065_v53 = vpop.permute.xlu0 %3064 }
0x27c0   :  { %v3067_v29 = vmul.f32 %v7094_v4, %v3065_v53 }
0x27c2   :  { %3069 = vrot.lane.b32.xlu0 %v3067_v29, %s7185_s24 }
0x282e   :  { %v3188_v54 = vpop.permute.xlu1 %3187 }
0x282f   :  { %v7789_v55 = vmul.f32 %v7086_v51, %v3188_v54 }
0x2831   :  { %v3304_v58 = vrot.slane %v7789_v55, 6 }
0x2833   :  { %3305 = vrot.lane.b32.xlu1 %v3304_v58, %s7185_s24 }
0x2834   :  { %v3070_v17 = vpop.permute.xlu0 %3069 }
0x2835   :  { %v7793_v40 = vadd.f32 %v3070_v17, %v3062_v59 }
0x2837   :  { %7095 = vtanh.f32 %v7793_v40  ;;  %v3280_v8 = vrot.slane %v7793_v40, 6 }
0x2844   :  { %v7096_v1 = vpop.eup %7095 }
0x2845   :  { %3075 = vrot.lane.b32.xlu1 %v7096_v1, %s7186_s25 }
0x28a5   :  { %v3306_v39 = vpop.permute.xlu1 %3305 }
0x28a6   :  { %6623 = vmatmul.mubr.msk.f32.vlgmr.msra.gmra.mxu1 %vm232_vm2, %v3306_v39 }
0x28a7   :  { %6633 = vmatpush3.msra.mxu1 %v7562_v63  ;;  %6636 = vmatprep.mubr.msk.f32.mxu1 %vm7179_vm0, %v7177_v0 }
0x28a8   :  { %6634 = vmatprep.subr.mxu1 %v7177_v0 }
0x28a9   :  { %6635 = vmatpush3.msra.mxu1 %v7566_v2 }
0x28aa   :  { %6646 = vmatprep.subr.mxu1 %v7177_v0 }
0x28b7   :  { %v3076_v62 = vpop.permute.xlu1 %3075 }
0x28b8   :  { %v3078_v5 = vmul.f32 %v7094_v4, %v3076_v62 }
0x28ba   :  { %3080 = vrot.lane.b32.xlu0 %v3078_v5, %s7187_s26 }
0x292c   :  { %v7805_v9 = vpop.permute.xlu0 %3080 }
0x292d   :  { %6616 = vmatmul.mubr.msk.f32.vlgmr.msra.gmra.mxu0 %vm232_vm2, %v7805_v9 }
0x292e   :  { %6626 = vmatpush3.msra.mxu0 %v7552_v37  ;;  %6629 = vmatprep.mubr.msk.f32.mxu0 %vm7179_vm0, %v7177_v0 }
0x292f   :  { %6627 = vmatprep.subr.mxu0 %v7177_v0 }
0x2930   :  { %6628 = vmatpush3.msra.mxu0 %v7557_v60 }
0x2931   :  { %6639 = vmatprep.subr.mxu0 %v7177_v0 }
0x2966   :  { %v3375_v10 = vpop.f32.mrf.mxu1 }
0x2967   :  { %v3380_v11 = vrot.slane %v3375_v10, 4 }
0x2968   :  { %v6624_v34 = vpop.f32.mrf.mxu1 }
0x2969   :  { %3381 = vrot.lane.b32.xlu1 %v3380_v11, %s7182_s18 }
0x29db   :  { %v3382_v61 = vpop.permute.xlu1 %3381 }
0x29dc   :  { %v3384_v12 = vadd.f32 %v3382_v61, %v7630_v46 }
0x29de   :  { %7097 = vtanh.f32 %v3384_v12  ;;  %v6113_v22 = vmul.f32 -1.442695, %v3384_v12 }
0x29eb   :  { %v7098_v21 = vpop.eup %7097 }
0x29ec   :  { %3397 = vrot.lane.b32.xlu0 %v7098_v21, %s7184_s23 }
0x29ed   :  { %v3264_v50 = vpop.f32.mrf.mxu0 }
0x29ee   :  { %v3269_v31 = vrot.slane %v3264_v50, 6 }
0x29ef   :  { %v6617_v13 = vpop.f32.mrf.mxu0 }
0x29f0   :  { %v3271_v15 = vadd.f32 %v3269_v31, %v7625_v36 }
0x29f2   :  { %7099 = vtanh.f32 %v3271_v15  ;;  %v6111_v25 = vmul.f32 -1.442695, %v3271_v15 }
0x29f3   :  { %7101 = vpow2.f32 %v6113_v22 }
0x29ff   :  { %v7100_v16 = vpop.eup %7099 }
0x2a00   :  { %3284 = vrot.lane.b32.xlu0 %v7100_v16, %s7184_s23  ;;  %v7102_v20 = vpop.eup %7101 }
0x2a01   :  { %v3388_v23 = vadd.f32 1.0, %v7102_v20 }
0x2a03   :  { %7103 = vrcp.f32 %v3388_v23 }
0x2a04   :  { %7105 = vpow2.f32 %v6111_v25 }
0x2a10   :  { %v7104_v26 = vpop.eup %7103 }
0x2a11   :  { %v7106_v24 = vpop.eup %7105  ;;  %v3395_v42 = vmul.f32 %v7104_v26, %v3393_v38 }
0x2a12   :  { %v3275_v30 = vadd.f32 1.0, %v7106_v24 }
0x2a14   :  { %7107 = vrcp.f32 %v3275_v30 }
0x2a21   :  { %v7108_v51 = vpop.eup %7107 }
0x2a22   :  { %v3282_v45 = vmul.f32 %v7108_v51, %v3280_v8 }
0x2a5e   :  { %v3398_v27 = vpop.permute.xlu0 %3397 }
0x2a5f   :  { %v3400_v28 = vmul.f32 %v7104_v26, %v3398_v27 }
0x2a61   :  { %3402 = vrot.lane.b32.xlu1 %v3400_v28, %s7185_s24 }
0x2a72   :  { %v3285_v32 = vpop.permute.xlu0 %3284 }
0x2a73   :  { %v3287_v35 = vmul.f32 %v7108_v51, %v3285_v32 }
0x2a75   :  { %3289 = vrot.lane.b32.xlu0 %v3287_v35, %s7185_s24 }
0x2ad3   :  { %v3403_v6 = vpop.permute.xlu1 %3402 }
0x2ad4   :  { %v7823_v43 = vadd.f32 %v3403_v6, %v3395_v42 }
0x2ad6   :  { %7109 = vtanh.f32 %v7823_v43  ;;  %v3617_v27 = vrot.slane %v7823_v43, 2 }
0x2ae3   :  { %v7110_v44 = vpop.eup %7109 }
0x2ae4   :  { %3408 = vrot.lane.b32.xlu1 %v7110_v44, %s7186_s25 }
0x2ae7   :  { %v3290_v18 = vpop.permute.xlu0 %3289 }
0x2ae8   :  { %v3292_v47 = vadd.f32 %v3290_v18, %v3282_v45 }
0x2aea   :  { %7111 = vtanh.f32 %v3292_v47  ;;  %v3504_v20 = vrot.slane %v3292_v47, 6 }
0x2af7   :  { %v7112_v3 = vpop.eup %7111 }
0x2af8   :  { %3295 = vrot.lane.b32.xlu0 %v7112_v3, %s7186_s25 }
0x2b56   :  { %v3409_v49 = vpop.permute.xlu1 %3408 }
0x2b57   :  { %v7829_v48 = vmul.f32 %v7104_v26, %v3409_v49 }
0x2b59   :  { %v3528_v4 = vrot.slane %v7829_v48, 4 }
0x2b5b   :  { %3529 = vrot.lane.b32.xlu1 %v3528_v4, %s7185_s24 }
0x2b6a   :  { %v3296_v53 = vpop.permute.xlu0 %3295 }
0x2b6b   :  { %v7833_v29 = vmul.f32 %v7108_v51, %v3296_v53 }
0x2b6d   :  { %v3417_v54 = vrot.slane %v7833_v29, 2 }
0x2b6f   :  { %3418 = vrot.lane.b32.xlu1 %v3417_v54, %s7187_s26 }
0x2bcd   :  { %v3530_v57 = vpop.permute.xlu1 %3529 }
0x2bce   :  { %6637 = vmatmul.mubr.msk.f32.vlgmr.msra.gmra.mxu1 %vm232_vm2, %v3530_v57 }
0x2bcf   :  { %6647 = vmatpush3.msra.mxu1 %v7562_v63  ;;  %6650 = vmatprep.mubr.msk.f32.mxu1 %vm7179_vm0, %v7177_v0 }
0x2bd0   :  { %6648 = vmatprep.subr.mxu1 %v7177_v0 }
0x2bd1   :  { %6649 = vmatpush3.msra.mxu1 %v7566_v2 }
0x2be1   :  { %v3419_v58 = vpop.permute.xlu1 %3418 }
0x2be2   :  { %6630 = vmatmul.mubr.msk.f32.vlgmr.msra.gmra.mxu0 %vm232_vm2, %v3419_v58 }
0x2be3   :  { %6640 = vmatpush3.msra.mxu0 %v7552_v37  ;;  %6643 = vmatprep.mubr.msk.f32.mxu0 %vm7179_vm0, %v7177_v0 }
0x2be4   :  { %6641 = vmatprep.subr.mxu0 %v7177_v0 }
0x2be5   :  { %6642 = vmatpush3.msra.mxu0 %v7557_v60 }
0x2c8e   :  { %v3599_v63 = vpop.f32.mrf.mxu1 }
0x2c8f   :  { %v3604_v59 = vrot.slane %v3599_v63, 6 }
0x2c90   :  { %v6638_v17 = vpop.f32.mrf.mxu1 }
0x2c91   :  { %3605 = vrot.lane.b32.xlu0 %v3604_v59, %s7182_s18 }
0x2ca2   :  { %v3488_v40 = vpop.f32.mrf.mxu0 }
0x2ca3   :  { %v3493_v1 = vrot.slane %v3488_v40, 4 }
0x2ca4   :  { %v6631_v2 = vpop.f32.mrf.mxu0 }
0x2ca5   :  { %v3495_v39 = vadd.f32 %v3493_v1, %v7625_v36 }
0x2ca7   :  { %7113 = vtanh.f32 %v3495_v39  ;;  %v6115_v37 = vmul.f32 -1.442695, %v3495_v39 }
0x2ca9   :  { %7115 = vpow2.f32 %v6115_v37 }
0x2cb4   :  { %v7114_v62 = vpop.eup %7113 }
0x2cb5   :  { %3508 = vrot.lane.b32.xlu0 %v7114_v62, %s7184_s23 }
0x2cb6   :  { %v7116_v60 = vpop.eup %7115 }
0x2cb7   :  { %v3499_v34 = vadd.f32 1.0, %v7116_v60 }
0x2d03   :  { %v3606_v5 = vpop.permute.xlu0 %3605 }
0x2d04   :  { %v3608_v10 = vadd.f32 %v3606_v5, %v7630_v46 }
0x2d06   :  { %7117 = vtanh.f32 %v3608_v10  ;;  %v6117_v50 = vmul.f32 -1.442695, %v3608_v10 }
0x2d07   :  { %7119 = vrcp.f32 %v3499_v34 }
0x2d08   :  { %7121 = vpow2.f32 %v6117_v50 }
0x2d13   :  { %v7118_v11 = vpop.eup %7117 }
0x2d14   :  { %3621 = vrot.lane.b32.xlu1 %v7118_v11, %s7184_s23  ;;  %v7120_v61 = vpop.eup %7119 }
0x2d15   :  { %v7122_v31 = vpop.eup %7121  ;;  %v3506_v23 = vmul.f32 %v7120_v61, %v3504_v20  ;;  %v3951_v20 = vld [vmem:[%s7918_s21 + $0x10] sm:$0xff] }
0x2d16   :  { %v3612_v13 = vadd.f32 1.0, %v7122_v31 }
0x2d18   :  { %7123 = vrcp.f32 %v3612_v13 }
0x2d25   :  { %v7124_v15 = vpop.eup %7123 }
0x2d26   :  { %v3619_v28 = vmul.f32 %v7124_v15, %v3617_v27 }
0x2d27   :  { %v3509_v12 = vpop.permute.xlu0 %3508 }
0x2d28   :  { %v3511_v21 = vmul.f32 %v7120_v61, %v3509_v12 }
0x2d2a   :  { %3513 = vrot.lane.b32.xlu0 %v3511_v21, %s7185_s24 }
0x2d86   :  { %v3622_v16 = vpop.permute.xlu1 %3621 }
0x2d87   :  { %v3624_v22 = vmul.f32 %v7124_v15, %v3622_v16 }
0x2d89   :  { %3626 = vrot.lane.b32.xlu1 %v3624_v22, %s7185_s24 }
0x2d9c   :  { %v3514_v25 = vpop.permute.xlu0 %3513 }
0x2d9d   :  { %v3516_v26 = vadd.f32 %v3514_v25, %v3506_v23 }
0x2d9f   :  { %7125 = vtanh.f32 %v3516_v26  ;;  %v3728_v39 = vrot.slane %v3516_v26, 6 }
0x2dac   :  { %v7126_v24 = vpop.eup %7125 }
0x2dad   :  { %3519 = vrot.lane.b32.xlu0 %v7126_v24, %s7186_s25 }
0x2dfb   :  { %v3627_v30 = vpop.permute.xlu1 %3626 }
0x2dfc   :  { %v7858_v51 = vadd.f32 %v3627_v30, %v3619_v28 }
0x2dfe   :  { %7127 = vtanh.f32 %v7858_v51  ;;  %v3840_v31 = vrot.slane %v7858_v51, 2 }
0x2e0b   :  { %v7128_v32 = vpop.eup %7127 }
0x2e0c   :  { %3632 = vrot.lane.b32.xlu1 %v7128_v32, %s7186_s25 }
0x2e1f   :  { %v3520_v35 = vpop.permute.xlu0 %3519 }
0x2e20   :  { %v7862_v38 = vmul.f32 %v7120_v61, %v3520_v35  ;;  %v3867_v35 = vld [vmem:[%s7911_s16 + $0x8] sm:$0xff] }
0x2e22   :  { %v3641_v42 = vrot.slane %v7862_v38, 4 }
0x2e24   :  { %3642 = vrot.lane.b32.xlu0 %v3641_v42, %s7187_s26  ;;  %v3949_v42 = vld [vmem:[%s7918_s21] sm:$0xff] }
0x2e7e   :  { %v3633_v6 = vpop.permute.xlu1 %3632 }
0x2e7f   :  { %v3635_v44 = vmul.f32 %v7124_v15, %v3633_v6 }
0x2e81   :  { %v3752_v8 = vrot.slane %v3635_v44, 2 }
0x2e83   :  { %3753 = vrot.lane.b32.xlu1 %v3752_v8, %s7185_s24  ;;  %v7949_v8 = vld [vmem:[%s6035_s28] sm:$0xff] }
0x2e96   :  { %v3643_v43 = vpop.permute.xlu0 %3642 }
0x2e97   :  { %6644 = vmatmul.mubr.msk.f32.vlgmr.msra.gmra.mxu0 %vm232_vm2, %v3643_v43 }
0x2ef5   :  { %v3754_v45 = vpop.permute.xlu1 %3753 }
0x2ef6   :  { %6651 = vmatmul.mubr.msk.f32.vlgmr.msra.gmra.mxu1 %vm232_vm2, %v3754_v45 }
0x2f57   :  { %v3712_v18 = vpop.f32.mrf.mxu0 }
0x2f58   :  { %v3717_v47 = vrot.slane %v3712_v18, 2 }
0x2f59   :  { %v6645_v3 = vpop.f32.mrf.mxu0 }
0x2f5a   :  { %v3719_v49 = vadd.f32 %v3717_v47, %v7625_v36 }
0x2f5c   :  { %7129 = vtanh.f32 %v3719_v49  ;;  %v6119_v54 = vmul.f32 -1.442695, %v3719_v49 }
0x2f5e   :  { %7131 = vpow2.f32 %v6119_v54 }
0x2f69   :  { %v7130_v4 = vpop.eup %7129 }
0x2f6a   :  { %3732 = vrot.lane.b32.xlu0 %v7130_v4, %s7184_s23 }
0x2f6b   :  { %v7132_v58 = vpop.eup %7131 }
0x2f6c   :  { %v3723_v63 = vadd.f32 1.0, %v7132_v58 }
0x2f6e   :  { %7133 = vrcp.f32 %v3723_v63 }
0x2f7b   :  { %v7134_v59 = vpop.eup %7133 }
0x2f7c   :  { %v3730_v62 = vmul.f32 %v7134_v59, %v3728_v39 }
0x2fb6   :  { %v3823_v53 = vpop.f32.mrf.mxu1 }
0x2fb7   :  { %3828 = vrot.lane.b32.xlu1 %v3823_v53, %s7182_s18 }
0x2fb8   :  { %v6652_v57 = vpop.f32.mrf.mxu1 }
0x2fdc   :  { %v3733_v17 = vpop.permute.xlu0 %3732 }
0x2fdd   :  { %v3735_v40 = vmul.f32 %v7134_v59, %v3733_v17 }
0x2fdf   :  { %3737 = vrot.lane.b32.xlu0 %v3735_v40, %s7185_s24 }
0x3029   :  { %v3829_v1 = vpop.permute.xlu1 %3828 }
0x302a   :  { %v3831_v36 = vadd.f32 %v3829_v1, %v7630_v46 }
0x302c   :  { %7135 = vtanh.f32 %v3831_v36  ;;  %v6121_v46 = vmul.f32 -1.442695, %v3831_v36 }
0x3039   :  { %v7136_v2 = vpop.eup %7135 }
0x303a   :  { %3844 = vrot.lane.b32.xlu1 %v7136_v2, %s7184_s23  ;;  %v7955_v2 = vld [vmem:[%s6035_s28 + $0x8] sm:$0xff]  ;;  %s7209_s28 = smov 11  }
0x303b   :  { %s6034_s1 = sld [smem:[%s8194_s0 + %s7209_s28]]  }
0x3051   :  { %v3738_v37 = vpop.permute.xlu0 %3737 }
0x3052   :  { %v3740_v5 = vadd.f32 %v3738_v37, %v3730_v62 }
0x3054   :  { %7137 = vtanh.f32 %v3740_v5 }
0x3055   :  { %7139 = vpow2.f32 %v6121_v46  ;;  %v4140_v46 = vld [vmem:[%s6037_s2 + $0x8] sm:$0xff] }
0x3061   :  { %v7138_v10 = vpop.eup %7137 }
0x3062   :  { %3743 = vrot.lane.b32.xlu0 %v7138_v10, %s7186_s25  ;;  %v7140_v60 = vpop.eup %7139 }
0x3063   :  { %v3835_v11 = vadd.f32 1.0, %v7140_v60 }
0x3065   :  { %7141 = vrcp.f32 %v3835_v11 }
0x3066   :  { %2304 = vrot.lane.b32.xlu0 %v7638_v56, %s7186_s25 }
0x306a   :  { %2749 = vrot.lane.b32.xlu0 %v7713_v19, %s7186_s25 }
0x306e   :  { %3300 = vrot.lane.b32.xlu0 %v7833_v29, %s7187_s26 }
0x3072   :  { %v7142_v34 = vpop.eup %7141 }
0x3073   :  { %v3842_v13 = vmul.f32 %v7142_v34, %v3840_v31  ;;  %v4315_v31 = vld [vmem:[%s6042_s6 + $0x18] sm:$0xff] }
0x30ac   :  { %v3845_v61 = vpop.permute.xlu1 %3844 }
0x30ad   :  { %v3847_v12 = vmul.f32 %v7142_v34, %v3845_v61 }
0x30af   :  { %3849 = vrot.lane.b32.xlu1 %v3847_v12, %s7185_s24  ;;  %s7213_s24 = smov 30  }
0x30d4   :  { %v3744_v21 = vpop.permute.xlu0 %3743 }
0x30d5   :  { %v3746_v50 = vmul.f32 %v7134_v59, %v3744_v21 }
0x30d7   :  { %3748 = vrot.lane.b32.xlu0 %v3746_v50, %s7187_s26  ;;  %v4319_v50 = vld [vmem:[%s6042_s6 + $0x38] sm:$0xff] }
0x30d8   :  { %v2305_v56 = vpop.permute.xlu0 %2304 }
0x30d9   :  { %2307 = vst.msk [vmem:[#allocation3 + $0x8] sm:$0xc0] %vm441_vm5, %v2305_v56  ;;  %v4318_v56 = vld [vmem:[%s6042_s6 + $0x30] sm:$0xff] }
0x30db   :  { %2636 = vrot.lane.b32.xlu0 %v7730_v33, %s7187_s26 }
0x30dc   :  { %v2750_v19 = vpop.permute.xlu0 %2749 }
0x30dd   :  { %2752 = vst.msk [vmem:[#allocation3 + $0x8] sm:$0xc] %vm890_vm6, %v2750_v19  ;;  %v4317_v19 = vld [vmem:[%s6042_s6 + $0x28] sm:$0xff] }
0x30df   :  { %3192 = vrot.lane.b32.xlu0 %v7789_v55, %s7186_s25 }
0x30e0   :  { %v3301_v29 = vpop.permute.xlu0 %3300 }
0x30e1   :  { %3303 = vst.msk [vmem:[#allocation3 + $0x8] sm:$0xc] %vm550_vm7, %v3301_v29  ;;  %v4316_v29 = vld [vmem:[%s6042_s6 + $0x20] sm:$0xff] }
0x30e3   :  { %3637 = vrot.lane.b32.xlu0 %v3635_v44, %s7186_s25 }
0x3121   :  { %v3850_v15 = vpop.permute.xlu1 %3849 }
0x3122   :  { %v3852_v16 = vadd.f32 %v3850_v15, %v3842_v13  ;;  %v4314_v13 = vld [vmem:[%s6042_s6 + $0x10] sm:$0xff]  ;;  %v4313_v15 = vld [vmem:[%s6042_s6 + $0x8] sm:$0xff] }
0x3124   :  { %7143 = vtanh.f32 %v3852_v16  ;;  %v4312_v16 = vld [vmem:[%s6042_s6] sm:$0xff]  ;;  %s7211_s6 = smov 29  }
0x3131   :  { %v7144_v22 = vpop.eup %7143 }
0x3132   :  { %3855 = vrot.lane.b32.xlu1 %v7144_v22, %s7186_s25  ;;  %v4230_v22 = vld [vmem:[%s6039_s9] sm:$0xff]  ;;  %s6052_s9 = sld [smem:[%s8194_s0 + %s7211_s6]]  }
0x3136   :  { %2525 = vrot.lane.b32.xlu1 %v7674_v41, %s7186_s25  ;;  %v3866_v41 = vld [vmem:[%s7911_s16] sm:$0xff] }
0x3137   :  { %6657 = vmatprep.mubr.msk.f32.mxu0 %vm232_vm2, %v3866_v41 }
0x313a   :  { %2972 = vrot.lane.b32.xlu1 %v7752_v7, %s7186_s25 }
0x313e   :  { %3524 = vrot.lane.b32.xlu1 %v7862_v38, %s7187_s26  ;;  %v3950_v38 = vld [vmem:[%s7918_s21 + $0x8] sm:$0xff] }
0x3142   :  { %2412 = vrot.lane.b32.xlu1 %v7691_v52, %s7187_s26 }
0x3146   :  { %2860 = vrot.lane.b32.xlu1 %v7766_v14, %s7187_s26  ;;  %s7200_s26 = smov 22  }
0x3147   :  { %s6045_s29 = sld [smem:[%s8194_s0 + %s7200_s26]]  }
0x3149   :  { %v3749_v33 = vpop.permute.xlu0 %3748 }
0x314a   :  { %3751 = vst.msk [vmem:[#allocation3 + $0x8] sm:$0xc0] %vm1002_vm8, %v3749_v33  ;;  %3413 = vrot.lane.b32.xlu1 %v7829_v48, %s7186_s25  ;;  %v3952_v48 = vld [vmem:[%s7918_s21 + $0x18] sm:$0xff] }
0x314b   :  { %6660 = vmatprep.subr.mxu1 %v3952_v48 }
0x314c   :  { %6661 = vmatpush3.msra.mxu1 %v3952_v48 }
0x314d   :  { %v2637_v55 = vpop.permute.xlu0 %2636  ;;  %6662 = vmatprep.subr.mxu1 %v3951_v20 }
0x314e   :  { %2639 = vst.msk [vmem:[#allocation3] sm:$0x30] %vm776_vm4, %v2637_v55  ;;  %6663 = vmatpush3.msra.mxu1 %v3951_v20  ;;  %v4225_v20 = vld [vmem:[%s6038_s13 + $0x8] sm:$0xff] }
0x314f   :  { %6664 = vmatprep.subr.mxu1 %v3950_v38 }
0x3150   :  { %6665 = vmatpush3.msra.mxu1 %v3950_v38 }
0x3151   :  { %v3193_v25 = vpop.permute.xlu0 %3192  ;;  %6666 = vmatprep.subr.mxu1 %v3949_v42 }
0x3152   :  { %6667 = vmatpush3.msra.mxu1 %v3949_v42 }
0x3153   :  { %6685 = vmatprep.subr.mxu1 %v4230_v22 }
0x3155   :  { %v3638_v27 = vpop.permute.xlu0 %3637 }
0x31a4   :  { %v3856_v52 = vpop.permute.xlu1 %3855 }
0x31a5   :  { %v3858_v7 = vmul.f32 %v7142_v34, %v3856_v52  ;;  %v4139_v34 = vld [vmem:[%s6037_s2] sm:$0xff]  ;;  %s7210_s2 = smov 27  }
0x31a6   :  { %s8166_s5 = sld [smem:[%s8194_s0 + %s7210_s2]]  }
0x31a7   :  { %3860 = vrot.lane.b32.xlu1 %v3858_v7, %s7186_s25 }
0x31a8   :  { %v2526_v14 = vpop.permute.xlu1 %2525 }
0x31a9   :  { %2528 = vst.msk [vmem:[#allocation3 + $0x8] sm:$0x30] %vm664_vm9, %v2526_v14 }
0x31ac   :  { %v2973_v23 = vpop.permute.xlu1 %2972 }
0x31ad   :  { %2975 = vst.msk [vmem:[#allocation3 + $0x8] sm:$0x3] %vm1115_vm10, %v2973_v23 }
0x31ae   :  { %3083 = vst.msk [vmem:[#allocation3 + $0x8] sm:$0x3] %vm335_vm3, %v7805_v9 }
0x31b0   :  { %v3525_v26 = vpop.permute.xlu1 %3524 }
0x31b1   :  { %3527 = vst.msk [vmem:[#allocation3 + $0x8] sm:$0x30] %vm776_vm4, %v3525_v26  ;;  %v4224_v26 = vld [vmem:[%s6038_s13] sm:$0xff]  ;;  %s6051_s13 = sld [smem:[%s8194_s0 + %s7212_s10]]  }
0x31b4   :  { %v2413_v24 = vpop.permute.xlu1 %2412 }
0x31b5   :  { %2415 = vst.msk [vmem:[#allocation3] sm:$0xc] %vm550_vm7, %v2413_v24 }
0x31b6   :  { %3640 = vst.msk [vmem:[#allocation3] sm:$0xc] %vm890_vm6, %v3638_v27 }
0x31b8   :  { %v2861_v28 = vpop.permute.xlu1 %2860  ;;  %v3865_v30 = vld [vmem:[#allocation3 + $0x8] sm:$0xff] }
0x31b9   :  { %2863 = vst.msk [vmem:[#allocation3] sm:$0xc0] %vm1002_vm8, %v2861_v28  ;;  %6653 = vmatprep.subr.mxu0 %v3865_v30 }
0x31ba   :  { %3195 = vst.msk [vmem:[#allocation3] sm:$0xc0] %vm441_vm5, %v3193_v25  ;;  %6654 = vmatpush3.msra.mxu0 %v3865_v30 }
0x31bc   :  { %v3414_v9 = vpop.permute.xlu1 %3413 }
0x31bd   :  { %3416 = vst.msk [vmem:[#allocation3] sm:$0x30] %vm664_vm9, %v3414_v9 }
0x3219   :  { %v3861_v51 = vpop.permute.xlu1 %3860 }
0x321a   :  { %3863 = vst.msk [vmem:[#allocation3] sm:$0x3] %vm1115_vm10, %v3861_v51 }
0x3221   :  { %v3864_v32 = vld [vmem:[#allocation3] sm:$0xff] }
0x3222   :  { %6655 = vmatprep.subr.mxu0 %v3864_v32 }
0x3223   :  { %6656 = vmatpush3.msra.mxu0 %v3864_v32 }
0x3224   :  { %6658 = vmatmul.mubr.msk.f32.vlgmr.msra.gmra.mxu0 %vm232_vm2, %v3867_v35 }
0x3225   :  { %6675 = vmatprep.mubr.msk.f32.mxu0 %vm232_vm2, %v7949_v8 }
0x32e4   :  { %v7938_v6 = vpop.f32.mrf.mxu0 }
0x32e6   :  { %v7940_v44 = vpop.f32.mrf.mxu0 }
0x32e7   :  { %6668 = vmatprep.mubr.msk.f32.mxu1 %vm150_vm1, %v7940_v44 }
0x32e8   :  { %6669 = vmatmul.mubr.msk.f32.vlgmr.msra.gmra.mxu1 %vm150_vm1, %v7938_v6 }
0x32e9   :  { %6686 = vmatpush3.msra.mxu1 %v4230_v22 }
0x33a8   :  { %v6670_v43 = vpop.f32.mrf.mxu1 }
0x33a9   :  { %v4036_v18 = vsel %vm4034_vm11, %v6670_v43, -inf }
0x33aa   :  { %v4025_v45 = vpop.f32.mrf.mxu1 }
0x33ab   :  { %v4035_v47 = vsel %vm4034_vm11, %v4025_v45, -inf }
0x33ac   :  { %v4037_v3 = vmax.f32 %v4035_v47, %v4036_v18 }
0x33ae   :  { %v4038_v49 = vrot.slane %v4037_v3, 4 }
0x33b0   :  { %v4039_v4 = vmax.f32 %v4037_v3, %v4038_v49 }
0x33b2   :  { %v4040_v53 = vrot.slane %v4039_v4, 2 }
0x33b4   :  { %v4041_v54 = vmax.f32 %v4039_v4, %v4040_v53 }
0x33b6   :  { %v4042_v57 = vrot.slane %v4041_v54, 1 }
0x33b8   :  { %v4043_v58 = vmax.f32 %v4041_v54, %v4042_v57 }
0x33ba   :  { %v4044_v63 = vsub.f32 %v4025_v45, %v4043_v58  ;;  %v4045_v59 = vsub.f32 %v6670_v43, %v4043_v58 }
0x33bc   :  { %v4048_v17 = vmul.f32 1.442695, %v4045_v59  ;;  %v4046_v40 = vmul.f32 1.442695, %v4044_v63 }
0x33be   :  { %7145 = vpow2.f32 %v4048_v17 }
0x33bf   :  { %7147 = vpow2.f32 %v4046_v40 }
0x33cb   :  { %v7146_v1 = vpop.eup %7145 }
0x33cc   :  { %6671 = vmatprep.subr.mxu0 %v7146_v1  ;;  %v7148_v36 = vpop.eup %7147 }
0x33cd   :  { %6672 = vmatpush3.msra.mxu0 %v7146_v1 }
0x33ce   :  { %6673 = vmatprep.subr.mxu0 %v7148_v36 }
0x33cf   :  { %6674 = vmatpush3.msra.mxu0 %v7148_v36 }
0x33d0   :  { %6676 = vmatmul.mubr.msk.f32.vlgmr.msra.gmra.mxu0 %vm232_vm2, %v7955_v2 }
0x33d1   :  { %6682 = vmatprep.mubr.msk.f32.mxu0 %vm232_vm2, %v7949_v8 }
0x3490   :  { %v6677_v39 = vpop.f32.mrf.mxu0 }
0x3491   :  { %v4134_v62 = vmax.f32 %v6677_v39, 1e-30 }
0x3492   :  { %v4124_v37 = vpop.f32.mrf.mxu0 }
0x3493   :  { %7149 = vrcp.f32 %v4134_v62  ;;  %v4133_v5 = vmax.f32 %v4124_v37, 1e-30 }
0x3495   :  { %7151 = vrcp.f32 %v4133_v5 }
0x34a0   :  { %v7150_v10 = vpop.eup %7149 }
0x34a1   :  { %v4138_v60 = vmul.f32 %v7150_v10, %v7146_v1 }
0x34a2   :  { %v7152_v11 = vpop.eup %7151 }
0x34a3   :  { %v4142_v61 = vmul.f32 %v4140_v46, %v4138_v60  ;;  %v4137_v12 = vmul.f32 %v7152_v11, %v7148_v36 }
0x34a5   :  { %6678 = vmatprep.subr.mxu0 %v4142_v61  ;;  %v4141_v21 = vmul.f32 %v4139_v34, %v4137_v12 }
0x34a6   :  { %6679 = vmatpush3.msra.mxu0 %v4142_v61 }
0x34a7   :  { %6680 = vmatprep.subr.mxu0 %v4141_v21 }
0x34a8   :  { %6681 = vmatpush3.msra.mxu0 %v4141_v21 }
0x34a9   :  { %6683 = vmatmul.mubr.msk.f32.vlgmr.msra.gmra.mxu0 %vm232_vm2, %v7955_v2  ;;  %4344 = vmatprep.subr.mxu0 %v4319_v50 }
0x34aa   :  { %4345 = vmatpush1.msra.mxu0 %v4318_v56  ;;  %4384 = vmatprep.mubr.f32.mxu0 %v7177_v0 }
0x34ab   :  { %4346 = vmatprep.subr.mxu0 %v4317_v19 }
0x34ac   :  { %4347 = vmatpush1.msra.mxu0 %v4316_v29 }
0x34ad   :  { %4348 = vmatprep.subr.mxu0 %v4315_v31 }
0x34ae   :  { %4349 = vmatpush1.msra.mxu0 %v4314_v13 }
0x34af   :  { %4350 = vmatprep.subr.mxu0 %v4313_v15 }
0x34b0   :  { %4351 = vmatpush1.msra.mxu0 %v4312_v16 }
0x34b1   :  { %6132 = vmatmul.mubr.msk.f32.vlgmr.msra.gmra.mxu0 %vm150_vm1, %v7940_v44 }
0x34b2   :  { %4390 = vmatprep.mubr.f32.mxu0 %v7177_v0 }
0x34b5   :  { %6133 = vmatmul.mubr.msk.f32.gmra.mxu0 %vm150_vm1, %v7938_v6 }
0x3569   :  { %v6684_v33 = vpop.f32.mrf.mxu0 }
0x356a   :  { %v4219_v55 = vmax.f32 %v6684_v33, 1e-30 }
0x356b   :  { %v4209_v41 = vpop.f32.mrf.mxu0 }
0x356c   :  { %7153 = vrcp.f32 %v4219_v55  ;;  %v4218_v52 = vmax.f32 %v4209_v41, 1e-30  ;;  %v5139_v55 = vld [vmem:[%s8077_s22 + $0x18] sm:$0xff] }
0x356e   :  { %7155 = vrcp.f32 %v4218_v52  ;;  %v5138_v52 = vld [vmem:[%s8077_s22 + $0x10] sm:$0xff] }
0x3571   :  { %v7979_v7 = vpop.f32.mrf.mxu0 }
0x3572   :  { %4408 = vrot.lane.b32.xlu1 %v7979_v7, %s7184_s23 }
0x3573   :  { %v7986_v0 = vpop.f32.mrf.mxu0 }
0x3575   :  { %v7988_v14 = vpop.f32.mrf.mxu0 }
0x3576   :  { %4581 = vrot.lane.b32.xlu1 %v7979_v7, %s7182_s18  ;;  %4410 = vrot.lane.b32.xlu0 %v7988_v14, %s7184_s23 }
0x3577   :  { %v8002_v28 = vpop.f32.mrf.mxu0 }
0x3579   :  { %v7154_v48 = vpop.eup %7153 }
0x357a   :  { %4675 = vrot.lane.b32.xlu1 %v7979_v7, %s7186_s25  ;;  %4583 = vrot.lane.b32.xlu0 %v7988_v14, %s7182_s18  ;;  %v4223_v23 = vmul.f32 %v7154_v48, %v4142_v61  ;;  %v5316_v48 = vld [vmem:[%s6046_s3 + $0x18] sm:$0xff] }
0x357b   :  { %v7156_v25 = vpop.eup %7155 }
0x357c   :  { %v4222_v24 = vmul.f32 %v7156_v25, %v4141_v21  ;;  %v4227_v27 = vmul.f32 %v4225_v20, %v4223_v23  ;;  %v5228_v20 = vld [vmem:[%s6045_s29 + $0x10] sm:$0xff]  ;;  %v5227_v25 = vld [vmem:[%s6045_s29 + $0x8] sm:$0xff] }
0x357d   :  { %v5315_v23 = vld [vmem:[%s6046_s3 + $0x10] sm:$0xff] }
0x357e   :  { %4677 = vrot.lane.b32.xlu0 %v7988_v14, %s7186_s25  ;;  %4861 = vrot.lane.b32.xlu1 %v8002_v28, %s7184_s23  ;;  %v4226_v30 = vmul.f32 %v4224_v26, %v4222_v24  ;;  %4229 = vst.msk [vmem:[%s6055_s15 + $0x8] sm:$0xff] %vm4034_vm11, %v4227_v27  ;;  %v5314_v26 = vld [vmem:[%s6046_s3 + $0x8] sm:$0xff] }
0x357f   :  { %v5226_v24 = vld [vmem:[%s6045_s29] sm:$0xff] }
0x3580   :  { %4228 = vst.msk [vmem:[%s6055_s15] sm:$0xff] %vm4034_vm11, %v4226_v30  ;;  %6687 = vmatprep.mubr.msk.f32.mxu1 %vm4034_vm11, %v4226_v30  ;;  %s7206_s15 = smov 24  }
0x3581   :  { %6688 = vmatmul.mubr.msk.f32.vlgmr.msra.gmra.mxu1 %vm4034_vm11, %v4227_v27  ;;  %v5313_v27 = vld [vmem:[%s6046_s3] sm:$0xff]  ;;  %s6047_s16 = sld [smem:[%s8194_s0 + %s7206_s15]]  }
0x3582   :  { %4859 = vrot.lane.b32.xlu1 %v7986_v0, %s7184_s23  ;;  %4955 = vrot.lane.b32.xlu0 %v8002_v28, %s7182_s18  ;;  %s7214_s23 = smov 31  }
0x3583   :  { %s6054_s19 = sld [smem:[%s8194_s0 + %s7214_s23]]  }
0x3586   :  { %5047 = vrot.lane.b32.xlu1 %v7986_v0, %s7186_s25  ;;  %4953 = vrot.lane.b32.xlu0 %v7986_v0, %s7182_s18  ;;  %s7198_s18 = smov 17  }
0x3587   :  { %s8028_s17 = sld [smem:[%s8194_s0 + %s7198_s18]]  }
0x3588   :  { %s6053_s18 = sld [smem:[%s8194_s0 + %s7213_s24]]  }
0x358a   :  { %5049 = vrot.lane.b32.xlu0 %v8002_v28, %s7186_s25 }
0x358d   :  { %v6134_v47 = vld [vmem:[%s8028_s17 + $0x10] sm:$0xff]  ;;  %v6135_v49 = vld [vmem:[%s8028_s17 + $0x18] sm:$0xff]  ;;  %v4397_v58 = vld [vmem:[%s8028_s17] sm:$0xff] }
0x358e   :  { %v6144_v3 = vld [vmem:[%s8028_s17 + $0x30] sm:$0xff]  ;;  %v6145_v4 = vld [vmem:[%s8028_s17 + $0x38] sm:$0xff]  ;;  %v4398_v39 = vld [vmem:[%s8028_s17 + $0x8] sm:$0xff] }
0x358f   :  { %v6152_v40 = vld [vmem:[%s8028_s17 + $0x50] sm:$0xff]  ;;  %v6153_v62 = vld [vmem:[%s8028_s17 + $0x58] sm:$0xff]  ;;  %v6140_v5 = vld [vmem:[%s8028_s17 + $0x20] sm:$0xff] }
0x3590   :  { %v6160_v11 = vld [vmem:[%s8028_s17 + $0x70] sm:$0xff]  ;;  %v6141_v61 = vld [vmem:[%s8028_s17 + $0x28] sm:$0xff]  ;;  %v6161_v21 = vld [vmem:[%s8028_s17 + $0x78] sm:$0xff] }
0x3591   :  { %v6148_v56 = vld [vmem:[%s8028_s17 + $0x40] sm:$0xff]  ;;  %v6149_v31 = vld [vmem:[%s8028_s17 + $0x48] sm:$0xff] }
0x3592   :  { %v6156_v15 = vld [vmem:[%s8028_s17 + $0x60] sm:$0xff]  ;;  %v6157_v33 = vld [vmem:[%s8028_s17 + $0x68] sm:$0xff]  ;;  %s7207_s17 = smov 10  }
0x3593   :  { %s6033_s21 = sld [smem:[%s8194_s0 + %s7207_s17]]  }
0x35e4   :  { %v4409_v9 = vpop.permute.xlu1 %4408 }
0x35e8   :  { %v8022_v51 = vpop.permute.xlu1 %4581  ;;  %v4411_v32 = vpop.permute.xlu0 %4410 }
0x35e9   :  { %6690 = vmatprep.subr.mxu1 %v4411_v32 }
0x35ea   :  { %6691 = vmatpush3.msra.mxu1 %v4411_v32 }
0x35eb   :  { %6692 = vmatprep.subr.mxu1 %v4409_v9 }
0x35ec   :  { %v4584_v35 = vpop.permute.xlu0 %4583  ;;  %6693 = vmatpush3.msra.mxu1 %v4409_v9  ;;  %v4676_v38 = vpop.permute.xlu1 %4675 }
0x35ed   :  { %6697 = vmatprep.subr.mxu1 %v7988_v14 }
0x35f0   :  { %v4678_v42 = vpop.permute.xlu0 %4677  ;;  %v4862_v43 = vpop.permute.xlu1 %4861 }
0x35f1   :  { %6711 = vmatprep.subr.mxu0 %v4678_v42 }
0x35f2   :  { %6712 = vmatpush3.msra.mxu0 %v4678_v42 }
0x35f3   :  { %6713 = vmatprep.subr.mxu0 %v4676_v38 }
0x35f4   :  { %6714 = vmatpush3.msra.mxu0 %v4676_v38  ;;  %v8030_v45 = vpop.permute.xlu0 %4955  ;;  %v4860_v37 = vpop.permute.xlu1 %4859 }
0x35f5   :  { %6725 = vmatprep.subr.mxu0 %v4862_v43 }
0x35f8   :  { %v8043_v63 = vpop.permute.xlu0 %4953  ;;  %v5048_v50 = vpop.permute.xlu1 %5047 }
0x35fc   :  { %v5050_v10 = vpop.permute.xlu0 %5049 }
0x3641   :  { %v8032_v18 = vpop.f32.mrf.mxu1 }
0x3642   :  { %v4405_v59 = vmul.f32 %v8032_v18, %v6135_v49  ;;  %v4674_v17 = vmul.f32 %v8032_v18, %v6145_v4  ;;  %v4400_v46 = vmul.f32 %v8032_v18, %v4398_v39  ;;  %v4856_v60 = vmul.f32 %v8032_v18, %v6153_v62 }
0x3643   :  { %v8038_v53 = vpop.f32.mrf.mxu1  ;;  %v4580_v19 = vmul.f32 %v8032_v18, %v6141_v61  ;;  %v5046_v29 = vmul.f32 %v8032_v18, %v6161_v21  ;;  %v4768_v16 = vmul.f32 %v8032_v18, %v6149_v31  ;;  %v4952_v41 = vmul.f32 %v8032_v18, %v6157_v33  ;;  %v5510_v33 = vld [vmem:[%s6048_s14 + $0x18] sm:$0xff] }
0x3644   :  { %v4404_v54 = vmul.f32 %v6134_v47, %v8038_v53  ;;  %v4673_v57 = vmul.f32 %v6144_v3, %v8038_v53  ;;  %v4399_v1 = vmul.f32 %v4397_v58, %v8038_v53  ;;  %v4855_v36 = vmul.f32 %v6152_v40, %v8038_v53 }
0x3645   :  { %v4579_v34 = vmul.f32 %v6140_v5, %v8038_v53  ;;  %v5045_v12 = vmul.f32 %v6160_v11, %v8038_v53  ;;  %v4767_v13 = vmul.f32 %v6148_v56, %v8038_v53  ;;  %v4951_v22 = vmul.f32 %v6156_v15, %v8038_v53  ;;  %v5513_v15 = vld [vmem:[%s6048_s14 + $0x30] sm:$0xff] }
0x3646   :  { %6694 = vmatprep.mubr.msk.f32.mxu1 %vm232_vm2, %v4404_v54  ;;  %6715 = vmatprep.mubr.msk.f32.mxu0 %vm232_vm2, %v4673_v57  ;;  %v7204_v31 = vmov 0  }
0x3647   :  { %6695 = vmatmul.mubr.msk.f32.vlgmr.msra.gmra.mxu1 %vm232_vm2, %v4405_v59  ;;  %6716 = vmatmul.mubr.msk.f32.vlgmr.msra.gmra.mxu0 %vm232_vm2, %v4674_v17 }
0x3648   :  { %6698 = vmatpush3.msra.mxu1 %v7988_v14  ;;  %6726 = vmatpush3.msra.mxu0 %v4862_v43  ;;  %v5229_v14 = vld [vmem:[%s6045_s29 + $0x18] sm:$0xff] }
0x3649   :  { %6699 = vmatprep.subr.mxu1 %v7979_v7  ;;  %6701 = vmatprep.mubr.msk.f32.mxu1 %vm232_vm2, %v4399_v1 }
0x364a   :  { %6727 = vmatprep.subr.mxu0 %v4860_v37  ;;  %6729 = vmatprep.mubr.msk.f32.mxu0 %vm232_vm2, %v4855_v36 }
0x364b   :  { %6700 = vmatpush3.msra.mxu1 %v7979_v7  ;;  %6728 = vmatpush3.msra.mxu0 %v4860_v37  ;;  %v5137_v7 = vld [vmem:[%s8077_s22 + $0x8] sm:$0xff] }
0x364c   :  { %6704 = vmatprep.subr.mxu1 %v4584_v35  ;;  %6739 = vmatprep.subr.mxu0 %v5050_v10 }
0x364d   :  { %6702 = vmatmul.mubr.msk.f32.vlgmr.msra.gmra.mxu1 %vm232_vm2, %v4400_v46  ;;  %6730 = vmatmul.mubr.msk.f32.vlgmr.msra.gmra.mxu0 %vm232_vm2, %v4856_v60 }
0x364e   :  { %6705 = vmatpush3.msra.mxu1 %v4584_v35  ;;  %6740 = vmatpush3.msra.mxu0 %v5050_v10 }
0x364f   :  { %6706 = vmatprep.subr.mxu1 %v8022_v51  ;;  %6708 = vmatprep.mubr.msk.f32.mxu1 %vm232_vm2, %v4579_v34  ;;  %v6166_v34 = vld [vmem:[%s6044_s7] ss:$0 sm:$0xff] }
0x3650   :  { %6741 = vmatprep.subr.mxu0 %v5048_v50  ;;  %6743 = vmatprep.mubr.msk.f32.mxu0 %vm232_vm2, %v5045_v12 }
0x3651   :  { %6707 = vmatpush3.msra.mxu1 %v8022_v51  ;;  %6742 = vmatpush3.msra.mxu0 %v5048_v50  ;;  %v5311_v50 = vld [vmem:[%s6041_s11] sm:$0xff] }
0x3652   :  { %6718 = vmatprep.subr.mxu1 %v8002_v28  ;;  %6709 = vmatmul.mubr.msk.f32.vlgmr.msra.gmra.mxu1 %vm232_vm2, %v4580_v19 }
0x3653   :  { %6719 = vmatpush3.msra.mxu1 %v8002_v28  ;;  %6744 = vmatmul.mubr.msk.f32.vlgmr.msra.gmra.mxu0 %vm232_vm2, %v5046_v29  ;;  %v5312_v29 = vld [vmem:[%s6041_s11 + $0x8] sm:$0xff] }
0x3654   :  { %6720 = vmatprep.subr.mxu1 %v7986_v0  ;;  %6722 = vmatprep.mubr.msk.f32.mxu1 %vm232_vm2, %v4767_v13  ;;  %v5514_v13 = vld [vmem:[%s6048_s14 + $0x38] sm:$0xff] }
0x3655   :  { %6721 = vmatpush3.msra.mxu1 %v7986_v0  ;;  %v5136_v0 = vld [vmem:[%s8077_s22] sm:$0xff]  ;;  %6757 = vmatprep.subr.mxu0 %v5229_v14 }
0x3656   :  { %6732 = vmatprep.subr.mxu1 %v8030_v45  ;;  %6723 = vmatmul.mubr.msk.f32.vlgmr.msra.gmra.mxu1 %vm232_vm2, %v4768_v16  ;;  %v5512_v16 = vld [vmem:[%s6048_s14 + $0x28] sm:$0xff] }
0x3657   :  { %6733 = vmatpush3.msra.mxu1 %v8030_v45  ;;  %6736 = vmatprep.mubr.msk.f32.mxu1 %vm232_vm2, %v4951_v22  ;;  %v5511_v22 = vld [vmem:[%s6048_s14 + $0x20] sm:$0xff] }
0x3658   :  { %6734 = vmatprep.subr.mxu1 %v8043_v63  ;;  %6758 = vmatpush3.msra.mxu0 %v5229_v14  ;;  %v6173_v14 = vld [vmem:[%s6047_s16] ss:$0 sm:$0xff] }
0x3659   :  { %6735 = vmatpush3.msra.mxu1 %v8043_v63  ;;  %6759 = vmatprep.subr.mxu0 %v5228_v20 }
0x365a   :  { %6746 = vmatprep.subr.mxu1 %v5139_v55  ;;  %6737 = vmatmul.mubr.msk.f32.vlgmr.msra.gmra.mxu1 %vm232_vm2, %v4952_v41  ;;  %v5508_v41 = vld [vmem:[%s6048_s14 + $0x8] sm:$0xff] }
0x365b   :  { %6747 = vmatpush3.msra.mxu1 %v5139_v55  ;;  %6754 = vmatprep.mubr.msk.f32.mxu1 %vm150_vm1, %v7940_v44  ;;  %v5509_v55 = vld [vmem:[%s6048_s14 + $0x10] sm:$0xff] }
0x365c   :  { %6748 = vmatprep.subr.mxu1 %v5138_v52  ;;  %6760 = vmatpush3.msra.mxu0 %v5228_v20 }
0x365d   :  { %6749 = vmatpush3.msra.mxu1 %v5138_v52  ;;  %6761 = vmatprep.subr.mxu0 %v5227_v25  ;;  %v5507_v52 = vld [vmem:[%s6048_s14] sm:$0xff] }
0x365e   :  { %6750 = vmatprep.subr.mxu1 %v5137_v7  ;;  %6762 = vmatpush3.msra.mxu0 %v5227_v25 }
0x365f   :  { %6751 = vmatpush3.msra.mxu1 %v5137_v7  ;;  %6763 = vmatprep.subr.mxu0 %v5226_v24 }
0x3660   :  { %6752 = vmatprep.subr.mxu1 %v5136_v0  ;;  %6764 = vmatpush3.msra.mxu0 %v5226_v24 }
0x3661   :  { %6753 = vmatpush3.msra.mxu1 %v5136_v0  ;;  %6888 = vset.pattern.permute.xlu1 %v7204_v31 }
0x3662   :  { %6755 = vmatmul.mubr.msk.f32.vlgmr.msra.gmra.mxu1 %vm150_vm1, %v7938_v6  ;;  %6768 = vmatprep.subr.mxu1 %v5316_v48 }
0x3663   :  { %6769 = vmatpush3.msra.mxu1 %v5316_v48  ;;  %6887 = vset.pattern.permute.xlu0 %v7204_v31  ;;  %v5803_v31 = vld [vmem:[%s8166_s5 + $0x8] sm:$0xff] }
0x3664   :  { %6770 = vmatprep.subr.mxu1 %v5315_v23 }
0x3665   :  { %6771 = vmatpush3.msra.mxu1 %v5315_v23 }
0x3666   :  { %6772 = vmatprep.subr.mxu1 %v5314_v26 }
0x3667   :  { %6773 = vmatpush3.msra.mxu1 %v5314_v26 }
0x3668   :  { %6774 = vmatprep.subr.mxu1 %v5313_v27 }
0x3669   :  { %6775 = vmatpush3.msra.mxu1 %v5313_v27  ;;  %v5492_v27 = vld [vmem:[%s6033_s21] sm:$0xff] }
0x3707   :  { %v6696_v28 = vpop.f32.mrf.mxu1  ;;  %v6717_v51 = vpop.f32.mrf.mxu0 }
0x3709   :  { %v4486_v30 = vpop.f32.mrf.mxu1  ;;  %v4753_v38 = vpop.f32.mrf.mxu0 }
0x370d   :  { %v6703_v9 = vpop.f32.mrf.mxu1  ;;  %v6731_v49 = vpop.f32.mrf.mxu0 }
0x370e   :  { %v4573_v35 = vadd.f32 %v6703_v9, %v6696_v28  ;;  %v5493_v28 = vld [vmem:[%s6033_s21 + $0x8] sm:$0xff] }
0x370f   :  { %v4567_v32 = vpop.f32.mrf.mxu1  ;;  %v4937_v63 = vpop.f32.mrf.mxu0 }
0x3710   :  { %v4568_v43 = vadd.f32 %v4567_v32, %v4486_v30 }
0x3712   :  { %v6710_v42 = vpop.f32.mrf.mxu1 }
0x3713   :  { %v4669_v45 = vadd.f32 %v6710_v42, %v4573_v35  ;;  %v6745_v36 = vpop.f32.mrf.mxu0 }
0x3714   :  { %v4659_v18 = vpop.f32.mrf.mxu1 }
0x3715   :  { %v4668_v47 = vadd.f32 %v4659_v18, %v4568_v43  ;;  %v4763_v3 = vadd.f32 %v6717_v51, %v4669_v45  ;;  %v5125_v37 = vpop.f32.mrf.mxu0 }
0x3716   :  { %v6724_v4 = vpop.f32.mrf.mxu1 }
0x3717   :  { %v4851_v53 = vadd.f32 %v6724_v4, %v4763_v3  ;;  %v4762_v54 = vadd.f32 %v4753_v38, %v4668_v47  ;;  %v6181_v3 = vld [vmem:[%s6034_s1] ss:$0 sm:$0xff] }
0x3718   :  { %v4841_v57 = vpop.f32.mrf.mxu1 }
0x3719   :  { %v4850_v58 = vadd.f32 %v4841_v57, %v4762_v54  ;;  %v4947_v59 = vadd.f32 %v6731_v49, %v4851_v53 }
0x371a   :  { %v6738_v17 = vpop.f32.mrf.mxu1 }
0x371b   :  { %v4946_v40 = vadd.f32 %v4937_v63, %v4850_v58  ;;  %v5041_v39 = vadd.f32 %v6738_v17, %v4947_v59  ;;  %v5702_v17 = vmul.f32 %v6181_v3, %v7955_v2  ;;  %v5809_v2 = vld [vmem:[%s8166_s5 + $0x38] sm:$0xff] }
0x371c   :  { %v5031_v1 = vpop.f32.mrf.mxu1 }
0x371d   :  { %v5040_v62 = vadd.f32 %v5031_v1, %v4946_v40  ;;  %v5135_v5 = vadd.f32 %v6745_v36, %v5041_v39  ;;  %v5701_v40 = vmul.f32 %v6181_v3, %v7949_v8 }
0x371f   :  { %v5134_v46 = vadd.f32 %v5125_v37, %v5040_v62 }
0x3722   :  { %v6756_v10 = vpop.f32.mrf.mxu1 }
0x3723   :  { %v5216_v60 = vadd.f32 %v6756_v10, %v5135_v5 }
0x3724   :  { %v5206_v11 = vpop.f32.mrf.mxu1 }
0x3725   :  { %v5215_v61 = vadd.f32 %v5206_v11, %v5134_v46  ;;  %v5225_v21 = vadd.f32 %v6166_v34, %v5216_v60 }
0x3727   :  { %v5224_v12 = vadd.f32 %v6166_v34, %v5215_v61 }
0x3729   :  { %6765 = vmatprep.mubr.msk.f32.mxu0 %vm150_vm1, %v5224_v12  ;;  %6776 = vmatprep.mubr.msk.f32.mxu1 %vm150_vm1, %v5224_v12 }
0x372a   :  { %6766 = vmatmul.mubr.msk.f32.vlgmr.msra.gmra.mxu0 %vm150_vm1, %v5225_v21  ;;  %6777 = vmatmul.mubr.msk.f32.vlgmr.msra.gmra.mxu1 %vm150_vm1, %v5225_v21  ;;  %v5808_v21 = vld [vmem:[%s8166_s5 + $0x30] sm:$0xff] }
0x372b   :  { %6783 = vmatprep.mubr.msk.f32.mxu0 %vm232_vm2, %v5311_v50  ;;  %v5807_v50 = vld [vmem:[%s8166_s5 + $0x28] sm:$0xff] }
0x37ea   :  { %v6767_v56 = vpop.f32.mrf.mxu0  ;;  %v6778_v7 = vpop.f32.mrf.mxu1 }
0x37eb   :  { %6779 = vmatprep.subr.mxu0 %v6767_v56 }
0x37ec   :  { %v5302_v19 = vpop.f32.mrf.mxu0  ;;  %6780 = vmatpush3.msra.mxu0 %v6767_v56  ;;  %v5383_v20 = vpop.f32.mrf.mxu1  ;;  %v5806_v56 = vld [vmem:[%s8166_s5 + $0x20] sm:$0xff] }
0x37ed   :  { %6781 = vmatprep.subr.mxu0 %v5302_v19 }
0x37ee   :  { %6782 = vmatpush3.msra.mxu0 %v5302_v19  ;;  %v5805_v19 = vld [vmem:[%s8166_s5 + $0x18] sm:$0xff] }
0x37ef   :  { %6784 = vmatmul.mubr.msk.f32.vlgmr.msra.gmra.mxu0 %vm232_vm2, %v5312_v29  ;;  %6786 = vmatprep.subr.mxu0 %v5514_v13  ;;  %v5804_v29 = vld [vmem:[%s8166_s5 + $0x10] sm:$0xff] }
0x37f0   :  { %6787 = vmatpush3.msra.mxu0 %v5514_v13  ;;  %v5802_v13 = vld [vmem:[%s8166_s5] sm:$0xff] }
0x37f1   :  { %6788 = vmatprep.subr.mxu0 %v5513_v15 }
0x37f2   :  { %6789 = vmatpush3.msra.mxu0 %v5513_v15 }
0x37f3   :  { %6790 = vmatprep.subr.mxu0 %v5512_v16 }
0x37f4   :  { %6791 = vmatpush3.msra.mxu0 %v5512_v16 }
0x37f5   :  { %6792 = vmatprep.subr.mxu0 %v5511_v22 }
0x37f6   :  { %6793 = vmatpush3.msra.mxu0 %v5511_v22  ;;  %v5903_v22 = vld [vmem:[%s6052_s9 + $0x18] sm:$0xff] }
0x37f7   :  { %6794 = vmatprep.subr.mxu0 %v5510_v33 }
0x37f8   :  { %6795 = vmatpush3.msra.mxu0 %v5510_v33  ;;  %v5902_v33 = vld [vmem:[%s6052_s9 + $0x10] sm:$0xff] }
0x37f9   :  { %6796 = vmatprep.subr.mxu0 %v5509_v55 }
0x37fa   :  { %6797 = vmatpush3.msra.mxu0 %v5509_v55  ;;  %v5901_v55 = vld [vmem:[%s6052_s9 + $0x8] sm:$0xff] }
0x37fb   :  { %6798 = vmatprep.subr.mxu0 %v5508_v41 }
0x37fc   :  { %6799 = vmatpush3.msra.mxu0 %v5508_v41  ;;  %v5900_v41 = vld [vmem:[%s6052_s9] sm:$0xff] }
0x37fd   :  { %6800 = vmatprep.subr.mxu0 %v5507_v52 }
0x37fe   :  { %6801 = vmatpush3.msra.mxu0 %v5507_v52  ;;  %v6184_v52 = vld [vmem:[%s6051_s13] ss:$0 sm:$0xff] }
0x37ff   :  { %6838 = vmatprep.subr.mxu0 %v5903_v22 }
0x38af   :  { %v6785_v0 = vpop.f32.mrf.mxu0 }
0x38b0   :  { %v5470_v48 = vadd.f32 %v6785_v0, %v6778_v7 }
0x38b1   :  { %v5464_v23 = vpop.f32.mrf.mxu0 }
0x38b2   :  { %v5481_v25 = vadd.f32 %v6173_v14, %v5470_v48  ;;  %v5465_v26 = vadd.f32 %v5464_v23, %v5383_v20 }
0x38b4   :  { %v5480_v24 = vadd.f32 %v6173_v14, %v5465_v26  ;;  %5486 = vrot.lane.b32.xlu1 %v5481_v25, %s7186_s25  ;;  %v6187_v25 = vld [vmem:[%s6053_s18] ss:$0 sm:$0xff] }
0x38b6   :  { %5484 = vrot.lane.b32.xlu0 %v5480_v24, %s7186_s25  ;;  %s7208_s25 = smov 26  }
0x38b7   :  { %s6049_s27 = sld [smem:[%s8194_s0 + %s7208_s25]]  }
0x38b8   :  { %5497 = vperm.xlu1 %6888, %v5492_v27  }
0x38ba   :  { %5502 = vperm.xlu0 %6887, %v5493_v28  }
0x3926   :  { %v5487_v30 = vpop.permute.xlu1 %5486 }
0x3927   :  { %v5491_v32 = vsel %vm150_vm1, %v7938_v6, %v5487_v30 }
0x3928   :  { %v5485_v9 = vpop.permute.xlu0 %5484 }
0x3929   :  { %v5490_v51 = vsel %vm150_vm1, %v7940_v44, %v5485_v9  ;;  %v6174_v44 = vld [vmem:[%s6049_s27] ss:$0 sm:$0xff] }
0x392a   :  { %6802 = vmatprep.mubr.msk.f32.mxu0 %vm5522_vm12, %v5490_v51 }
0x392b   :  { %6803 = vmatmul.mubr.msk.f32.vlgmr.msra.gmra.mxu0 %vm5522_vm12, %v5491_v32 }
0x392c   :  { %6839 = vmatpush3.msra.mxu0 %v5903_v22 }
0x392d   :  { %6840 = vmatprep.subr.mxu0 %v5902_v33 }
0x392e   :  { %6841 = vmatpush3.msra.mxu0 %v5902_v33 }
0x392f   :  { %6842 = vmatprep.subr.mxu0 %v5901_v55 }
0x3930   :  { %6843 = vmatpush3.msra.mxu0 %v5901_v55 }
0x3931   :  { %6844 = vmatprep.subr.mxu0 %v5900_v41 }
0x3932   :  { %6845 = vmatpush3.msra.mxu0 %v5900_v41 }
0x3933   :  { %v5498_v35 = vpop.permute.xlu1 %5497 }
0x3934   :  { %v5505_v43 = vmul.f32 %v5498_v35, %v5490_v51 }
0x3935   :  { %v5503_v38 = vpop.permute.xlu0 %5502 }
0x3936   :  { %v5506_v42 = vmul.f32 %v5503_v38, %v5491_v32 }
0x3938   :  { %6805 = vmatprep.subr.msk.mxu1 %vm5522_vm12, %v5506_v42 }
0x3939   :  { %6806 = vmatpush3.xpose.msk.msra.mxu1 %vm5522_vm12, %v5506_v42 }
0x393a   :  { %6807 = vmatprep.subr.msk.mxu1 %vm5522_vm12, %v5505_v43 }
0x393d   :  { %6808 = vmatpush3.xpose.msk.msra.mxu1 %vm5522_vm12, %v5505_v43 }
0x393e   :  { %6812 = vmatprep.subr.mxu1 %v5491_v32 }
0x39eb   :  { %v6804_v6 = vpop.f32.mrf.mxu0 }
0x39ec   :  { %v5601_v47 = vadd.f32 %v6804_v6, %v6174_v44 }
0x39ed   :  { %v5595_v45 = vpop.f32.mrf.mxu0 }
0x39ee   :  { %v5596_v18 = vadd.f32 %v6174_v44, %v5595_v45 }
0x39f0   :  { %6809 = vmatprep.mubr.msk.f32.mxu1 %vm5522_vm12, %v5596_v18 }
0x39f1   :  { %6810 = vmatmul.mubr.msk.f32.vlgmr.msra.gmra.mxu1 %vm5522_vm12, %v5601_v47 }
0x39f2   :  { %6813 = vmatpush3.msra.mxu1 %v5491_v32 }
0x39f3   :  { %6814 = vmatprep.subr.mxu1 %v5490_v51 }
0x39f4   :  { %6815 = vmatpush3.msra.mxu1 %v5490_v51 }
0x39f5   :  { %6819 = vmatprep.subr.mxu1 %v5809_v2 }
0x3ab1   :  { %v6811_v49 = vpop.f32.mrf.mxu1 }
0x3ab2   :  { %v5698_v4 = vmul.f32 %v6811_v49, %v6181_v3 }
0x3ab3   :  { %v5682_v53 = vpop.f32.mrf.mxu1 }
0x3ab4   :  { %7157 = vtanh.f32 %v5698_v4  ;;  %v5697_v54 = vmul.f32 %v6181_v3, %v5682_v53 }
0x3ab6   :  { %7159 = vtanh.f32 %v5697_v54 }
0x3ac1   :  { %v7158_v57 = vpop.eup %7157 }
0x3ac2   :  { %v5705_v58 = vmul.f32 1.442695, %v7158_v57 }
0x3ac3   :  { %v7160_v63 = vpop.eup %7159 }
0x3ac4   :  { %7161 = vpow2.f32 %v5705_v58  ;;  %v5703_v59 = vmul.f32 1.442695, %v7160_v63 }
0x3ac6   :  { %7163 = vpow2.f32 %v5703_v59 }
0x3ad1   :  { %v7162_v1 = vpop.eup %7161 }
0x3ad2   :  { %v5708_v36 = vmul.f32 %v7162_v1, %v5702_v17 }
0x3ad3   :  { %v7164_v39 = vpop.eup %7163 }
0x3ad4   :  { %v5712_v62 = vsel %vm232_vm2, %v5708_v36, 0.0  ;;  %v5707_v37 = vmul.f32 %v7164_v39, %v5701_v40 }
0x3ad5   :  { %5713 = vadd.xlane.f32.xlu0 %v5712_v62 }
0x3ad6   :  { %v5709_v5 = vsel %vm232_vm2, %v5707_v37, 0.0 }
0x3ad7   :  { %5710 = vadd.xlane.f32.xlu1 %v5709_v5 }
0x3b5e   :  { %v5714_v8 = vpop.xlane.xlu0 %5713 }
0x3b5f   :  { %v5716_v10 = vmax.f32 %v5714_v8, 1e-30 }
0x3b60   :  { %v5711_v46 = vpop.xlane.xlu1 %5710 }
0x3b61   :  { %v5715_v60 = vmax.f32 %v5711_v46, 1e-30  ;;  %7165 = vrcp.f32 %v5716_v10 }
0x3b63   :  { %7167 = vrcp.f32 %v5715_v60 }
0x3b6e   :  { %v7166_v11 = vpop.eup %7165 }
0x3b6f   :  { %v5720_v12 = vmul.f32 %v7166_v11, %v5708_v36 }
0x3b70   :  { %v7168_v34 = vpop.eup %7167 }
0x3b71   :  { %v5719_v61 = vmul.f32 %v7168_v34, %v5707_v37 }
0x3b73   :  { %6816 = vmatprep.mubr.msk.f32.mxu1 %vm232_vm2, %v5719_v61 }
0x3b74   :  { %6817 = vmatmul.mubr.msk.f32.vlgmr.msra.gmra.mxu1 %vm232_vm2, %v5720_v12 }
0x3b75   :  { %6820 = vmatpush3.msra.mxu1 %v5809_v2 }
0x3b76   :  { %6821 = vmatprep.subr.mxu1 %v5808_v21 }
0x3b77   :  { %6822 = vmatpush3.msra.mxu1 %v5808_v21 }
0x3b78   :  { %6823 = vmatprep.subr.mxu1 %v5807_v50 }
0x3b79   :  { %6824 = vmatpush3.msra.mxu1 %v5807_v50 }
0x3b7a   :  { %6825 = vmatprep.subr.mxu1 %v5806_v56 }
0x3b7b   :  { %6826 = vmatpush3.msra.mxu1 %v5806_v56 }
0x3b7c   :  { %6827 = vmatprep.subr.mxu1 %v5805_v19 }
0x3b7d   :  { %6828 = vmatpush3.msra.mxu1 %v5805_v19 }
0x3b7e   :  { %6829 = vmatprep.subr.mxu1 %v5804_v29 }
0x3b7f   :  { %6830 = vmatpush3.msra.mxu1 %v5804_v29 }
0x3b80   :  { %6831 = vmatprep.subr.mxu1 %v5803_v31 }
0x3b81   :  { %6832 = vmatpush3.msra.mxu1 %v5803_v31 }
0x3b82   :  { %6833 = vmatprep.subr.mxu1 %v5802_v13 }
0x3b83   :  { %6834 = vmatpush3.msra.mxu1 %v5802_v13 }
0x3c34   :  { %v6818_v15 = vpop.f32.mrf.mxu1 }
0x3c36   :  { %v5793_v16 = vpop.f32.mrf.mxu1 }
0x3c37   :  { %6835 = vmatprep.mubr.msk.f32.mxu1 %vm5522_vm12, %v5793_v16 }
0x3c38   :  { %6836 = vmatmul.mubr.msk.f32.vlgmr.msra.gmra.mxu1 %vm5522_vm12, %v6818_v15 }
0x3cf8   :  { %v6837_v7 = vpop.f32.mrf.mxu1 }
0x3cf9   :  { %v5895_v0 = vadd.f32 %v6837_v7, %v6184_v52 }
0x3cfa   :  { %v5889_v14 = vpop.f32.mrf.mxu1 }
0x3cfb   :  { %v5890_v48 = vadd.f32 %v6184_v52, %v5889_v14  ;;  %v5899_v23 = vmax.f32 %v5895_v0, 0.0 }
0x3cfd   :  { %v5898_v20 = vmax.f32 %v5890_v48, 0.0 }
0x3cff   :  { %6846 = vmatprep.mubr.msk.f32.mxu0 %vm150_vm1, %v5898_v20 }
0x3d00   :  { %6847 = vmatmul.mubr.msk.f32.vlgmr.msra.gmra.mxu0 %vm150_vm1, %v5899_v23 }
0x3dc0   :  { %v6848_v26 = vpop.f32.mrf.mxu0 }
0x3dc1   :  { %v5989_v24 = vadd.f32 %v6848_v26, %v6187_v25 }
0x3dc2   :  { %v5983_v27 = vpop.f32.mrf.mxu0 }
0x3dc3   :  { %v5984_v28 = vadd.f32 %v6187_v25, %v5983_v27  ;;  %5994 = vmax.xlane.f32.xlu1 %v5989_v24 }
0x3dc5   :  { %5992 = vmax.xlane.f32.xlu0 %v5984_v28 }
0x3e4c   :  { %v5995_v30 = vpop.xlane.xlu1 %5994 }
0x3e4d   :  { %v5997_v9 = vsub.f32 %v5989_v24, %v5995_v30 }
0x3e4e   :  { %v5993_v51 = vpop.xlane.xlu0 %5992 }
0x3e4f   :  { %v6000_v32 = vmul.f32 1.442695, %v5997_v9  ;;  %v5996_v35 = vsub.f32 %v5984_v28, %v5993_v51 }
0x3e51   :  { %7169 = vpow2.f32 %v6000_v32  ;;  %v5998_v38 = vmul.f32 1.442695, %v5996_v35 }
0x3e53   :  { %7171 = vpow2.f32 %v5998_v38 }
0x3e5e   :  { %v7170_v42 = vpop.eup %7169 }
0x3e5f   :  { %6004 = vadd.xlane.f32.xlu1 %v7170_v42 }
0x3e60   :  { %v7172_v43 = vpop.eup %7171 }
0x3e61   :  { %6002 = vadd.xlane.f32.xlu0 %v7172_v43 }
0x3ee8   :  { %v6005_v6 = vpop.xlane.xlu1 %6004 }
0x3ee9   :  { %7173 = vlog2.f32 %v6005_v6 }
0x3eea   :  { %v6003_v44 = vpop.xlane.xlu0 %6002 }
0x3eeb   :  { %7175 = vlog2.f32 %v6003_v44 }
0x3ef6   :  { %v7174_v45 = vpop.eup %7173 }
0x3ef7   :  { %v6009_v18 = vmul.f32 0.6931472, %v7174_v45 }
0x3ef8   :  { %v7176_v47 = vpop.eup %7175 }
0x3ef9   :  { %v6011_v3 = vadd.f32 %v6009_v18, %v5995_v30  ;;  %v6007_v49 = vmul.f32 0.6931472, %v7176_v47 }
0x3efb   :  { %v6013_v4 = vsub.f32 %v5989_v24, %v6011_v3  ;;  %v6010_v53 = vadd.f32 %v6007_v49, %v5993_v51 }
0x3efd   :  { %6015 = vst [vmem:[%s6054_s19 + $0x8] sm:$0xff] %v6013_v4  ;;  %v6012_v54 = vsub.f32 %v5984_v28, %v6010_v53 }
0x3eff   :  { %6014 = vst [vmem:[%s6054_s19] sm:$0xff] %v6012_v54 }

</bundles_post_ra>
